<compile_context>
chip_gen: v7x
topology: tpu7x:2x2x1
jax: 0.10.0
libtpu: 0.0.40
codegen_flags: <defaults>
</compile_context>

<pallas_src>
import functools

import jax
import jax.numpy as jnp
from jax.experimental import pallas as pl
from jax.experimental.pallas import tpu as pltpu


def _head_kernel(x_ref, w1_ref, b1_ref, w2t_ref, b2_ref, out_ref, *,
                 alpha, inner, finalize):
    """One hidden tile of Linear2(Dropout(PReLU(Linear1(flatten(x)))))."""
    i = pl.program_id(0)          # hidden-dim shard (parallel across TCs on v7x)
    j = pl.program_id(1)          # reduction step within the shard
    blk = i * inner + j           # global hidden-tile index

    @pl.when(j == 0)
    def _():
        out_ref[...] = jnp.zeros_like(out_ref)

    # Linear1 tile on the MXU: bf16 x bf16 -> f32 accumulation.
    h = jnp.dot(x_ref[...], w1_ref[...], preferred_element_type=jnp.float32)
    h = h + b1_ref[blk]                         # (1, tn) bias slice, VMEM-resident
    # PReLU with a single shared slope (torch.nn.PReLU() default, num_parameters=1).
    h = jnp.where(h > 0, h, alpha * h)
    # TODO(synk): nn.Dropout() train-mode masking omitted (treated as eval-mode identity).

    w2_tile = w2t_ref[blk]                      # (O, tn), VMEM-resident
    if w2_tile.shape[0] == 1:
        # num_classes == 1: VPU multiply + lane reduction; keeps the MXU free for
        # the w1 stream (fully hidden under the w1 DMA on every generation).
        out_ref[...] += jnp.sum(h * w2_tile, axis=-1, keepdims=True)
    else:
        out_ref[...] += jax.lax.dot_general(
            h, w2_tile, (((1,), (1,)), ((), ())),
            preferred_element_type=jnp.float32)

    if finalize:
        # Single-shard case (v5e/v6e): fold bias2 + final PReLU into the kernel.
        @pl.when(j == pl.num_programs(1) - 1)
        def _():
            z = out_ref[...] + b2_ref[...]
            out_ref[...] = jnp.where(z > 0, z, alpha * z)


def _default_n_par():
    """2 hidden-dim shards on dual-TensorCore chips (v7x), else 1."""
    try:
        kind = jax.devices()[0].device_kind.lower()
    except Exception:
        return 1
    return 2 if ("v7" in kind or "7x" in kind) else 1


def prepare_head_params(w1, b1, w2, b2, *, tn=1024, n_par=None):
    """One-time (model-load) relayout of the head weights into kernel layout.

    w1: (K, H) Linear1 weight, stored transposed vs PyTorch (y = x @ W + b).
    b1: (H,)   w2: (H, O)   b2: (O,)
    """
    K, H = w1.shape
    O = w2.shape[1]
    if n_par is None:
        n_par = _default_n_par()
    if H % (n_par * tn) != 0:
        # Fallback: pick a 128-lane tile that divides H with a single shard.
        n_par = 1
        for cand in (1024, 512, 256, 128):
            if H % cand == 0:
                tn = cand
                break
        else:
            raise ValueError(f"hidden dim {H} is not divisible by a 128-lane tile")
    inner = H // (n_par * tn)
    n_blocks = n_par * inner

    # Dominant HBM stream: tile-major bf16 w1 -> one contiguous slab per grid step.
    w1_t = jnp.transpose(
        w1.astype(jnp.bfloat16).reshape(K, n_blocks, tn), (1, 0, 2))
    b1_r = b1.astype(jnp.float32).reshape(n_blocks, 1, tn)
    # (H, O) -> (n_blocks, O, tn): lane-dense per-tile rows of w2^T.
    w2t_r = jnp.transpose(
        w2.astype(jnp.float32).T.reshape(O, n_blocks, tn), (1, 0, 2))
    b2_r = b2.astype(jnp.float32).reshape(1, O)

    return dict(w1=w1_t, b1=b1_r, w2t=w2t_r, b2=b2_r,
                K=K, H=H, O=O, tn=tn, n_par=n_par, inner=inner)


def unest_head_apply(x_feat, params, prelu_alpha):
    """x_feat: (B, C, 3, 3, 3) frozen-backbone features.  Returns (B, num_classes)."""
    B = x_feat.shape[0]
    # torch.nn.Flatten (row-major NCDHW); bf16 feed keeps the MXU on its native path.
    x = x_feat.reshape(B, -1).astype(jnp.bfloat16)
    K, H, O = params["K"], params["H"], params["O"]
    tn, n_par, inner = params["tn"], params["n_par"], params["inner"]
    n_blocks = n_par * inner
    assert x.shape[1] == K, "flattened feature size mismatch with Linear1"

    alpha = float(prelu_alpha)
    finalize = (n_par == 1)
    kernel = functools.partial(_head_kernel, alpha=alpha, inner=inner,
                               finalize=finalize)

    if finalize:
        out_shape = jax.ShapeDtypeStruct((B, O), jnp.float32)
        out_spec = pl.BlockSpec((B, O), lambda i, j: (0, 0))
    else:
        out_shape = jax.ShapeDtypeStruct((n_par, B, O), jnp.float32)
        out_spec = pl.BlockSpec((None, B, O), lambda i, j: (i, 0, 0))

    # Actual double-buffered footprint + small headroom (v7x has 64 MiB VMEM/TC).
    footprint = 2 * (K * tn * 2 + B * K * 2 + n_blocks * tn * 4
                     + n_blocks * O * tn * 4 + O * 4 + n_par * B * O * 4)
    vmem_limit = int(footprint + (4 << 20))

    cost = pl.CostEstimate(
        flops=2 * B * K * H + 2 * B * H * O,
        transcendentals=0,
        bytes_accessed=(K * H * 2 + B * K * 2 + H * 4 + H * O * 4
                        + O * 4 + n_par * B * O * 4))

    out = pl.pallas_call(
        kernel,
        out_shape=out_shape,
        grid_spec=pltpu.PrefetchScalarGridSpec(
            num_scalar_prefetch=0,
            grid=(n_par, inner),
            in_specs=[
                pl.BlockSpec((B, K), lambda i, j: (0, 0)),                # x (resident)
                pl.BlockSpec((None, K, tn),                               # w1 tile: one
                             lambda i, j: (i * inner + j, 0, 0)),         #  contiguous bf16 slab
                pl.BlockSpec((n_blocks, 1, tn), lambda i, j: (0, 0, 0)),  # b1 (resident)
                pl.BlockSpec((n_blocks, O, tn), lambda i, j: (0, 0, 0)),  # w2^T (resident)
                pl.BlockSpec((1, O), lambda i, j: (0, 0)),                # b2 (resident)
            ],
            out_specs=out_spec,
        ),
        compiler_params=pltpu.CompilerParams(
            dimension_semantics=("parallel", "arbitrary"),
            vmem_limit_bytes=vmem_limit),
        cost_estimate=cost,
    )(x, params["w1"], params["b1"], params["w2t"], params["b2"])

    if finalize:
        return out
    # Dual-TensorCore path (v7x): tiny epilogue combines the per-core halves.
    z = out.sum(axis=0) + params["b2"]
    return jnp.where(z > 0, z, alpha * z)


def frozen_backbone_stub(x_in, proj_w, proj_b):
    # TODO(synk): the frozen UNesT backbone (model_ft.nestViT + model_ft.encoder10) is an
    # external MONAI/UNesT dependency loaded from './models/model.pt' and cannot be
    # reproduced here; this deterministic pool + channel-projection stub only supplies a
    # (B, C_feat, 3, 3, 3) feature map of the shape the head expects.
    B, C_in, D, Hs, W = x_in.shape
    f = x_in.reshape(B, C_in, 3, D // 3, 3, Hs // 3, 3, W // 3).mean(axis=(3, 5, 7))
    f = jnp.einsum("bcdhw,co->bodhw", f, proj_w) + proj_b[None, :, None, None, None]
    return f


if __name__ == "__main__":
    key = jax.random.PRNGKey(0)

    # Small shapes consistent with the module:
    #   in_channels=1 volume input; encoder10 features at 3x3x3 spatial;
    #   linear1: C_feat*27 -> 1024*4; linear2: 1024*4 -> num_classes=1.
    B, C_in, S = 2, 1, 24
    C_feat = 64                 # stand-in for model_ft.encoder10.out_channels (scaled down)
    K = C_feat * 3 * 3 * 3      # 1728
    H = 1024 * 4                # 4096, exactly as in the module
    O = 1                       # num_classes
    PRELU_ALPHA = 0.25          # torch.nn.PReLU default init

    ks = jax.random.split(key, 7)
    x_in = jax.random.normal(ks[0], (B, C_in, S, S, S), jnp.float32)
    proj_w = jax.random.normal(ks[1], (C_in, C_feat), jnp.float32) * 0.1
    proj_b = jax.random.normal(ks[2], (C_feat,), jnp.float32) * 0.01
    w1 = jax.random.normal(ks[3], (K, H), jnp.float32) * (1.0 / jnp.sqrt(K))
    b1 = jax.random.normal(ks[4], (H,), jnp.float32) * 0.01
    w2 = jax.random.normal(ks[5], (H, O), jnp.float32) * (1.0 / jnp.sqrt(H))
    b2 = jax.random.normal(ks[6], (O,), jnp.float32) * 0.01

    # One-time weight relayout (model-load time, outside the per-call hot path).
    head_params = prepare_head_params(w1, b1, w2, b2)
    head_params = jax.tree_util.tree_map(
        lambda a: jax.block_until_ready(a) if isinstance(a, jax.Array) else a,
        head_params)

    x_feat = frozen_backbone_stub(x_in, proj_w, proj_b)
    logits = unest_head_apply(x_feat, head_params, PRELU_ALPHA)
    logits = jax.block_until_ready(logits)

    # Plain-JAX reference of the head (bf16-cast inputs, f32 accumulation — same
    # numerics as the MXU path) for the correctness check.
    xf = x_feat.reshape(B, -1)
    xb = xf.astype(jnp.bfloat16).astype(jnp.float32)
    w1b = w1.astype(jnp.bfloat16).astype(jnp.float32)
    h = xb @ w1b + b1
    h = jnp.where(h > 0, h, PRELU_ALPHA * h)
    z = h @ w2 + b2
    ref = jnp.where(z > 0, z, PRELU_ALPHA * z)
    assert logits.shape == (B, O)
    assert jnp.allclose(logits, ref, atol=5e-3, rtol=5e-3)

    print("KERNEL_OK")
</pallas_src>

<mosaic_0001>
module attributes {stable_mosaic.version = 11 : i64} {
  func.func @_head_kernel(%arg0: i32, %arg1: i32, %arg2: memref<2x1728xbf16, #tpu.memory_space<vmem>>, %arg3: memref<1x1728x1024xbf16, #tpu.memory_space<vmem>>, %arg4: memref<4x1x1024xf32, #tpu.memory_space<vmem>>, %arg5: memref<4x1x1024xf32, #tpu.memory_space<vmem>>, %arg6: memref<1x1xf32, #tpu.memory_space<vmem>>, %arg7: memref<2x1xf32, #tpu.memory_space<vmem>>) attributes {dimension_semantics = [#tpu.dimension_semantics<parallel>, #tpu.dimension_semantics<arbitrary>], iteration_bounds = array<i64: 1, 4>, scalar_prefetch = 0 : i64, scratch_operands = 0 : i64, tpu.core_type = #tpu.core_type<tc>, window_params = [{pipeline_mode = #tpu.pipeline_mode<synchronous>, transform_indices = @transform_0, window_bounds = array<i64: 2, 1728>}, {transform_indices = @transform_1, window_bounds = array<i64: 1, 1728, 1024>}, {pipeline_mode = #tpu.pipeline_mode<synchronous>, transform_indices = @transform_2, window_bounds = array<i64: 4, 1, 1024>}, {pipeline_mode = #tpu.pipeline_mode<synchronous>, transform_indices = @transform_3, window_bounds = array<i64: 4, 1, 1024>}, {pipeline_mode = #tpu.pipeline_mode<synchronous>, transform_indices = @transform_4, window_bounds = array<i64: 1, 1>}, {pipeline_mode = #tpu.pipeline_mode<synchronous>, transform_indices = @transform_5, window_bounds = array<i64: 2, 1>}]} {
    %c4_i32 = arith.constant 4 : i32
    %0 = arith.muli %arg0, %c4_i32 : i32
    %1 = arith.addi %0, %arg1 : i32
    %c0_i32 = arith.constant 0 : i32
    %2 = arith.cmpi eq, %arg1, %c0_i32 : i32
    %3 = arith.extui %2 : i1 to i32
    %c0_i32_0 = arith.constant 0 : i32
    %4 = arith.cmpi ne, %3, %c0_i32_0 : i32
    scf.if %4 {
      %cst_17 = arith.constant 0.000000e+00 : f32
      %32 = vector.broadcast %cst_17 : f32 to vector<2x1xf32>
      %c0_18 = arith.constant 0 : index
      %c0_19 = arith.constant 0 : index
      %33 = vector.load %arg7[%c0_18, %c0_19] : memref<2x1xf32, #tpu.memory_space<vmem>>, vector<2x1xf32>
      tpu.vector_store %arg7[%c0_18, %c0_19], %32 {strides = array<i32>} : memref<2x1xf32, #tpu.memory_space<vmem>>, vector<2x1xf32>,
    } else {
    }
    %c0 = arith.constant 0 : index
    %c0_1 = arith.constant 0 : index
    %5 = vector.load %arg2[%c0, %c0_1] : memref<2x1728xbf16, #tpu.memory_space<vmem>>, vector<2x1728xbf16>
    %c0_2 = arith.constant 0 : index
    %c0_3 = arith.constant 0 : index
    %c0_4 = arith.constant 0 : index
    %6 = vector.load %arg3[%c0_2, %c0_3, %c0_4] : memref<1x1728x1024xbf16, #tpu.memory_space<vmem>>, vector<1x1728x1024xbf16>
    %7 = vector.shape_cast %6 : vector<1x1728x1024xbf16> to vector<1728x1024xbf16>
    %cst = arith.constant dense<0.000000e+00> : vector<2x1024xf32>
    %8 = tpu.matmul %5, %7, %cst {dimension_numbers = #tpu.dot_dimension_numbers<[1], [0], [0], [1], [0, 0, 1, 1], [], []>} : vector<2x1728xbf16>, vector<1728x1024xbf16>, vector<2x1024xf32> -> vector<2x1024xf32>
    %9 = arith.index_cast %1 : i32 to index
    %c0_5 = arith.constant 0 : index
    %c0_6 = arith.constant 0 : index
    %10 = vector.load %arg4[%9, %c0_5, %c0_6] : memref<4x1x1024xf32, #tpu.memory_space<vmem>>, vector<1x1x1024xf32>
    %11 = vector.shape_cast %10 : vector<1x1x1024xf32> to vector<1x1024xf32>
    %12 = vector.broadcast %11 : vector<1x1024xf32> to vector<2x1024xf32>
    %13 = arith.addf %8, %12 : vector<2x1024xf32>
    %cst_7 = arith.constant 0.000000e+00 : f32
    %14 = vector.broadcast %cst_7 : f32 to vector<2x1024xf32>
    %15 = arith.cmpf ogt, %13, %14 : vector<2x1024xf32>
    %cst_8 = arith.constant 2.500000e-01 : f32
    %16 = vector.broadcast %cst_8 : f32 to vector<2x1024xf32>
    %17 = arith.mulf %16, %13 : vector<2x1024xf32>
    %18 = arith.select %15, %13, %17 : vector<2x1024xi1>, vector<2x1024xf32>
    %19 = arith.index_cast %1 : i32 to index
    %c0_9 = arith.constant 0 : index
    %c0_10 = arith.constant 0 : index
    %20 = vector.load %arg5[%19, %c0_9, %c0_10] : memref<4x1x1024xf32, #tpu.memory_space<vmem>>, vector<1x1x1024xf32>
    %21 = vector.shape_cast %20 : vector<1x1x1024xf32> to vector<1x1024xf32>
    %c0_11 = arith.constant 0 : index
    %c0_12 = arith.constant 0 : index
    %22 = vector.load %arg7[%c0_11, %c0_12] : memref<2x1xf32, #tpu.memory_space<vmem>>, vector<2x1xf32>
    %23 = vector.broadcast %21 : vector<1x1024xf32> to vector<2x1024xf32>
    %24 = arith.mulf %18, %23 : vector<2x1024xf32>
    %cst_13 = arith.constant dense<0.000000e+00> : vector<2xf32>
    %25 = vector.multi_reduction <add>, %24, %cst_13 [1] : vector<2x1024xf32> to vector<2xf32>
    %26 = vector.shape_cast %25 : vector<2xf32> to vector<2x1xf32>
    %27 = arith.addf %22, %26 : vector<2x1xf32>
    %c0_14 = arith.constant 0 : index
    %c0_15 = arith.constant 0 : index
    %28 = vector.load %arg7[%c0_14, %c0_15] : memref<2x1xf32, #tpu.memory_space<vmem>>, vector<2x1xf32>
    tpu.vector_store %arg7[%c0_14, %c0_15], %27 {strides = array<i32>} : memref<2x1xf32, #tpu.memory_space<vmem>>, vector<2x1xf32>,
    %c3_i32 = arith.constant 3 : i32
    %29 = arith.cmpi eq, %arg1, %c3_i32 : i32
    %30 = arith.extui %29 : i1 to i32
    %c0_i32_16 = arith.constant 0 : i32
    %31 = arith.cmpi ne, %30, %c0_i32_16 : i32
    scf.if %31 {
      %c0_17 = arith.constant 0 : index
      %c0_18 = arith.constant 0 : index
      %32 = vector.load %arg7[%c0_17, %c0_18] : memref<2x1xf32, #tpu.memory_space<vmem>>, vector<2x1xf32>
      %c0_19 = arith.constant 0 : index
      %c0_20 = arith.constant 0 : index
      %33 = vector.load %arg6[%c0_19, %c0_20] : memref<1x1xf32, #tpu.memory_space<vmem>>, vector<1x1xf32>
      %34 = vector.broadcast %33 : vector<1x1xf32> to vector<2x1xf32>
      %35 = arith.addf %32, %34 : vector<2x1xf32>
      %cst_21 = arith.constant 0.000000e+00 : f32
      %36 = vector.broadcast %cst_21 : f32 to vector<2x1xf32>
      %37 = arith.cmpf ogt, %35, %36 : vector<2x1xf32>
      %cst_22 = arith.constant 2.500000e-01 : f32
      %38 = vector.broadcast %cst_22 : f32 to vector<2x1xf32>
      %39 = arith.mulf %38, %35 : vector<2x1xf32>
      %40 = arith.select %37, %35, %39 : vector<2x1xi1>, vector<2x1xf32>
      %c0_23 = arith.constant 0 : index
      %c0_24 = arith.constant 0 : index
      %41 = vector.load %arg7[%c0_23, %c0_24] : memref<2x1xf32, #tpu.memory_space<vmem>>, vector<2x1xf32>
      tpu.vector_store %arg7[%c0_23, %c0_24], %40 {strides = array<i32>} : memref<2x1xf32, #tpu.memory_space<vmem>>, vector<2x1xf32>,
    } else {
    }
    return
  }
  func.func @transform_0(%arg0: i32, %arg1: i32) -> (i32, i32) {
    %c0_i32 = arith.constant 0 : i32
    %c0_i32_0 = arith.constant 0 : i32
    %c0_i32_1 = arith.constant 0 : i32
    return %c0_i32, %c0_i32_0 : i32, i32
  }
  func.func @transform_1(%arg0: i32, %arg1: i32) -> (i32, i32, i32) {
    %c4_i32 = arith.constant 4 : i32
    %0 = arith.muli %arg0, %c4_i32 : i32
    %1 = arith.addi %0, %arg1 : i32
    %c0_i32 = arith.constant 0 : i32
    %c0_i32_0 = arith.constant 0 : i32
    %c0_i32_1 = arith.constant 0 : i32
    return %1, %c0_i32, %c0_i32_0 : i32, i32, i32
  }
  func.func @transform_2(%arg0: i32, %arg1: i32) -> (i32, i32, i32) {
    %c0_i32 = arith.constant 0 : i32
    %c0_i32_0 = arith.constant 0 : i32
    %c0_i32_1 = arith.constant 0 : i32
    %c0_i32_2 = arith.constant 0 : i32
    return %c0_i32, %c0_i32_0, %c0_i32_1 : i32, i32, i32
  }
  func.func @transform_3(%arg0: i32, %arg1: i32) -> (i32, i32, i32) {
    %c0_i32 = arith.constant 0 : i32
    %c0_i32_0 = arith.constant 0 : i32
    %c0_i32_1 = arith.constant 0 : i32
    %c0_i32_2 = arith.constant 0 : i32
    return %c0_i32, %c0_i32_0, %c0_i32_1 : i32, i32, i32
  }
  func.func @transform_4(%arg0: i32, %arg1: i32) -> (i32, i32) {
    %c0_i32 = arith.constant 0 : i32
    %c0_i32_0 = arith.constant 0 : i32
    %c0_i32_1 = arith.constant 0 : i32
    return %c0_i32, %c0_i32_0 : i32, i32
  }
  func.func @transform_5(%arg0: i32, %arg1: i32) -> (i32, i32) {
    %c0_i32 = arith.constant 0 : i32
    %c0_i32_0 = arith.constant 0 : i32
    %c0_i32_1 = arith.constant 0 : i32
    return %c0_i32, %c0_i32_0 : i32, i32
  }
}

</mosaic_0001>

<bundles_post_ra>
// kernel: tpu_custom_call.1
= control target key start
LH: loop header
LB: loop body
LE: loop exit
PB: predicated region body
PF: predicated region fallthrough
CT: control target
= control target key end

     0   :  { %s9609_s0 = inlined_call_operand.hbm [shape: bf16[2,1728], index: 0, kind: input, shape index: {}]   ;;  %s9610_s1 = inlined_call_operand.hbm [shape: bf16[4,1728,1024], index: 1, kind: input, shape index: {}]   ;;  %s9611_s2 = inlined_call_operand.hbm [shape: f32[4,1,1024], index: 2, kind: input, shape index: {}]   ;;  %s9612_s3 = inlined_call_operand.hbm [shape: f32[4,1,1024], index: 3, kind: input, shape index: {}]   ;;  %s9613_s4 = inlined_call_operand.<no memory space> [shape: f32[1,1], index: 4, kind: input, shape index: {}]   ;;  %s9614_s5 = inlined_call_operand.vmem [shape: f32[2,1], index: 5, kind: output, shape index: {}]  }
   0x1   :  { %v10_v0 = vstv %s9613_s4 }
   0x2   :  { %11 = vst [vmem:[#allocation2] sm:$0x1] %v10_v0 }
   0x3   :  { %12 = vsyncpa [#allocation4], 0 }
   0x4   :  { %13 = vsyncpa [#allocation6], 0 }
   0x5   :  { %15 = vsyncpa [#allocation6 + $0x1], 0 }
   0x6   :  { %16 = vsyncpa [#allocation9], 0  ;;  %s8308_s20 = smov 0   ;;  %s8310_s21 = smov 0  }
   0x7   :  { %s8312_s22 = smov 0   ;;  %s8314_s23 = smov 0  }
   0x8   :  { %s8316_s24 = smov 0   ;;  %s8318_s25 = smov 0  }
   0x9 LB: > { %s9620_s4 = sadd.s32 4294967295, %s8263_s25   ;;  %s66_s26 = sadd.s32 1, %s8251_s22  ;;  %s8263_s25 = sphi %s8318_s25, %s22_s25   ;;  %s8259_s24 = sphi %s8316_s24, %s9636_s24   ;;  %s8255_s23 = sphi %s8314_s23, %s9635_s23   ;;  %s8251_s22 = sphi %s8312_s22, %s9634_s22   ;;  %s8247_s21 = sphi %s8310_s21, %s9633_s21   ;;  %s8243_s20 = sphi %s8308_s20, %s9632_s20  }
   0xa   : > { %p73_p0 = scmp.ne.s32.totalorder %s8251_s22, %s8247_s21  ;;  %p74_p1 = scmp.eq.s32.totalorder %s8263_s25, 0 }
   0xb   : > { %p79_p2 = scmp.ne.s32.totalorder %s8247_s21, %s8243_s20  ;;  %p8344_p3 = scmp.eq.s32.totalorder %s9620_s4, 0 }
   0xc   : > { %p75_p4 = por %p74_p1, %p73_p0  ;;  %p7000_p5 = scmp.ge.s32.totalorder %s8263_s25, 1 }
   0xd   : > { %s9621_s27 = scalar_select %p8344_p3, 1, 0 }
   0xe   : > { %p8351_p6 = por %p8344_p3, %p79_p2  ;;  %p174_p7 = scmp.lt.s32.totalorder %s8263_s25, 5 }
   0xf   : > { %s8265_s30 = smov [#allocation7]   ;;  %p8022_p10 = scmp.lt.s32.totalorder %s8263_s25, 4 }
  0x10   : > { %s9622_s28 = scalar_select %p8351_p6, 1, 0 }
  0x11   : > { %p8356_p8 = pnand %p7000_p5, %p174_p7  ;;  %s197_s6 = sshll.u32 %s8265_s30, 4  ;;  %s198_s6 = int_to_ptr.vmem [resolvable:$true] %s197_s6 }
  0x12   : > { %p8369_p12 = pnand %p8022_p10, %p75_p4  ;;  %s8087_s11 = scalar_lea.hbm %s9611_s2, 512 }
  0x13   : > { %s9623_s29 = scalar_select %p8356_p8, 1, 0 }
  0x14   : > { %p8005_p9 = pneg %p8356_p8  ;;  %p8088_p13 = scmp.ne.s32.totalorder %s9611_s2, %s8087_s11 }
  0x15   : > { %s9625_s8 = scalar_select %p8369_p12, 1, 0 }
  0x16   : > { %p8365_p11 = pnand %p8005_p9, %p8344_p3  ;;  %p8094_p4 = scmp.lt.u32.totalorder %s8087_s11, %s9611_s2 }
  0x18   : > { %p8381_p0 = pneg %p8365_p11 }
  0x1a   : > { %p8090_p1 = pnand %p8381_p0, %p8088_p13 }
  0x1c   : > { %p8091_p2 = pneg %p8090_p1 }
  0x1e   : > { %p8096_p5 = pnand %p8094_p4, %p8091_p2 }
  0x20   : > { %8099 = shalt.err (!%p8096_p5)
}
  0x21   : > { %s8100_s17 = scalar_lea.vmem %s198_s6, 512  ;;  %p8108_p6 = scmp.lt.s32.totalorder %s198_s6, %s198_s6 }
  0x22   : > { %p8101_p7 = scmp.ne.s32.totalorder %s198_s6, %s8100_s17  ;;  %p8109_p3 = scmp.lt.s32.totalorder %s8100_s17, %s8100_s17 }
  0x24   : > { %p8103_p9 = pnand %p8101_p7, %p8381_p0  ;;  %p8110_p8 = por %p8109_p3, %p8108_p6 }
  0x26   : > { %p8104_p10 = pneg %p8103_p9 }
  0x28   : > { %p8111_p12 = pnand %p8110_p8, %p8104_p10 }
  0x2a   : > { %8114 = shalt.err (!%p8111_p12)
}
  0x2b   : > { %s8266_s18 = smov 128   ;;  %s8267_s19 = smov 8  }
  0x2c   : > { %8011 = dma.hbm_to_vmem [thread:$0]  (!%p8365_p11), %s9611_s2, 512, %s198_s6, [#allocation6], %s8266_s18, %s8266_s18, %s8267_s19  }
  0x2d   : > { %s8268_s9 = smov [#allocation3]   ;;  %s8115_s13 = scalar_lea.hbm %s9609_s0, 224 }
  0x2e   : > { %s187_s10 = sshll.u32 %s8268_s9, 4  ;;  %p8116_p3 = scmp.ne.s32.totalorder %s9609_s0, %s8115_s13  ;;  %s188_s10 = int_to_ptr.vmem [resolvable:$true] %s187_s10 }
  0x2f   : > { %p8122_p12 = scmp.lt.u32.totalorder %s8115_s13, %s9609_s0 }
  0x30   : > { %p8118_p6 = pnand %p8116_p3, %p8381_p0 }
  0x32   : > { %p8119_p8 = pneg %p8118_p6 }
  0x34   : > { %p8124_p13 = pnand %p8122_p12, %p8119_p8 }
  0x36   : > { %8127 = shalt.err (!%p8124_p13)
}
  0x37   : > { %s8128_s6 = scalar_lea.vmem %s188_s10, 224  ;;  %p8136_p5 = scmp.lt.s32.totalorder %s188_s10, %s188_s10 }
  0x38   : > { %p8129_p1 = scmp.ne.s32.totalorder %s188_s10, %s8128_s6  ;;  %p8137_p7 = scmp.lt.s32.totalorder %s8128_s6, %s8128_s6 }
  0x3a   : > { %p8131_p2 = pnand %p8129_p1, %p8381_p0  ;;  %p8138_p9 = por %p8137_p7, %p8136_p5 }
  0x3c   : > { %p8132_p4 = pneg %p8131_p2 }
  0x3e   : > { %p8139_p10 = pnand %p8138_p9, %p8132_p4 }
  0x40   : > { %8142 = shalt.err (!%p8139_p10)
}
  0x41   : > { %8008 = dma.hbm_to_vmem [thread:$0]  (!%p8365_p11), %s9609_s0, 224, %s188_s10, [#allocation4]  }
  0x42   : > { %s8269_s4 = smov [#allocation8]   ;;  %s8143_s13 = scalar_lea.hbm %s9612_s3, 512 }
  0x43   : > { %s210_s9 = sshll.u32 %s8269_s4, 4  ;;  %p8144_p3 = scmp.ne.s32.totalorder %s9612_s3, %s8143_s13  ;;  %s211_s9 = int_to_ptr.vmem [resolvable:$true] %s210_s9 }
  0x44   : > { %p8150_p12 = scmp.lt.u32.totalorder %s8143_s13, %s9612_s3 }
  0x45   : > { %p8146_p6 = pnand %p8144_p3, %p8381_p0 }
  0x47   : > { %p8147_p8 = pneg %p8146_p6 }
  0x49   : > { %p8152_p13 = pnand %p8150_p12, %p8147_p8 }
  0x4b   : > { %8155 = shalt.err (!%p8152_p13)
}
  0x4c   : > { %s8156_s10 = scalar_lea.vmem %s211_s9, 512  ;;  %p8164_p5 = scmp.lt.s32.totalorder %s211_s9, %s211_s9 }
  0x4d   : > { %p8157_p1 = scmp.ne.s32.totalorder %s211_s9, %s8156_s10  ;;  %p8165_p7 = scmp.lt.s32.totalorder %s8156_s10, %s8156_s10 }
  0x4f   : > { %p8159_p2 = pnand %p8157_p1, %p8381_p0  ;;  %p8166_p9 = por %p8165_p7, %p8164_p5 }
  0x51   : > { %p8160_p4 = pneg %p8159_p2 }
  0x53   : > { %p8167_p10 = pnand %p8166_p9, %p8160_p4 }
  0x55   : > { %8170 = shalt.err (!%p8167_p10)
}
  0x56   : > { %8014 = dma.hbm_to_vmem [thread:$0]  (!%p8365_p11), %s9612_s3, 512, %s211_s9, [#allocation9], %s8266_s18, %s8266_s18, %s8267_s19  }
  0x57   : > { %s31_s14 = sadd.s32 1, %s8259_s24  ;;  %s227_s4 = sand.u32 1, %s8263_s25  }
  0x58   : > { %p32_p0 = scmp.ge.s32.totalorder %s31_s14, 4  ;;  %s229_s7 = sand.u32 1, %s8251_s22  }
  0x59   : > { %s7989_s11 = smul.u32 110592, %s8259_s24  ;;  %s8459_s6 = scalar_lea.sflag [#allocation6], %s227_s4 }
  0x5a   : > { %s9638_s14 = smov (%p32_p0, %s31_s14), 0  ;;  %s7988_s12 = smul.u32 6912, %s229_s7 }
  0x5b   : > { %s8448_s16 = scalar_lea.hbm %s9610_s1, %s7989_s11  ;;  %s63_s18 = ssub.s32 %s8259_s24, %s9638_s14 }
  0x5c   : > { %p64_p11 = scmp.eq.s32.totalorder %s63_s18, 0  ;;  %s231_s19 = scalar_lea.vmem [#allocation5], %s7988_s12 }
  0x5d   : > { %s240_s9 = sshll.u32 %s231_s19, 4  ;;  %s8171_s10 = scalar_lea.hbm %s8448_s16, 110592  ;;  %s8457_s9 = int_to_ptr.vmem [resolvable:$true] %s240_s9 }
  0x5e   : > { %s8455_s17 = scalar_select %p64_p11, %s8251_s22, %s66_s26  }
  0x5f   : > { %p8172_p3 = scmp.ne.s32.totalorder %s8448_s16, %s8171_s10  ;;  %p9627_p6 = scmp.ne.s32.totalorder %s9625_s8, 0 }
  0x60   : > { %s8176_s7 = scalar_lea.hbm %s9610_s1, 442368  ;;  %p8177_p1 = scmp.lt.u32.totalorder %s8448_s16, %s9610_s1 }
  0x61   : > { %p8173_p8 = pneg %p9627_p6  ;;  %p8178_p2 = scmp.lt.u32.totalorder %s8176_s7, %s8171_s10 }
  0x62   : > { %p8180_p5 = scmp.lt.u32.totalorder %s8171_s10, %s8448_s16 }
  0x63   : > { %p8174_p12 = pnand %p8173_p8, %p8172_p3  ;;  %p8179_p4 = por %p8178_p2, %p8177_p1 }
  0x65   : > { %p8175_p13 = pneg %p8174_p12  ;;  %p8181_p7 = por %p8180_p5, %p8179_p4 }
  0x67   : > { %p8182_p9 = pnand %p8181_p7, %p8175_p13 }
  0x69   : > { %8185 = shalt.err (!%p8182_p9)
}
  0x6a   : > { %s8186_s26 = scalar_lea.vmem %s8457_s9, 110592  ;;  %s8270_s4 = smov [#allocation5]  }
  0x6b   : > { %p8187_p10 = scmp.ne.s32.totalorder %s8457_s9, %s8186_s26  ;;  %s8191_s13 = sshll.u32 %s8270_s4, 4  ;;  %s8192_s13 = int_to_ptr.vmem [resolvable:$false] %s8191_s13 }
  0x6c   : > { %s8193_s15 = scalar_lea.vmem %s8192_s13, 221184  ;;  %p8194_p3 = scmp.lt.s32.totalorder %s8457_s9, %s8192_s13 }
  0x6d   : > { %p8189_p0 = pnand %p8187_p10, %p8173_p8  ;;  %p8195_p12 = scmp.lt.s32.totalorder %s8193_s15, %s8186_s26 }
  0x6f   : > { %p8190_p11 = pneg %p8189_p0  ;;  %p8196_p1 = por %p8195_p12, %p8194_p3 }
  0x71   : > { %p8197_p2 = pnand %p8196_p1, %p8190_p11 }
  0x73   : > { %8200 = shalt.err (!%p8197_p2)
}
  0x74   : > { %s8271_s18 = smov 512   ;;  %s8272_s19 = smov 32  }
  0x75   : > { %8018 = dma.hbm_to_vmem [thread:$0]  (!%p9627_p6), %s8448_s16, 110592, %s8457_s9, %s8459_s6, %s8271_s18, %s8271_s18, %s8272_s19  }
  0x76   : > { %p9628_p8 = scmp.ne.s32.totalorder %s9623_s29, 0 }
  0x77   : > { %p9629_p13 = scmp.ne.s32.totalorder (!%p9628_p8), %s9621_s27, 0 }
  0x78   : > { %252 = sbr.rel (%p9628_p8) target bundleno = 1400 (0x578), region = 40 }
  0x7f   : > { %8226 = dma.done.wait (%p9629_p13), [#allocation4], 224  }
  0x80   : > { %8228 = vsyncadd (%p9629_p13), [#allocation4], 4294967072  ;;  %s9630_s10 = sadd.s32 4294967295, %s8263_s25   ;;  %s260_s30 = sand.u32 1, %s8247_s21  }
  0x81   : > { %s258_s20 = sand.u32 1, %s9630_s10   ;;  %s7990_s7 = smul.u32 6912, %s260_s30 }
  0x82   : > { %s259_s11 = scalar_lea.sflag [#allocation6], %s258_s20  ;;  %p9631_p6 = scmp.ne.s32.totalorder %s9622_s28, 0 }
  0x83   : > { %s8496_s12 = scalar_lea.vmem [#allocation5], %s7990_s7 }
  0x84   : > { %8230 = dma.done.wait (%p9631_p6), %s259_s11, 110592  }
  0x85   : > { %8232 = vsyncadd (%p9631_p6), %s259_s11, 4294856704 }
  0x86   : > { %8234 = dma.done.wait (%p9629_p13), [#allocation6], 512  }
  0x87   : > { %8236 = vsyncadd (%p9629_p13), [#allocation6], 4294966784 }
  0x88   : > { %8238 = dma.done.wait (%p9629_p13), [#allocation9], 512  }
  0x89   : > { %8240 = vsyncadd (%p9629_p13), [#allocation9], 4294966784  ;;  %p7010_p4 = scmp.ne.s32.totalorder %s8255_s23, 0 }
  0x8a   : > { %vm301_vm0 = vcmask (!%p7010_p4), 1024   ;;  %v8273_v1 = vmov (!%p7010_p4), 0.0  }
  0x8b   : > { %300 = sbr.rel (%p7010_p4) target bundleno = 146 (0x92), region = 60  ;;  %302 = vst.msk [vmem:[%s9614_s5] sm:$0x3] (!%p7010_p4), %vm301_vm0, %v8273_v1 }
  0x92 PF: > { %v305_v2 = vld [vmem:[%s8496_s12] sm:$0xff]  ;;  %v306_v4 = vld [vmem:[%s8496_s12 + $0x8] sm:$0xff]  ;;  %v1173_v34 = vlaneseq  ;;  %v8274_v35 = vmov 1966171168   ;;  %v8547_v61 = vld [vmem:[#allocation3] sm:$0xff]  ;;  %vm5644_vm1 = vcmask 523264  }
  0x93   : > { %v309_v3 = vld [vmem:[%s8496_s12 + $0x20] sm:$0xff]  ;;  %v310_v6 = vld [vmem:[%s8496_s12 + $0x28] sm:$0xff]  ;;  %v1217_v36 = vunpack.c.l.s4 %v8274_v35  ;;  %s7011_s27 = sshll.u32 %s8255_s23, 3  ;;  %vm6872_vm2 = vcmask 1041408   ;;  %vm6891_vm11 = vcmask 1024   ;;  %p7880_p5 = scmp.ne.s32.totalorder %s8255_s23, 3 }
  0x94   : > { %v7013_v5 = vcombine.high %v305_v2, %v309_v3  ;;  %v7012_v7 = vcombine.low %v305_v2, %v309_v3  ;;  %v313_v8 = vld [vmem:[%s8496_s12 + $0x40] sm:$0xff]  ;;  %v7015_v10 = vcombine.high %v306_v4, %v310_v6  ;;  %v7014_v11 = vcombine.low %v306_v4, %v310_v6  ;;  %v314_v13 = vld [vmem:[%s8496_s12 + $0x48] sm:$0xff]  ;;  %s9295_s8 = scalar_lea.vmem [#allocation7], %s7011_s27  ;;  %s9301_s16 = scalar_lea.vmem [#allocation8], %s7011_s27 }
  0x95   : > { %v317_v9 = vld [vmem:[%s8496_s12 + $0x60] sm:$0xff]  ;;  %v318_v14 = vld [vmem:[%s8496_s12 + $0x68] sm:$0xff]  ;;  %v8536_v45 = vshrl.u32 %v1173_v34, 7  ;;  %v1218_v46 = vunpack.c.0.s8 %v1217_v36 }
  0x96   : > { %v7021_v12 = vcombine.high %v313_v8, %v317_v9  ;;  %v321_v15 = vld [vmem:[%s8496_s12 + $0x80] sm:$0xff]  ;;  %5648 = vmatprep.subr.bf16.mxu0 %v7013_v5  ;;  %v7023_v16 = vcombine.high %v314_v13, %v318_v14  ;;  %v322_v18 = vld [vmem:[%s8496_s12 + $0x88] sm:$0xff]  ;;  %5935 = vmatprep.subr.bf16.mxu1 %v7015_v10  ;;  %v7020_v20 = vcombine.low %v313_v8, %v317_v9 }
  0x97   : > { %v325_v17 = vld [vmem:[%s8496_s12 + $0xa0] sm:$0xff]  ;;  %v326_v19 = vld [vmem:[%s8496_s12 + $0xa8] sm:$0xff]  ;;  %5649 = vmatpush1.bf16.msra.mxu0 %v7012_v7  ;;  %5936 = vmatpush1.bf16.msra.mxu1 %v7014_v11  ;;  %v7022_v21 = vcombine.low %v314_v13, %v318_v14  ;;  %v8543_v55 = vsub.s32 %v1218_v46, %v8536_v45 }
  0x98   : > { %5650 = vmatprep.subr.bf16.mxu0 %v7021_v12  ;;  %v7029_v22 = vcombine.high %v321_v15, %v325_v17  ;;  %5937 = vmatprep.subr.bf16.mxu1 %v7023_v16  ;;  %v7031_v23 = vcombine.high %v322_v18, %v326_v19  ;;  %v329_v24 = vld [vmem:[%s8496_s12 + $0xc0] sm:$0xff]  ;;  %v330_v26 = vld [vmem:[%s8496_s12 + $0xc8] sm:$0xff]  ;;  %v7028_v28 = vcombine.low %v321_v15, %v325_v17 }
  0x99   : > { %v333_v25 = vld [vmem:[%s8496_s12 + $0xe0] sm:$0xff]  ;;  %v334_v27 = vld [vmem:[%s8496_s12 + $0xe8] sm:$0xff]  ;;  %v7030_v29 = vcombine.low %v322_v18, %v326_v19  ;;  %v8553_v1 = vrot.slane %v8547_v61, %v8543_v55 }
  0x9a   : > { %v7037_v30 = vcombine.high %v329_v24, %v333_v25  ;;  %v7039_v31 = vcombine.high %v330_v26, %v334_v27  ;;  %v337_v32 = vld [vmem:[%s8496_s12 + $0x100] sm:$0xff]  ;;  %v338_v37 = vld [vmem:[%s8496_s12 + $0x108] sm:$0xff]  ;;  %v7036_v39 = vcombine.low %v329_v24, %v333_v25  ;;  %v7038_v40 = vcombine.low %v330_v26, %v334_v27 }
  0x9b   : > { %5651 = vmatpush1.bf16.msra.mxu0 %v7020_v20  ;;  %5938 = vmatpush1.bf16.msra.mxu1 %v7022_v21  ;;  %v341_v33 = vld [vmem:[%s8496_s12 + $0x120] sm:$0xff]  ;;  %v342_v38 = vld [vmem:[%s8496_s12 + $0x128] sm:$0xff]  ;;  %v1230_v5 = vcombine.high %v8553_v1, %v8553_v1 }
  0x9c   : > { %5652 = vmatprep.subr.bf16.mxu0 %v7029_v22  ;;  %5939 = vmatprep.subr.bf16.mxu1 %v7031_v23  ;;  %v7045_v41 = vcombine.high %v337_v32, %v341_v33  ;;  %v7047_v42 = vcombine.high %v338_v37, %v342_v38  ;;  %v345_v43 = vld [vmem:[%s8496_s12 + $0x140] sm:$0xff]  ;;  %v346_v47 = vld [vmem:[%s8496_s12 + $0x148] sm:$0xff]  ;;  %v7044_v49 = vcombine.low %v337_v32, %v341_v33 }
  0x9d   : > { %v349_v44 = vld [vmem:[%s8496_s12 + $0x160] sm:$0xff]  ;;  %v350_v48 = vld [vmem:[%s8496_s12 + $0x168] sm:$0xff]  ;;  %v7046_v50 = vcombine.low %v338_v37, %v342_v38  ;;  %v8562_v11 = vrot.slane %v1230_v5, %v8543_v55 }
  0x9e   : > { %v7053_v51 = vcombine.high %v345_v43, %v349_v44  ;;  %v7055_v52 = vcombine.high %v346_v47, %v350_v48  ;;  %v353_v53 = vld [vmem:[%s8496_s12 + $0x180] sm:$0xff]  ;;  %v354_v56 = vld [vmem:[%s8496_s12 + $0x188] sm:$0xff]  ;;  %v7052_v58 = vcombine.low %v345_v43, %v349_v44  ;;  %v7054_v59 = vcombine.low %v346_v47, %v350_v48 }
  0x9f   : > { %5653 = vmatpush1.bf16.msra.mxu0 %v7028_v28  ;;  %5940 = vmatpush1.bf16.msra.mxu1 %v7030_v29  ;;  %v357_v54 = vld [vmem:[%s8496_s12 + $0x1a0] sm:$0xff]  ;;  %v358_v57 = vld [vmem:[%s8496_s12 + $0x1a8] sm:$0xff] }
  0xa0   : > { %5654 = vmatprep.subr.bf16.mxu0 %v7037_v30  ;;  %5941 = vmatprep.subr.bf16.mxu1 %v7039_v31  ;;  %v7061_v60 = vcombine.high %v353_v53, %v357_v54  ;;  %v7063_v62 = vcombine.high %v354_v56, %v358_v57  ;;  %v361_v63 = vld [vmem:[%s8496_s12 + $0x1c0] sm:$0xff]  ;;  %v362_v2 = vld [vmem:[%s8496_s12 + $0x1c8] sm:$0xff]  ;;  %v7060_v4 = vcombine.low %v353_v53, %v357_v54 }
  0xa1   : > { %v365_v0 = vld [vmem:[%s8496_s12 + $0x1e0] sm:$0xff]  ;;  %v366_v3 = vld [vmem:[%s8496_s12 + $0x1e8] sm:$0xff]  ;;  %v7062_v6 = vcombine.low %v354_v56, %v358_v57  ;;  %5680 = vmatprep.mubr.bf16.mxu0 %v8562_v11  ;;  %5967 = vmatprep.mubr.bf16.mxu1 %v8562_v11 }
  0xa2   : > { %v7069_v7 = vcombine.high %v361_v63, %v365_v0  ;;  %v7071_v8 = vcombine.high %v362_v2, %v366_v3  ;;  %v369_v9 = vld [vmem:[%s8496_s12 + $0x200] sm:$0xff]  ;;  %v370_v12 = vld [vmem:[%s8496_s12 + $0x208] sm:$0xff]  ;;  %v7068_v14 = vcombine.low %v361_v63, %v365_v0  ;;  %v7070_v15 = vcombine.low %v362_v2, %v366_v3 }
  0xa3   : > { %5655 = vmatpush1.bf16.msra.mxu0 %v7036_v39  ;;  %5942 = vmatpush1.bf16.msra.mxu1 %v7038_v40  ;;  %v373_v10 = vld [vmem:[%s8496_s12 + $0x220] sm:$0xff]  ;;  %v374_v13 = vld [vmem:[%s8496_s12 + $0x228] sm:$0xff] }
  0xa4   : > { %5656 = vmatprep.subr.bf16.mxu0 %v7045_v41  ;;  %5943 = vmatprep.subr.bf16.mxu1 %v7047_v42  ;;  %v7077_v16 = vcombine.high %v369_v9, %v373_v10  ;;  %v7079_v17 = vcombine.high %v370_v12, %v374_v13  ;;  %v377_v18 = vld [vmem:[%s8496_s12 + $0x240] sm:$0xff]  ;;  %v378_v20 = vld [vmem:[%s8496_s12 + $0x248] sm:$0xff]  ;;  %v7076_v22 = vcombine.low %v369_v9, %v373_v10 }
  0xa5   : > { %v381_v19 = vld [vmem:[%s8496_s12 + $0x260] sm:$0xff]  ;;  %v382_v21 = vld [vmem:[%s8496_s12 + $0x268] sm:$0xff]  ;;  %v7078_v23 = vcombine.low %v370_v12, %v374_v13 }
  0xa6   : > { %v7085_v24 = vcombine.high %v377_v18, %v381_v19  ;;  %v7087_v25 = vcombine.high %v378_v20, %v382_v21  ;;  %v385_v26 = vld [vmem:[%s8496_s12 + $0x280] sm:$0xff]  ;;  %v386_v28 = vld [vmem:[%s8496_s12 + $0x288] sm:$0xff]  ;;  %v7084_v30 = vcombine.low %v377_v18, %v381_v19  ;;  %v7086_v31 = vcombine.low %v378_v20, %v382_v21 }
  0xa7   : > { %5657 = vmatpush1.bf16.msra.mxu0 %v7044_v49  ;;  %5944 = vmatpush1.bf16.msra.mxu1 %v7046_v50  ;;  %v389_v27 = vld [vmem:[%s8496_s12 + $0x2a0] sm:$0xff]  ;;  %v390_v29 = vld [vmem:[%s8496_s12 + $0x2a8] sm:$0xff] }
  0xa8   : > { %5658 = vmatprep.subr.bf16.mxu0 %v7053_v51  ;;  %5945 = vmatprep.subr.bf16.mxu1 %v7055_v52  ;;  %v7093_v32 = vcombine.high %v385_v26, %v389_v27  ;;  %v7095_v33 = vcombine.high %v386_v28, %v390_v29  ;;  %v393_v34 = vld [vmem:[%s8496_s12 + $0x2c0] sm:$0xff]  ;;  %v394_v36 = vld [vmem:[%s8496_s12 + $0x2c8] sm:$0xff]  ;;  %v7092_v38 = vcombine.low %v385_v26, %v389_v27 }
  0xa9   : > { %v397_v35 = vld [vmem:[%s8496_s12 + $0x2e0] sm:$0xff]  ;;  %v398_v37 = vld [vmem:[%s8496_s12 + $0x2e8] sm:$0xff]  ;;  %v7094_v39 = vcombine.low %v386_v28, %v390_v29 }
  0xaa   : > { %v7101_v40 = vcombine.high %v393_v34, %v397_v35  ;;  %v7103_v41 = vcombine.high %v394_v36, %v398_v37  ;;  %v401_v42 = vld [vmem:[%s8496_s12 + $0x300] sm:$0xff]  ;;  %v402_v44 = vld [vmem:[%s8496_s12 + $0x308] sm:$0xff]  ;;  %v7100_v47 = vcombine.low %v393_v34, %v397_v35  ;;  %v7102_v48 = vcombine.low %v394_v36, %v398_v37 }
  0xab   : > { %5659 = vmatpush1.bf16.msra.mxu0 %v7052_v58  ;;  %5946 = vmatpush1.bf16.msra.mxu1 %v7054_v59  ;;  %v405_v43 = vld [vmem:[%s8496_s12 + $0x320] sm:$0xff]  ;;  %v406_v46 = vld [vmem:[%s8496_s12 + $0x328] sm:$0xff]  ;;  %v8612_v34 = vcombine.high %v8562_v11, %v8562_v11 }
  0xac   : > { %5660 = vmatprep.subr.bf16.mxu0 %v7061_v60  ;;  %5947 = vmatprep.subr.bf16.mxu1 %v7063_v62  ;;  %v7109_v49 = vcombine.high %v401_v42, %v405_v43  ;;  %v7111_v50 = vcombine.high %v402_v44, %v406_v46  ;;  %v409_v51 = vld [vmem:[%s8496_s12 + $0x340] sm:$0xff]  ;;  %v410_v53 = vld [vmem:[%s8496_s12 + $0x348] sm:$0xff]  ;;  %v7108_v56 = vcombine.low %v401_v42, %v405_v43 }
  0xad   : > { %v413_v52 = vld [vmem:[%s8496_s12 + $0x360] sm:$0xff]  ;;  %v414_v54 = vld [vmem:[%s8496_s12 + $0x368] sm:$0xff]  ;;  %v7110_v57 = vcombine.low %v402_v44, %v406_v46 }
  0xae   : > { %v7117_v58 = vcombine.high %v409_v51, %v413_v52  ;;  %v7119_v59 = vcombine.high %v410_v53, %v414_v54  ;;  %v417_v60 = vld [vmem:[%s8496_s12 + $0x380] sm:$0xff]  ;;  %v418_v63 = vld [vmem:[%s8496_s12 + $0x388] sm:$0xff]  ;;  %v7116_v2 = vcombine.low %v409_v51, %v413_v52  ;;  %v7118_v3 = vcombine.low %v410_v53, %v414_v54 }
  0xaf   : > { %5661 = vmatpush1.bf16.msra.mxu0 %v7060_v4  ;;  %5948 = vmatpush1.bf16.msra.mxu1 %v7062_v6  ;;  %v421_v62 = vld [vmem:[%s8496_s12 + $0x3a0] sm:$0xff]  ;;  %v422_v0 = vld [vmem:[%s8496_s12 + $0x3a8] sm:$0xff] }
  0xb0   : > { %5662 = vmatprep.subr.bf16.mxu0 %v7069_v7  ;;  %5949 = vmatprep.subr.bf16.mxu1 %v7071_v8  ;;  %v7125_v4 = vcombine.high %v417_v60, %v421_v62  ;;  %v7127_v5 = vcombine.high %v418_v63, %v422_v0  ;;  %v425_v6 = vld [vmem:[%s8496_s12 + $0x3c0] sm:$0xff]  ;;  %v426_v8 = vld [vmem:[%s8496_s12 + $0x3c8] sm:$0xff]  ;;  %v7124_v10 = vcombine.low %v417_v60, %v421_v62 }
  0xb1   : > { %v429_v7 = vld [vmem:[%s8496_s12 + $0x3e0] sm:$0xff]  ;;  %v430_v9 = vld [vmem:[%s8496_s12 + $0x3e8] sm:$0xff]  ;;  %v7126_v12 = vcombine.low %v418_v63, %v422_v0 }
  0xb2   : > { %v7133_v13 = vcombine.high %v425_v6, %v429_v7  ;;  %v438_v18 = vld [vmem:[%s8496_s12 + $0x428] sm:$0xff]  ;;  %v7132_v19 = vcombine.low %v425_v6, %v429_v7  ;;  %v7134_v20 = vcombine.low %v426_v8, %v430_v9 }
  0xb3   : > { %5663 = vmatpush1.bf16.msra.mxu0 %v7068_v14  ;;  %5950 = vmatpush1.bf16.msra.mxu1 %v7070_v15  ;;  %v7135_v14 = vcombine.high %v426_v8, %v430_v9  ;;  %v433_v15 = vld [vmem:[%s8496_s12 + $0x400] sm:$0xff]  ;;  %v442_v26 = vld [vmem:[%s8496_s12 + $0x448] sm:$0xff] }
  0xb4   : > { %5664 = vmatprep.subr.bf16.mxu0 %v7077_v16  ;;  %5951 = vmatprep.subr.bf16.mxu1 %v7079_v17  ;;  %v437_v16 = vld [vmem:[%s8496_s12 + $0x420] sm:$0xff]  ;;  %v434_v17 = vld [vmem:[%s8496_s12 + $0x408] sm:$0xff] }
  0xb5   : > { %v7141_v21 = vcombine.high %v433_v15, %v437_v16  ;;  %v446_v27 = vld [vmem:[%s8496_s12 + $0x468] sm:$0xff]  ;;  %v7140_v28 = vcombine.low %v433_v15, %v437_v16  ;;  %v7142_v29 = vcombine.low %v434_v17, %v438_v18 }
  0xb6   : > { %v454_v35 = vld [vmem:[%s8496_s12 + $0x4a8] sm:$0xff]  ;;  %v7150_v37 = vcombine.low %v442_v26, %v446_v27 }
  0xb7   : > { %5665 = vmatpush1.bf16.msra.mxu0 %v7076_v22  ;;  %5952 = vmatpush1.bf16.msra.mxu1 %v7078_v23  ;;  %v7143_v22 = vcombine.high %v434_v17, %v438_v18  ;;  %v441_v23 = vld [vmem:[%s8496_s12 + $0x440] sm:$0xff]  ;;  %v458_v42 = vld [vmem:[%s8496_s12 + $0x4c8] sm:$0xff] }
  0xb8   : > { %5666 = vmatprep.subr.bf16.mxu0 %v7085_v24  ;;  %5953 = vmatprep.subr.bf16.mxu1 %v7087_v25  ;;  %v445_v24 = vld [vmem:[%s8496_s12 + $0x460] sm:$0xff]  ;;  %v8604_v25 = vrot.slane %v8553_v1, %v8543_v55  ;;  %v450_v1 = vld [vmem:[%s8496_s12 + $0x488] sm:$0xff] }
  0xb9   : > { %v7148_v36 = vcombine.low %v441_v23, %v445_v24  ;;  %v462_v43 = vld [vmem:[%s8496_s12 + $0x4e8] sm:$0xff]  ;;  %v7158_v46 = vcombine.low %v450_v1, %v454_v35 }
  0xba   : > { %v466_v51 = vld [vmem:[%s8496_s12 + $0x508] sm:$0xff]  ;;  %v7166_v54 = vcombine.low %v458_v42, %v462_v43 }
  0xbb   : > { %5667 = vmatpush1.bf16.msra.mxu0 %v7084_v30  ;;  %5954 = vmatpush1.bf16.msra.mxu1 %v7086_v31  ;;  %v7149_v30 = vcombine.high %v441_v23, %v445_v24  ;;  %v7151_v31 = vcombine.high %v442_v26, %v446_v27  ;;  %v470_v52 = vld [vmem:[%s8496_s12 + $0x528] sm:$0xff] }
  0xbc   : > { %5668 = vmatprep.subr.bf16.mxu0 %v7093_v32  ;;  %5955 = vmatprep.subr.bf16.mxu1 %v7095_v33  ;;  %v449_v32 = vld [vmem:[%s8496_s12 + $0x480] sm:$0xff]  ;;  %v474_v60 = vld [vmem:[%s8496_s12 + $0x548] sm:$0xff]  ;;  %v7174_v0 = vcombine.low %v466_v51, %v470_v52 }
  0xbd   : > { %v453_v33 = vld [vmem:[%s8496_s12 + $0x4a0] sm:$0xff]  ;;  %v478_v62 = vld [vmem:[%s8496_s12 + $0x568] sm:$0xff] }
  0xbe   : > { %v7156_v44 = vcombine.low %v449_v32, %v453_v33  ;;  %v482_v6 = vld [vmem:[%s8496_s12 + $0x588] sm:$0xff]  ;;  %v7182_v9 = vcombine.low %v474_v60, %v478_v62 }
  0xbf   : > { %5669 = vmatpush1.bf16.msra.mxu0 %v7092_v38  ;;  %5956 = vmatpush1.bf16.msra.mxu1 %v7094_v39  ;;  %v7157_v38 = vcombine.high %v449_v32, %v453_v33  ;;  %v7159_v39 = vcombine.high %v450_v1, %v454_v35  ;;  %v486_v7 = vld [vmem:[%s8496_s12 + $0x5a8] sm:$0xff] }
  0xc0   : > { %5670 = vmatprep.subr.bf16.mxu0 %v7101_v40  ;;  %5957 = vmatprep.subr.bf16.mxu1 %v7103_v41  ;;  %v457_v40 = vld [vmem:[%s8496_s12 + $0x4c0] sm:$0xff]  ;;  %v490_v15 = vld [vmem:[%s8496_s12 + $0x5c8] sm:$0xff]  ;;  %v7190_v18 = vcombine.low %v482_v6, %v486_v7 }
  0xc1   : > { %v461_v41 = vld [vmem:[%s8496_s12 + $0x4e0] sm:$0xff]  ;;  %v494_v16 = vld [vmem:[%s8496_s12 + $0x5e8] sm:$0xff] }
  0xc2   : > { %v7164_v53 = vcombine.low %v457_v40, %v461_v41  ;;  %v498_v23 = vld [vmem:[%s8496_s12 + $0x608] sm:$0xff]  ;;  %v7198_v27 = vcombine.low %v490_v15, %v494_v16 }
  0xc3   : > { %5671 = vmatpush1.bf16.msra.mxu0 %v7100_v47  ;;  %5958 = vmatpush1.bf16.msra.mxu1 %v7102_v48  ;;  %v7165_v47 = vcombine.high %v457_v40, %v461_v41  ;;  %v7167_v48 = vcombine.high %v458_v42, %v462_v43  ;;  %v502_v24 = vld [vmem:[%s8496_s12 + $0x628] sm:$0xff] }
  0xc4   : > { %5672 = vmatprep.subr.bf16.mxu0 %v7109_v49  ;;  %5959 = vmatprep.subr.bf16.mxu1 %v7111_v50  ;;  %v465_v49 = vld [vmem:[%s8496_s12 + $0x500] sm:$0xff]  ;;  %v506_v32 = vld [vmem:[%s8496_s12 + $0x648] sm:$0xff]  ;;  %v7206_v35 = vcombine.low %v498_v23, %v502_v24 }
  0xc5   : > { %v469_v50 = vld [vmem:[%s8496_s12 + $0x520] sm:$0xff]  ;;  %v510_v33 = vld [vmem:[%s8496_s12 + $0x668] sm:$0xff] }
  0xc6   : > { %v7172_v63 = vcombine.low %v465_v49, %v469_v50  ;;  %v514_v40 = vld [vmem:[%s8496_s12 + $0x688] sm:$0xff]  ;;  %v7214_v43 = vcombine.low %v506_v32, %v510_v33 }
  0xc7   : > { %5673 = vmatpush1.bf16.msra.mxu0 %v7108_v56  ;;  %5960 = vmatpush1.bf16.msra.mxu1 %v7110_v57  ;;  %v7173_v56 = vcombine.high %v465_v49, %v469_v50  ;;  %v7175_v57 = vcombine.high %v466_v51, %v470_v52  ;;  %v518_v41 = vld [vmem:[%s8496_s12 + $0x6a8] sm:$0xff] }
  0xc8   : > { %5674 = vmatprep.subr.bf16.mxu0 %v7117_v58  ;;  %5961 = vmatprep.subr.bf16.mxu1 %v7119_v59  ;;  %v473_v58 = vld [vmem:[%s8496_s12 + $0x540] sm:$0xff]  ;;  %v522_v49 = vld [vmem:[%s8496_s12 + $0x6c8] sm:$0xff]  ;;  %v7222_v52 = vcombine.low %v514_v40, %v518_v41 }
  0xc9   : > { %v477_v59 = vld [vmem:[%s8496_s12 + $0x560] sm:$0xff]  ;;  %v526_v50 = vld [vmem:[%s8496_s12 + $0x6e8] sm:$0xff] }
  0xca   : > { %v7180_v8 = vcombine.low %v473_v58, %v477_v59 }
  0xcb   : > { %5675 = vmatpush1.bf16.msra.mxu0 %v7116_v2  ;;  %5962 = vmatpush1.bf16.msra.mxu1 %v7118_v3  ;;  %v7181_v2 = vcombine.high %v473_v58, %v477_v59  ;;  %v7183_v3 = vcombine.high %v474_v60, %v478_v62  ;;  %v530_v58 = vld [vmem:[%s8496_s12 + $0x708] sm:$0xff]  ;;  %v7230_v62 = vcombine.low %v522_v49, %v526_v50 }
  0xcc   : > { %5676 = vmatprep.subr.bf16.mxu0 %v7125_v4  ;;  %5963 = vmatprep.subr.bf16.mxu1 %v7127_v5  ;;  %v481_v4 = vld [vmem:[%s8496_s12 + $0x580] sm:$0xff]  ;;  %v534_v59 = vld [vmem:[%s8496_s12 + $0x728] sm:$0xff] }
  0xcd   : > { %v485_v5 = vld [vmem:[%s8496_s12 + $0x5a0] sm:$0xff] }
  0xce   : > { %v7188_v17 = vcombine.low %v481_v4, %v485_v5 }
  0xcf   : > { %5677 = vmatpush1.bf16.msra.mxu0 %v7124_v10  ;;  %5964 = vmatpush1.bf16.msra.mxu1 %v7126_v12  ;;  %v7189_v10 = vcombine.high %v481_v4, %v485_v5  ;;  %v7191_v12 = vcombine.high %v482_v6, %v486_v7  ;;  %v538_v4 = vld [vmem:[%s8496_s12 + $0x748] sm:$0xff]  ;;  %v7238_v7 = vcombine.low %v530_v58, %v534_v59 }
  0xd0   : > { %5678 = vmatprep.subr.bf16.mxu0 %v7133_v13  ;;  %5965 = vmatprep.subr.bf16.mxu1 %v7135_v14  ;;  %v489_v13 = vld [vmem:[%s8496_s12 + $0x5c0] sm:$0xff]  ;;  %v542_v5 = vld [vmem:[%s8496_s12 + $0x768] sm:$0xff] }
  0xd1   : > { %v493_v14 = vld [vmem:[%s8496_s12 + $0x5e0] sm:$0xff] }
  0xd2   : > { %v7196_v26 = vcombine.low %v489_v13, %v493_v14 }
  0xd3   : > { %5679 = vmatpush1.bf16.msra.mxu0 %v7132_v19  ;;  %5966 = vmatpush1.bf16.msra.mxu1 %v7134_v20  ;;  %v7197_v19 = vcombine.high %v489_v13, %v493_v14  ;;  %v7199_v20 = vcombine.high %v490_v15, %v494_v16  ;;  %v546_v13 = vld [vmem:[%s8496_s12 + $0x788] sm:$0xff]  ;;  %v7246_v16 = vcombine.low %v538_v4, %v542_v5 }
  0xd4   : > { %5689 = vmatprep.subr.bf16.mxu0 %v7141_v21  ;;  %5976 = vmatprep.subr.bf16.mxu1 %v7143_v22  ;;  %v497_v21 = vld [vmem:[%s8496_s12 + $0x600] sm:$0xff]  ;;  %v550_v14 = vld [vmem:[%s8496_s12 + $0x7a8] sm:$0xff] }
  0xd5   : > { %v501_v22 = vld [vmem:[%s8496_s12 + $0x620] sm:$0xff] }
  0xd6   : > { %5681 = vmatmul.mubr.bf16.vlgmr.msra.gmra.mrb[0].mxu0 %v8604_v25  ;;  %5968 = vmatmul.mubr.bf16.vlgmr.msra.gmra.mrb[0].mxu1 %v8604_v25  ;;  %v7204_v1 = vcombine.low %v497_v21, %v501_v22 }
  0xd7   : > { %5690 = vmatpush1.bf16.msra.mxu0 %v7140_v28  ;;  %5977 = vmatpush1.bf16.msra.mxu1 %v7142_v29  ;;  %v7205_v28 = vcombine.high %v497_v21, %v501_v22  ;;  %v7207_v29 = vcombine.high %v498_v23, %v502_v24  ;;  %v1215_v21 = vcombine.high %v8547_v61, %v8547_v61  ;;  %v554_v22 = vld [vmem:[%s8496_s12 + $0x7c8] sm:$0xff] }
  0xd8   : > { %5691 = vmatprep.subr.bf16.mxu0 %v7149_v30  ;;  %5978 = vmatprep.subr.bf16.mxu1 %v7151_v31  ;;  %v505_v30 = vld [vmem:[%s8496_s12 + $0x640] sm:$0xff]  ;;  %v558_v23 = vld [vmem:[%s8496_s12 + $0x7e8] sm:$0xff] }
  0xd9   : > { %5721 = vmatprep.mubr.bf16.mxu0 %v8612_v34  ;;  %6008 = vmatprep.mubr.bf16.mxu1 %v8612_v34  ;;  %v509_v31 = vld [vmem:[%s8496_s12 + $0x660] sm:$0xff]  ;;  %v562_v61 = vld [vmem:[%s8496_s12 + $0x808] sm:$0xff] }
  0xda   : > { %v7212_v42 = vcombine.low %v505_v30, %v509_v31 }
  0xdb   : > { %5692 = vmatpush1.bf16.msra.mxu0 %v7148_v36  ;;  %5979 = vmatpush1.bf16.msra.mxu1 %v7150_v37  ;;  %v7213_v36 = vcombine.high %v505_v30, %v509_v31  ;;  %v7215_v37 = vcombine.high %v506_v32, %v510_v33  ;;  %v565_v30 = vld [vmem:[%s8496_s12 + $0x820] sm:$0xff]  ;;  %v8677_v31 = vrot.slane %v1215_v21, %v8543_v55  ;;  %v566_v32 = vld [vmem:[%s8496_s12 + $0x828] sm:$0xff] }
  0xdc   : > { %5693 = vmatprep.subr.bf16.mxu0 %v7157_v38  ;;  %5980 = vmatprep.subr.bf16.mxu1 %v7159_v39  ;;  %v513_v38 = vld [vmem:[%s8496_s12 + $0x680] sm:$0xff] }
  0xdd   : > { %v517_v39 = vld [vmem:[%s8496_s12 + $0x6a0] sm:$0xff] }
  0xde   : > { %v7220_v51 = vcombine.low %v513_v38, %v517_v39  ;;  %v609_v21 = vld [vmem:[%s8496_s12 + $0x980] sm:$0xff] }
  0xdf   : > { %5694 = vmatpush1.bf16.msra.mxu0 %v7156_v44  ;;  %5981 = vmatpush1.bf16.msra.mxu1 %v7158_v46  ;;  %v7221_v44 = vcombine.high %v513_v38, %v517_v39  ;;  %v7223_v46 = vcombine.high %v514_v40, %v518_v41  ;;  %v573_v38 = vld [vmem:[%s8496_s12 + $0x860] sm:$0xff]  ;;  %v1231_v39 = vcombine.high %v8677_v31, %v8677_v31  ;;  %v570_v41 = vld [vmem:[%s8496_s12 + $0x848] sm:$0xff] }
  0xe0   : > { %5695 = vmatprep.subr.bf16.mxu0 %v7165_v47  ;;  %5982 = vmatprep.subr.bf16.mxu1 %v7167_v48  ;;  %v521_v47 = vld [vmem:[%s8496_s12 + $0x6c0] sm:$0xff]  ;;  %v8687_v40 = vcombine.high %v8604_v25, %v8604_v25 }
  0xe1   : > { %v525_v48 = vld [vmem:[%s8496_s12 + $0x6e0] sm:$0xff] }
  0xe2   : > { %v7228_v60 = vcombine.low %v521_v47, %v525_v48 }
  0xe3   : > { %5696 = vmatpush1.bf16.msra.mxu0 %v7164_v53  ;;  %5983 = vmatpush1.bf16.msra.mxu1 %v7166_v54  ;;  %v7229_v53 = vcombine.high %v521_v47, %v525_v48  ;;  %v7231_v54 = vcombine.high %v522_v49, %v526_v50  ;;  %v577_v48 = vld [vmem:[%s8496_s12 + $0x880] sm:$0xff]  ;;  %v8694_v50 = vrot.slane %v1231_v39, %v8543_v55 }
  0xe4   : > { %5697 = vmatprep.subr.bf16.mxu0 %v7173_v56  ;;  %5984 = vmatprep.subr.bf16.mxu1 %v7175_v57  ;;  %v529_v56 = vld [vmem:[%s8496_s12 + $0x700] sm:$0xff] }
  0xe5   : > { %v533_v57 = vld [vmem:[%s8496_s12 + $0x720] sm:$0xff] }
  0xe6   : > { %v7236_v6 = vcombine.low %v529_v56, %v533_v57  ;;  %v581_v49 = vld [vmem:[%s8496_s12 + $0x8a0] sm:$0xff] }
  0xe7   : > { %5698 = vmatpush1.bf16.msra.mxu0 %v7172_v63  ;;  %5985 = vmatpush1.bf16.msra.mxu1 %v7174_v0  ;;  %v7237_v63 = vcombine.high %v529_v56, %v533_v57  ;;  %v7239_v0 = vcombine.high %v530_v58, %v534_v59  ;;  %v7285_v56 = vcombine.high %v577_v48, %v581_v49  ;;  %v585_v58 = vld [vmem:[%s8496_s12 + $0x8c0] sm:$0xff] }
  0xe8   : > { %5699 = vmatprep.subr.bf16.mxu0 %v7181_v2  ;;  %5986 = vmatprep.subr.bf16.mxu1 %v7183_v3  ;;  %v537_v2 = vld [vmem:[%s8496_s12 + $0x740] sm:$0xff] }
  0xe9   : > { %v541_v3 = vld [vmem:[%s8496_s12 + $0x760] sm:$0xff] }
  0xea   : > { %v7244_v15 = vcombine.low %v537_v2, %v541_v3  ;;  %v589_v59 = vld [vmem:[%s8496_s12 + $0x8e0] sm:$0xff] }
  0xeb   : > { %5700 = vmatpush1.bf16.msra.mxu0 %v7180_v8  ;;  %5987 = vmatpush1.bf16.msra.mxu1 %v7182_v9  ;;  %v7245_v8 = vcombine.high %v537_v2, %v541_v3  ;;  %v7247_v9 = vcombine.high %v538_v4, %v542_v5  ;;  %v7293_v2 = vcombine.high %v585_v58, %v589_v59  ;;  %v593_v4 = vld [vmem:[%s8496_s12 + $0x900] sm:$0xff] }
  0xec   : > { %5701 = vmatprep.subr.bf16.mxu0 %v7189_v10  ;;  %5988 = vmatprep.subr.bf16.mxu1 %v7191_v12  ;;  %v545_v10 = vld [vmem:[%s8496_s12 + $0x780] sm:$0xff] }
  0xed   : > { %v549_v12 = vld [vmem:[%s8496_s12 + $0x7a0] sm:$0xff] }
  0xee   : > { %v7252_v24 = vcombine.low %v545_v10, %v549_v12  ;;  %v597_v5 = vld [vmem:[%s8496_s12 + $0x920] sm:$0xff] }
  0xef   : > { %5702 = vmatpush1.bf16.msra.mxu0 %v7188_v17  ;;  %5989 = vmatpush1.bf16.msra.mxu1 %v7190_v18  ;;  %v7253_v17 = vcombine.high %v545_v10, %v549_v12  ;;  %v7255_v18 = vcombine.high %v546_v13, %v550_v14  ;;  %v7301_v10 = vcombine.high %v593_v4, %v597_v5  ;;  %v629_v39 = vld [vmem:[%s8496_s12 + $0xa20] sm:$0xff] }
  0xf0   : > { %5703 = vmatprep.subr.bf16.mxu0 %v7197_v19  ;;  %5990 = vmatprep.subr.bf16.mxu1 %v7199_v20  ;;  %v553_v19 = vld [vmem:[%s8496_s12 + $0x7c0] sm:$0xff] }
  0xf1   : > { %v557_v20 = vld [vmem:[%s8496_s12 + $0x7e0] sm:$0xff] }
  0xf2   : > { %v7260_v33 = vcombine.low %v553_v19, %v557_v20 }
  0xf3   : > { %5704 = vmatpush1.bf16.msra.mxu0 %v7196_v26  ;;  %5991 = vmatpush1.bf16.msra.mxu1 %v7198_v27  ;;  %v7254_v26 = vcombine.low %v546_v13, %v550_v14  ;;  %v7261_v27 = vcombine.high %v553_v19, %v557_v20  ;;  %v601_v13 = vld [vmem:[%s8496_s12 + $0x940] sm:$0xff] }
  0xf4   : > { %5705 = vmatprep.subr.bf16.mxu0 %v7205_v28  ;;  %5992 = vmatprep.subr.bf16.mxu1 %v7207_v29  ;;  %v7263_v28 = vcombine.high %v554_v22, %v558_v23  ;;  %v561_v29 = vld [vmem:[%s8496_s12 + $0x800] sm:$0xff] }
  0xf5   : > { %v605_v14 = vld [vmem:[%s8496_s12 + $0x960] sm:$0xff] }
  0xf6   : > { %v7309_v19 = vcombine.high %v601_v13, %v605_v14 }
  0xf7   : > { %5706 = vmatpush1.bf16.msra.mxu0 %v7204_v1  ;;  %5993 = vmatpush1.bf16.msra.mxu1 %v7206_v35  ;;  %v7262_v1 = vcombine.low %v554_v22, %v558_v23  ;;  %v7269_v35 = vcombine.high %v561_v29, %v565_v30  ;;  %v613_v22 = vld [vmem:[%s8496_s12 + $0x9a0] sm:$0xff]  ;;  %v610_v23 = vld [vmem:[%s8496_s12 + $0x988] sm:$0xff] }
  0xf8   : > { %5707 = vmatprep.subr.bf16.mxu0 %v7213_v36  ;;  %5994 = vmatprep.subr.bf16.mxu1 %v7215_v37  ;;  %v7271_v36 = vcombine.high %v562_v61, %v566_v32  ;;  %v569_v37 = vld [vmem:[%s8496_s12 + $0x840] sm:$0xff] }
  0xfb   : > { %5708 = vmatpush1.bf16.msra.mxu0 %v7212_v42  ;;  %5995 = vmatpush1.bf16.msra.mxu1 %v7214_v43  ;;  %v574_v42 = vld [vmem:[%s8496_s12 + $0x868] sm:$0xff]  ;;  %v7268_v43 = vcombine.low %v561_v29, %v565_v30  ;;  %v617_v30 = vld [vmem:[%s8496_s12 + $0x9c0] sm:$0xff] }
  0xfc   : > { %5709 = vmatprep.subr.bf16.mxu0 %v7221_v44  ;;  %5996 = vmatprep.subr.bf16.mxu1 %v7223_v46  ;;  %v7270_v44 = vcombine.low %v562_v61, %v566_v32  ;;  %v7277_v46 = vcombine.high %v569_v37, %v573_v38  ;;  %v7279_v47 = vcombine.high %v570_v41, %v574_v42  ;;  %v621_v61 = vld [vmem:[%s8496_s12 + $0x9e0] sm:$0xff]  ;;  %v618_v32 = vld [vmem:[%s8496_s12 + $0x9c8] sm:$0xff] }
  0xff   : > { %5710 = vmatpush1.bf16.msra.mxu0 %v7220_v51  ;;  %5997 = vmatpush1.bf16.msra.mxu1 %v7222_v52  ;;  %v578_v51 = vld [vmem:[%s8496_s12 + $0x888] sm:$0xff] }
 0x100   : > { %5711 = vmatprep.subr.bf16.mxu0 %v7229_v53  ;;  %5998 = vmatprep.subr.bf16.mxu1 %v7231_v54  ;;  %v582_v52 = vld [vmem:[%s8496_s12 + $0x8a8] sm:$0xff]  ;;  %v7276_v53 = vcombine.low %v569_v37, %v573_v38  ;;  %v7278_v54 = vcombine.low %v570_v41, %v574_v42  ;;  %v625_v38 = vld [vmem:[%s8496_s12 + $0xa00] sm:$0xff] }
 0x101   : > { %v7287_v57 = vcombine.high %v578_v51, %v582_v52  ;;  %v626_v41 = vld [vmem:[%s8496_s12 + $0xa08] sm:$0xff] }
 0x102   : > { %v630_v42 = vld [vmem:[%s8496_s12 + $0xa28] sm:$0xff] }
 0x103   : > { %5712 = vmatpush1.bf16.msra.mxu0 %v7228_v60  ;;  %5999 = vmatpush1.bf16.msra.mxu1 %v7230_v62  ;;  %v586_v60 = vld [vmem:[%s8496_s12 + $0x8c8] sm:$0xff] }
 0x104   : > { %5713 = vmatprep.subr.bf16.mxu0 %v7237_v63  ;;  %6000 = vmatprep.subr.bf16.mxu1 %v7239_v0  ;;  %v590_v62 = vld [vmem:[%s8496_s12 + $0x8e8] sm:$0xff]  ;;  %v7284_v63 = vcombine.low %v577_v48, %v581_v49  ;;  %v7286_v0 = vcombine.low %v578_v51, %v582_v52  ;;  %v633_v48 = vld [vmem:[%s8496_s12 + $0xa40] sm:$0xff] }
 0x105   : > { %v7295_v3 = vcombine.high %v586_v60, %v590_v62  ;;  %v637_v49 = vld [vmem:[%s8496_s12 + $0xa60] sm:$0xff]  ;;  %v634_v51 = vld [vmem:[%s8496_s12 + $0xa48] sm:$0xff] }
 0x106   : > { %v638_v52 = vld [vmem:[%s8496_s12 + $0xa68] sm:$0xff] }
 0x107   : > { %5714 = vmatpush1.bf16.msra.mxu0 %v7236_v6  ;;  %6001 = vmatpush1.bf16.msra.mxu1 %v7238_v7  ;;  %v594_v6 = vld [vmem:[%s8496_s12 + $0x908] sm:$0xff] }
 0x108   : > { %5715 = vmatprep.subr.bf16.mxu0 %v7245_v8  ;;  %6002 = vmatprep.subr.bf16.mxu1 %v7247_v9  ;;  %v598_v7 = vld [vmem:[%s8496_s12 + $0x928] sm:$0xff]  ;;  %v7292_v8 = vcombine.low %v585_v58, %v589_v59  ;;  %v7294_v9 = vcombine.low %v586_v60, %v590_v62  ;;  %v641_v58 = vld [vmem:[%s8496_s12 + $0xa80] sm:$0xff] }
 0x109   : > { %v7303_v12 = vcombine.high %v594_v6, %v598_v7  ;;  %v645_v59 = vld [vmem:[%s8496_s12 + $0xaa0] sm:$0xff]  ;;  %v642_v60 = vld [vmem:[%s8496_s12 + $0xa88] sm:$0xff] }
 0x10a   : > { %v646_v62 = vld [vmem:[%s8496_s12 + $0xaa8] sm:$0xff] }
 0x10b   : > { %5716 = vmatpush1.bf16.msra.mxu0 %v7244_v15  ;;  %6003 = vmatpush1.bf16.msra.mxu1 %v7246_v16  ;;  %v602_v15 = vld [vmem:[%s8496_s12 + $0x948] sm:$0xff] }
 0x10c   : > { %5717 = vmatprep.subr.bf16.mxu0 %v7253_v17  ;;  %6004 = vmatprep.subr.bf16.mxu1 %v7255_v18  ;;  %v606_v16 = vld [vmem:[%s8496_s12 + $0x968] sm:$0xff]  ;;  %v7300_v17 = vcombine.low %v593_v4, %v597_v5  ;;  %v7302_v18 = vcombine.low %v594_v6, %v598_v7  ;;  %v649_v4 = vld [vmem:[%s8496_s12 + $0xac0] sm:$0xff] }
 0x10d   : > { %v7311_v20 = vcombine.high %v602_v15, %v606_v16  ;;  %v653_v5 = vld [vmem:[%s8496_s12 + $0xae0] sm:$0xff]  ;;  %v650_v6 = vld [vmem:[%s8496_s12 + $0xac8] sm:$0xff] }
 0x10e   : > { %v654_v7 = vld [vmem:[%s8496_s12 + $0xae8] sm:$0xff] }
 0x10f   : > { %5718 = vmatpush1.bf16.msra.mxu0 %v7252_v24  ;;  %6005 = vmatpush1.bf16.msra.mxu1 %v7254_v26  ;;  %v614_v24 = vld [vmem:[%s8496_s12 + $0x9a8] sm:$0xff]  ;;  %v7308_v26 = vcombine.low %v601_v13, %v605_v14  ;;  %v657_v13 = vld [vmem:[%s8496_s12 + $0xb00] sm:$0xff] }
 0x110   : > { %5719 = vmatprep.subr.bf16.mxu0 %v7261_v27  ;;  %6006 = vmatprep.subr.bf16.mxu1 %v7263_v28  ;;  %v7310_v27 = vcombine.low %v602_v15, %v606_v16  ;;  %v7317_v28 = vcombine.high %v609_v21, %v613_v22  ;;  %v7319_v29 = vcombine.high %v610_v23, %v614_v24  ;;  %v661_v14 = vld [vmem:[%s8496_s12 + $0xb20] sm:$0xff]  ;;  %v658_v15 = vld [vmem:[%s8496_s12 + $0xb08] sm:$0xff] }
 0x111   : > { %v662_v16 = vld [vmem:[%s8496_s12 + $0xb28] sm:$0xff] }
 0x113   : > { %5720 = vmatpush1.bf16.msra.mxu0 %v7260_v33  ;;  %6007 = vmatpush1.bf16.msra.mxu1 %v7262_v1  ;;  %v622_v33 = vld [vmem:[%s8496_s12 + $0x9e8] sm:$0xff]  ;;  %v7316_v1 = vcombine.low %v609_v21, %v613_v22  ;;  %v665_v21 = vld [vmem:[%s8496_s12 + $0xb40] sm:$0xff] }
 0x114   : > { %5730 = vmatprep.subr.bf16.mxu0 %v7269_v35  ;;  %6017 = vmatprep.subr.bf16.mxu1 %v7271_v36  ;;  %v7318_v35 = vcombine.low %v610_v23, %v614_v24  ;;  %v7325_v36 = vcombine.high %v617_v30, %v621_v61  ;;  %v7327_v37 = vcombine.high %v618_v32, %v622_v33  ;;  %v669_v22 = vld [vmem:[%s8496_s12 + $0xb60] sm:$0xff]  ;;  %v666_v23 = vld [vmem:[%s8496_s12 + $0xb48] sm:$0xff] }
 0x115   : > { %v670_v24 = vld [vmem:[%s8496_s12 + $0xb68] sm:$0xff] }
 0x116   : > { %5722 = vmatmul.mubr.bf16.vlgmr.msra.gmra.mrb[0].mxu0 %v8687_v40  ;;  %6009 = vmatmul.mubr.bf16.vlgmr.msra.gmra.mrb[0].mxu1 %v8687_v40 }
 0x117   : > { %5731 = vmatpush1.bf16.msra.mxu0 %v7268_v43  ;;  %6018 = vmatpush1.bf16.msra.mxu1 %v7270_v44  ;;  %v7324_v43 = vcombine.low %v617_v30, %v621_v61  ;;  %v7326_v44 = vcombine.low %v618_v32, %v622_v33  ;;  %v673_v30 = vld [vmem:[%s8496_s12 + $0xb80] sm:$0xff]  ;;  %v674_v32 = vld [vmem:[%s8496_s12 + $0xb88] sm:$0xff] }
 0x118   : > { %5732 = vmatprep.subr.bf16.mxu0 %v7277_v46  ;;  %6019 = vmatprep.subr.bf16.mxu1 %v7279_v47  ;;  %v7333_v46 = vcombine.high %v625_v38, %v629_v39  ;;  %v7335_v47 = vcombine.high %v626_v41, %v630_v42  ;;  %v677_v61 = vld [vmem:[%s8496_s12 + $0xba0] sm:$0xff]  ;;  %v678_v33 = vld [vmem:[%s8496_s12 + $0xba8] sm:$0xff] }
 0x119   : > { %5762 = vmatprep.mubr.bf16.mxu0 %v8694_v50  ;;  %6049 = vmatprep.mubr.bf16.mxu1 %v8694_v50 }
 0x11b   : > { %5733 = vmatpush1.bf16.msra.mxu0 %v7276_v53  ;;  %6020 = vmatpush1.bf16.msra.mxu1 %v7278_v54  ;;  %v7332_v53 = vcombine.low %v625_v38, %v629_v39  ;;  %v7334_v54 = vcombine.low %v626_v41, %v630_v42  ;;  %v681_v38 = vld [vmem:[%s8496_s12 + $0xbc0] sm:$0xff]  ;;  %v682_v41 = vld [vmem:[%s8496_s12 + $0xbc8] sm:$0xff] }
 0x11c   : > { %5734 = vmatprep.subr.bf16.mxu0 %v7285_v56  ;;  %6021 = vmatprep.subr.bf16.mxu1 %v7287_v57  ;;  %v7341_v56 = vcombine.high %v633_v48, %v637_v49  ;;  %v7343_v57 = vcombine.high %v634_v51, %v638_v52  ;;  %v685_v39 = vld [vmem:[%s8496_s12 + $0xbe0] sm:$0xff]  ;;  %v686_v42 = vld [vmem:[%s8496_s12 + $0xbe8] sm:$0xff] }
 0x11f   : > { %5735 = vmatpush1.bf16.msra.mxu0 %v7284_v63  ;;  %6022 = vmatpush1.bf16.msra.mxu1 %v7286_v0  ;;  %v7340_v63 = vcombine.low %v633_v48, %v637_v49  ;;  %v7342_v0 = vcombine.low %v634_v51, %v638_v52  ;;  %v689_v48 = vld [vmem:[%s8496_s12 + $0xc00] sm:$0xff]  ;;  %v690_v51 = vld [vmem:[%s8496_s12 + $0xc08] sm:$0xff] }
 0x120   : > { %5736 = vmatprep.subr.bf16.mxu0 %v7293_v2  ;;  %6023 = vmatprep.subr.bf16.mxu1 %v7295_v3  ;;  %v7349_v2 = vcombine.high %v641_v58, %v645_v59  ;;  %v7351_v3 = vcombine.high %v642_v60, %v646_v62  ;;  %v693_v49 = vld [vmem:[%s8496_s12 + $0xc20] sm:$0xff]  ;;  %v694_v52 = vld [vmem:[%s8496_s12 + $0xc28] sm:$0xff] }
 0x123   : > { %5737 = vmatpush1.bf16.msra.mxu0 %v7292_v8  ;;  %6024 = vmatpush1.bf16.msra.mxu1 %v7294_v9  ;;  %v7348_v8 = vcombine.low %v641_v58, %v645_v59  ;;  %v7350_v9 = vcombine.low %v642_v60, %v646_v62  ;;  %v697_v58 = vld [vmem:[%s8496_s12 + $0xc40] sm:$0xff]  ;;  %v8762_v60 = vrot.slane %v8677_v31, %v8543_v55  ;;  %v698_v62 = vld [vmem:[%s8496_s12 + $0xc48] sm:$0xff] }
 0x124   : > { %5738 = vmatprep.subr.bf16.mxu0 %v7301_v10  ;;  %6025 = vmatprep.subr.bf16.mxu1 %v7303_v12  ;;  %v7357_v10 = vcombine.high %v649_v4, %v653_v5  ;;  %v7359_v12 = vcombine.high %v650_v6, %v654_v7  ;;  %v701_v59 = vld [vmem:[%s8496_s12 + $0xc60] sm:$0xff]  ;;  %v706_v31 = vld [vmem:[%s8496_s12 + $0xc88] sm:$0xff] }
 0x127   : > { %5739 = vmatpush1.bf16.msra.mxu0 %v7300_v17  ;;  %6026 = vmatpush1.bf16.msra.mxu1 %v7302_v18  ;;  %v7356_v17 = vcombine.low %v649_v4, %v653_v5  ;;  %v7358_v18 = vcombine.low %v650_v6, %v654_v7  ;;  %v705_v5 = vld [vmem:[%s8496_s12 + $0xc80] sm:$0xff]  ;;  %v8770_v7 = vcombine.high %v8694_v50, %v8694_v50 }
 0x128   : > { %5740 = vmatprep.subr.bf16.mxu0 %v7309_v19  ;;  %6027 = vmatprep.subr.bf16.mxu1 %v7311_v20  ;;  %v7365_v19 = vcombine.high %v657_v13, %v661_v14  ;;  %v7367_v20 = vcombine.high %v658_v15, %v662_v16  ;;  %v709_v6 = vld [vmem:[%s8496_s12 + $0xca0] sm:$0xff] }
 0x12b   : > { %5741 = vmatpush1.bf16.msra.mxu0 %v7308_v26  ;;  %6028 = vmatpush1.bf16.msra.mxu1 %v7310_v27  ;;  %v7364_v26 = vcombine.low %v657_v13, %v661_v14  ;;  %v7366_v27 = vcombine.low %v658_v15, %v662_v16  ;;  %v713_v14 = vld [vmem:[%s8496_s12 + $0xcc0] sm:$0xff]  ;;  %v714_v16 = vld [vmem:[%s8496_s12 + $0xcc8] sm:$0xff] }
 0x12c   : > { %5742 = vmatprep.subr.bf16.mxu0 %v7317_v28  ;;  %6029 = vmatprep.subr.bf16.mxu1 %v7319_v29  ;;  %v7373_v28 = vcombine.high %v665_v21, %v669_v22  ;;  %v7375_v29 = vcombine.high %v666_v23, %v670_v24  ;;  %v717_v15 = vld [vmem:[%s8496_s12 + $0xce0] sm:$0xff] }
 0x12f   : > { %5743 = vmatpush1.bf16.msra.mxu0 %v7316_v1  ;;  %6030 = vmatpush1.bf16.msra.mxu1 %v7318_v35  ;;  %v7372_v1 = vcombine.low %v665_v21, %v669_v22  ;;  %v7374_v35 = vcombine.low %v666_v23, %v670_v24  ;;  %v721_v22 = vld [vmem:[%s8496_s12 + $0xd00] sm:$0xff]  ;;  %v722_v24 = vld [vmem:[%s8496_s12 + $0xd08] sm:$0xff] }
 0x130   : > { %5744 = vmatprep.subr.bf16.mxu0 %v7325_v36  ;;  %6031 = vmatprep.subr.bf16.mxu1 %v7327_v37  ;;  %v7381_v36 = vcombine.high %v673_v30, %v677_v61  ;;  %v7383_v37 = vcombine.high %v674_v32, %v678_v33  ;;  %v725_v23 = vld [vmem:[%s8496_s12 + $0xd20] sm:$0xff] }
 0x133   : > { %5745 = vmatpush1.bf16.msra.mxu0 %v7324_v43  ;;  %6032 = vmatpush1.bf16.msra.mxu1 %v7326_v44  ;;  %v7380_v43 = vcombine.low %v673_v30, %v677_v61  ;;  %v7382_v44 = vcombine.low %v674_v32, %v678_v33  ;;  %v729_v61 = vld [vmem:[%s8496_s12 + $0xd40] sm:$0xff]  ;;  %v730_v33 = vld [vmem:[%s8496_s12 + $0xd48] sm:$0xff] }
 0x134   : > { %5746 = vmatprep.subr.bf16.mxu0 %v7333_v46  ;;  %6033 = vmatprep.subr.bf16.mxu1 %v7335_v47  ;;  %v7389_v46 = vcombine.high %v681_v38, %v685_v39  ;;  %v7391_v47 = vcombine.high %v682_v41, %v686_v42  ;;  %v733_v32 = vld [vmem:[%s8496_s12 + $0xd60] sm:$0xff] }
 0x137   : > { %5747 = vmatpush1.bf16.msra.mxu0 %v7332_v53  ;;  %6034 = vmatpush1.bf16.msra.mxu1 %v7334_v54  ;;  %v7388_v53 = vcombine.low %v681_v38, %v685_v39  ;;  %v7390_v54 = vcombine.low %v682_v41, %v686_v42  ;;  %v737_v39 = vld [vmem:[%s8496_s12 + $0xd80] sm:$0xff]  ;;  %v738_v42 = vld [vmem:[%s8496_s12 + $0xd88] sm:$0xff] }
 0x138   : > { %5748 = vmatprep.subr.bf16.mxu0 %v7341_v56  ;;  %6035 = vmatprep.subr.bf16.mxu1 %v7343_v57  ;;  %v7397_v56 = vcombine.high %v689_v48, %v693_v49  ;;  %v7399_v57 = vcombine.high %v690_v51, %v694_v52  ;;  %v741_v41 = vld [vmem:[%s8496_s12 + $0xda0] sm:$0xff] }
 0x13b   : > { %5749 = vmatpush1.bf16.msra.mxu0 %v7340_v63  ;;  %6036 = vmatpush1.bf16.msra.mxu1 %v7342_v0  ;;  %v702_v63 = vld [vmem:[%s8496_s12 + $0xc68] sm:$0xff]  ;;  %v7396_v0 = vcombine.low %v689_v48, %v693_v49  ;;  %v745_v49 = vld [vmem:[%s8496_s12 + $0xdc0] sm:$0xff] }
 0x13c   : > { %5750 = vmatprep.subr.bf16.mxu0 %v7349_v2  ;;  %6037 = vmatprep.subr.bf16.mxu1 %v7351_v3  ;;  %v7398_v2 = vcombine.low %v690_v51, %v694_v52  ;;  %v7405_v3 = vcombine.high %v697_v58, %v701_v59  ;;  %v7407_v4 = vcombine.high %v698_v62, %v702_v63  ;;  %v749_v51 = vld [vmem:[%s8496_s12 + $0xde0] sm:$0xff]  ;;  %v746_v52 = vld [vmem:[%s8496_s12 + $0xdc8] sm:$0xff] }
 0x13f   : > { %5751 = vmatpush1.bf16.msra.mxu0 %v7348_v8  ;;  %6038 = vmatpush1.bf16.msra.mxu1 %v7350_v9  ;;  %v710_v8 = vld [vmem:[%s8496_s12 + $0xca8] sm:$0xff]  ;;  %v7404_v9 = vcombine.low %v697_v58, %v701_v59  ;;  %v753_v59 = vld [vmem:[%s8496_s12 + $0xe00] sm:$0xff] }
 0x140   : > { %5752 = vmatprep.subr.bf16.mxu0 %v7357_v10  ;;  %6039 = vmatprep.subr.bf16.mxu1 %v7359_v12  ;;  %v7406_v10 = vcombine.low %v698_v62, %v702_v63  ;;  %v7413_v12 = vcombine.high %v705_v5, %v709_v6  ;;  %v7415_v13 = vcombine.high %v706_v31, %v710_v8  ;;  %v757_v62 = vld [vmem:[%s8496_s12 + $0xe20] sm:$0xff]  ;;  %v754_v63 = vld [vmem:[%s8496_s12 + $0xe08] sm:$0xff] }
 0x143   : > { %5753 = vmatpush1.bf16.msra.mxu0 %v7356_v17  ;;  %6040 = vmatpush1.bf16.msra.mxu1 %v7358_v18  ;;  %v718_v17 = vld [vmem:[%s8496_s12 + $0xce8] sm:$0xff]  ;;  %v7412_v18 = vcombine.low %v705_v5, %v709_v6  ;;  %v761_v6 = vld [vmem:[%s8496_s12 + $0xe40] sm:$0xff] }
 0x144   : > { %5754 = vmatprep.subr.bf16.mxu0 %v7365_v19  ;;  %6041 = vmatprep.subr.bf16.mxu1 %v7367_v20  ;;  %v7414_v19 = vcombine.low %v706_v31, %v710_v8  ;;  %v7421_v20 = vcombine.high %v713_v14, %v717_v15  ;;  %v7423_v21 = vcombine.high %v714_v16, %v718_v17  ;;  %v765_v31 = vld [vmem:[%s8496_s12 + $0xe60] sm:$0xff]  ;;  %v762_v8 = vld [vmem:[%s8496_s12 + $0xe48] sm:$0xff] }
 0x147   : > { %5755 = vmatpush1.bf16.msra.mxu0 %v7364_v26  ;;  %6042 = vmatpush1.bf16.msra.mxu1 %v7366_v27  ;;  %v726_v26 = vld [vmem:[%s8496_s12 + $0xd28] sm:$0xff]  ;;  %v7420_v27 = vcombine.low %v713_v14, %v717_v15  ;;  %v769_v15 = vld [vmem:[%s8496_s12 + $0xe80] sm:$0xff] }
 0x148   : > { %5756 = vmatprep.subr.bf16.mxu0 %v7373_v28  ;;  %6043 = vmatprep.subr.bf16.mxu1 %v7375_v29  ;;  %v7422_v28 = vcombine.low %v714_v16, %v718_v17  ;;  %v7429_v29 = vcombine.high %v721_v22, %v725_v23  ;;  %v7431_v30 = vcombine.high %v722_v24, %v726_v26  ;;  %v773_v16 = vld [vmem:[%s8496_s12 + $0xea0] sm:$0xff]  ;;  %v770_v17 = vld [vmem:[%s8496_s12 + $0xe88] sm:$0xff] }
 0x14b   : > { %5757 = vmatpush1.bf16.msra.mxu0 %v7372_v1  ;;  %6044 = vmatpush1.bf16.msra.mxu1 %v7374_v35  ;;  %v734_v1 = vld [vmem:[%s8496_s12 + $0xd68] sm:$0xff]  ;;  %v7428_v35 = vcombine.low %v721_v22, %v725_v23  ;;  %v777_v23 = vld [vmem:[%s8496_s12 + $0xec0] sm:$0xff] }
 0x14c   : > { %5758 = vmatprep.subr.bf16.mxu0 %v7381_v36  ;;  %6045 = vmatprep.subr.bf16.mxu1 %v7383_v37  ;;  %v7430_v36 = vcombine.low %v722_v24, %v726_v26  ;;  %v7437_v37 = vcombine.high %v729_v61, %v733_v32  ;;  %v7439_v38 = vcombine.high %v730_v33, %v734_v1  ;;  %v781_v24 = vld [vmem:[%s8496_s12 + $0xee0] sm:$0xff]  ;;  %v778_v26 = vld [vmem:[%s8496_s12 + $0xec8] sm:$0xff] }
 0x14f   : > { %5759 = vmatpush1.bf16.msra.mxu0 %v7380_v43  ;;  %6046 = vmatpush1.bf16.msra.mxu1 %v7382_v44  ;;  %v742_v43 = vld [vmem:[%s8496_s12 + $0xda8] sm:$0xff]  ;;  %v7436_v44 = vcombine.low %v729_v61, %v733_v32  ;;  %v785_v32 = vld [vmem:[%s8496_s12 + $0xf00] sm:$0xff] }
 0x150   : > { %5760 = vmatprep.subr.bf16.mxu0 %v7389_v46  ;;  %6047 = vmatprep.subr.bf16.mxu1 %v7391_v47  ;;  %v7438_v46 = vcombine.low %v730_v33, %v734_v1  ;;  %v7445_v47 = vcombine.high %v737_v39, %v741_v41  ;;  %v7447_v48 = vcombine.high %v738_v42, %v742_v43  ;;  %v789_v33 = vld [vmem:[%s8496_s12 + $0xf20] sm:$0xff]  ;;  %v786_v1 = vld [vmem:[%s8496_s12 + $0xf08] sm:$0xff] }
 0x153   : > { %5761 = vmatpush1.bf16.msra.mxu0 %v7388_v53  ;;  %6048 = vmatpush1.bf16.msra.mxu1 %v7390_v54  ;;  %v750_v53 = vld [vmem:[%s8496_s12 + $0xde8] sm:$0xff]  ;;  %v7444_v54 = vcombine.low %v737_v39, %v741_v41  ;;  %v793_v41 = vld [vmem:[%s8496_s12 + $0xf40] sm:$0xff] }
 0x154   : > { %5771 = vmatprep.subr.bf16.mxu0 %v7397_v56  ;;  %6058 = vmatprep.subr.bf16.mxu1 %v7399_v57  ;;  %v7446_v56 = vcombine.low %v738_v42, %v742_v43  ;;  %v7453_v57 = vcombine.high %v745_v49, %v749_v51  ;;  %v7455_v58 = vcombine.high %v746_v52, %v750_v53  ;;  %v797_v42 = vld [vmem:[%s8496_s12 + $0xf60] sm:$0xff]  ;;  %v794_v43 = vld [vmem:[%s8496_s12 + $0xf48] sm:$0xff] }
 0x156   : > { %5763 = vmatmul.mubr.bf16.vlgmr.msra.gmra.mrb[0].mxu0 %v8762_v60  ;;  %6050 = vmatmul.mubr.bf16.vlgmr.msra.gmra.mrb[0].mxu1 %v8762_v60 }
 0x157   : > { %5772 = vmatpush1.bf16.msra.mxu0 %v7396_v0  ;;  %6059 = vmatpush1.bf16.msra.mxu1 %v7398_v2  ;;  %v758_v0 = vld [vmem:[%s8496_s12 + $0xe28] sm:$0xff]  ;;  %v7452_v2 = vcombine.low %v745_v49, %v749_v51  ;;  %v801_v51 = vld [vmem:[%s8496_s12 + $0xf80] sm:$0xff] }
 0x158   : > { %5773 = vmatprep.subr.bf16.mxu0 %v7405_v3  ;;  %6060 = vmatprep.subr.bf16.mxu1 %v7407_v4  ;;  %v7454_v3 = vcombine.low %v746_v52, %v750_v53  ;;  %v7461_v4 = vcombine.high %v753_v59, %v757_v62  ;;  %v7463_v5 = vcombine.high %v754_v63, %v758_v0  ;;  %v805_v52 = vld [vmem:[%s8496_s12 + $0xfa0] sm:$0xff]  ;;  %v802_v53 = vld [vmem:[%s8496_s12 + $0xf88] sm:$0xff] }
 0x159   : > { %5803 = vmatprep.mubr.bf16.mxu0 %v8770_v7  ;;  %6090 = vmatprep.mubr.bf16.mxu1 %v8770_v7 }
 0x15b   : > { %5774 = vmatpush1.bf16.msra.mxu0 %v7404_v9  ;;  %6061 = vmatpush1.bf16.msra.mxu1 %v7406_v10  ;;  %v766_v9 = vld [vmem:[%s8496_s12 + $0xe68] sm:$0xff]  ;;  %v7460_v10 = vcombine.low %v753_v59, %v757_v62  ;;  %v809_v62 = vld [vmem:[%s8496_s12 + $0xfc0] sm:$0xff] }
 0x15c   : > { %5775 = vmatprep.subr.bf16.mxu0 %v7413_v12  ;;  %6062 = vmatprep.subr.bf16.mxu1 %v7415_v13  ;;  %v7462_v12 = vcombine.low %v754_v63, %v758_v0  ;;  %v7469_v13 = vcombine.high %v761_v6, %v765_v31  ;;  %v7471_v14 = vcombine.high %v762_v8, %v766_v9  ;;  %v813_v63 = vld [vmem:[%s8496_s12 + $0xfe0] sm:$0xff]  ;;  %v810_v0 = vld [vmem:[%s8496_s12 + $0xfc8] sm:$0xff] }
 0x15f   : > { %5776 = vmatpush1.bf16.msra.mxu0 %v7412_v18  ;;  %6063 = vmatpush1.bf16.msra.mxu1 %v7414_v19  ;;  %v774_v18 = vld [vmem:[%s8496_s12 + $0xea8] sm:$0xff]  ;;  %v7468_v19 = vcombine.low %v761_v6, %v765_v31  ;;  %v7517_v6 = vcombine.high %v809_v62, %v813_v63 }
 0x160   : > { %5777 = vmatprep.subr.bf16.mxu0 %v7421_v20  ;;  %6064 = vmatprep.subr.bf16.mxu1 %v7423_v21  ;;  %v7470_v20 = vcombine.low %v762_v8, %v766_v9  ;;  %v7477_v21 = vcombine.high %v769_v15, %v773_v16  ;;  %v7479_v22 = vcombine.high %v770_v17, %v774_v18  ;;  %v817_v8 = vld [vmem:[%s8496_s12 + $0x1000] sm:$0xff] }
 0x161   : > { %v821_v9 = vld [vmem:[%s8496_s12 + $0x1020] sm:$0xff] }
 0x163   : > { %5778 = vmatpush1.bf16.msra.mxu0 %v7420_v27  ;;  %6065 = vmatpush1.bf16.msra.mxu1 %v7422_v28  ;;  %v782_v27 = vld [vmem:[%s8496_s12 + $0xee8] sm:$0xff]  ;;  %v7476_v28 = vcombine.low %v769_v15, %v773_v16  ;;  %v7525_v16 = vcombine.high %v817_v8, %v821_v9 }
 0x164   : > { %5779 = vmatprep.subr.bf16.mxu0 %v7429_v29  ;;  %6066 = vmatprep.subr.bf16.mxu1 %v7431_v30  ;;  %v7478_v29 = vcombine.low %v770_v17, %v774_v18  ;;  %v7485_v30 = vcombine.high %v777_v23, %v781_v24  ;;  %v7487_v61 = vcombine.high %v778_v26, %v782_v27  ;;  %v825_v18 = vld [vmem:[%s8496_s12 + $0x1040] sm:$0xff] }
 0x167   : > { %5780 = vmatpush1.bf16.msra.mxu0 %v7428_v35  ;;  %6067 = vmatpush1.bf16.msra.mxu1 %v7430_v36  ;;  %v790_v35 = vld [vmem:[%s8496_s12 + $0xf28] sm:$0xff]  ;;  %v7484_v36 = vcombine.low %v777_v23, %v781_v24  ;;  %v7524_v24 = vcombine.low %v817_v8, %v821_v9 }
 0x168   : > { %5781 = vmatprep.subr.bf16.mxu0 %v7437_v37  ;;  %6068 = vmatprep.subr.bf16.mxu1 %v7439_v38  ;;  %v7486_v37 = vcombine.low %v778_v26, %v782_v27  ;;  %v7493_v38 = vcombine.high %v785_v32, %v789_v33  ;;  %v7495_v39 = vcombine.high %v786_v1, %v790_v35  ;;  %v830_v23 = vld [vmem:[%s8496_s12 + $0x1068] sm:$0xff] }
 0x169   : > { %v866_v8 = vld [vmem:[%s8496_s12 + $0x1188] sm:$0xff] }
 0x16a   : > { %v870_v9 = vld [vmem:[%s8496_s12 + $0x11a8] sm:$0xff] }
 0x16b   : > { %5782 = vmatpush1.bf16.msra.mxu0 %v7436_v44  ;;  %6069 = vmatpush1.bf16.msra.mxu1 %v7438_v46  ;;  %v798_v44 = vld [vmem:[%s8496_s12 + $0xf68] sm:$0xff]  ;;  %v7492_v46 = vcombine.low %v785_v32, %v789_v33 }
 0x16c   : > { %5783 = vmatprep.subr.bf16.mxu0 %v7445_v47  ;;  %6070 = vmatprep.subr.bf16.mxu1 %v7447_v48  ;;  %v7494_v47 = vcombine.low %v786_v1, %v790_v35  ;;  %v7501_v48 = vcombine.high %v793_v41, %v797_v42  ;;  %v7503_v49 = vcombine.high %v794_v43, %v798_v44  ;;  %v834_v32 = vld [vmem:[%s8496_s12 + $0x1088] sm:$0xff] }
 0x16d   : > { %v838_v33 = vld [vmem:[%s8496_s12 + $0x10a8] sm:$0xff] }
 0x16f   : > { %5784 = vmatpush1.bf16.msra.mxu0 %v7444_v54  ;;  %6071 = vmatpush1.bf16.msra.mxu1 %v7446_v56  ;;  %v806_v54 = vld [vmem:[%s8496_s12 + $0xfa8] sm:$0xff]  ;;  %v7500_v56 = vcombine.low %v793_v41, %v797_v42 }
 0x170   : > { %5785 = vmatprep.subr.bf16.mxu0 %v7453_v57  ;;  %6072 = vmatprep.subr.bf16.mxu1 %v7455_v58  ;;  %v7502_v57 = vcombine.low %v794_v43, %v798_v44  ;;  %v7509_v58 = vcombine.high %v801_v51, %v805_v52  ;;  %v7511_v59 = vcombine.high %v802_v53, %v806_v54  ;;  %v842_v41 = vld [vmem:[%s8496_s12 + $0x10c8] sm:$0xff] }
 0x171   : > { %v846_v42 = vld [vmem:[%s8496_s12 + $0x10e8] sm:$0xff]  ;;  %v7542_v44 = vcombine.low %v834_v32, %v838_v33 }
 0x173   : > { %5786 = vmatpush1.bf16.msra.mxu0 %v7452_v2  ;;  %6073 = vmatpush1.bf16.msra.mxu1 %v7454_v3  ;;  %v814_v2 = vld [vmem:[%s8496_s12 + $0xfe8] sm:$0xff]  ;;  %v8830_v3 = vld [vmem:[#allocation3 + $0x8] sm:$0x3f] }
 0x174   : > { %5787 = vmatprep.subr.bf16.mxu0 %v7461_v4  ;;  %6074 = vmatprep.subr.bf16.mxu1 %v7463_v5  ;;  %v7508_v4 = vcombine.low %v801_v51, %v805_v52  ;;  %v7510_v5 = vcombine.low %v802_v53, %v806_v54  ;;  %v7519_v31 = vcombine.high %v810_v0, %v814_v2  ;;  %v850_v51 = vld [vmem:[%s8496_s12 + $0x1108] sm:$0xff] }
 0x175   : > { %v7518_v15 = vcombine.low %v810_v0, %v814_v2  ;;  %v854_v52 = vld [vmem:[%s8496_s12 + $0x1128] sm:$0xff]  ;;  %v7550_v54 = vcombine.low %v842_v41, %v846_v42 }
 0x176   : > { %v7558_v2 = vcombine.low %v850_v51, %v854_v52 }
 0x177   : > { %5788 = vmatpush1.bf16.msra.mxu0 %v7460_v10  ;;  %6075 = vmatpush1.bf16.msra.mxu1 %v7462_v12  ;;  %v8836_v10 = vrot.slane %v8830_v3, %v8543_v55  ;;  %v818_v12 = vld [vmem:[%s8496_s12 + $0x1008] sm:$0xff] }
 0x178   : > { %5789 = vmatprep.subr.bf16.mxu0 %v7469_v13  ;;  %6076 = vmatprep.subr.bf16.mxu1 %v7471_v14  ;;  %v822_v13 = vld [vmem:[%s8496_s12 + $0x1028] sm:$0xff]  ;;  %v7516_v14 = vcombine.low %v809_v62, %v813_v63 }
 0x179   : > { %v7527_v17 = vcombine.high %v818_v12, %v822_v13  ;;  %v7526_v26 = vcombine.low %v818_v12, %v822_v13  ;;  %v858_v62 = vld [vmem:[%s8496_s12 + $0x1148] sm:$0xff] }
 0x17a   : > { %v862_v63 = vld [vmem:[%s8496_s12 + $0x1168] sm:$0xff] }
 0x17b   : > { %5790 = vmatpush1.bf16.msra.mxu0 %v7468_v19  ;;  %6077 = vmatpush1.bf16.msra.mxu1 %v7470_v20  ;;  %v829_v19 = vld [vmem:[%s8496_s12 + $0x1060] sm:$0xff]  ;;  %v1279_v20 = vcombine.high %v8836_v10, %v8836_v10  ;;  %v7566_v13 = vcombine.low %v858_v62, %v862_v63 }
 0x17c   : > { %5791 = vmatprep.subr.bf16.mxu0 %v7477_v21  ;;  %6078 = vmatprep.subr.bf16.mxu1 %v7479_v22  ;;  %v8846_v21 = vcombine.high %v8762_v60, %v8762_v60  ;;  %v826_v22 = vld [vmem:[%s8496_s12 + $0x1048] sm:$0xff]  ;;  %v7533_v27 = vcombine.high %v825_v18, %v829_v19  ;;  %v7532_v1 = vcombine.low %v825_v18, %v829_v19 }
 0x17d   : > { %v7534_v35 = vcombine.low %v826_v22, %v830_v23  ;;  %v874_v18 = vld [vmem:[%s8496_s12 + $0x11c8] sm:$0xff] }
 0x17e   : > { %v878_v19 = vld [vmem:[%s8496_s12 + $0x11e8] sm:$0xff] }
 0x17f   : > { %5792 = vmatpush1.bf16.msra.mxu0 %v7476_v28  ;;  %6079 = vmatpush1.bf16.msra.mxu1 %v7478_v29  ;;  %v7535_v28 = vcombine.high %v826_v22, %v830_v23  ;;  %v833_v29 = vld [vmem:[%s8496_s12 + $0x1080] sm:$0xff]  ;;  %v7574_v22 = vcombine.low %v866_v8, %v870_v9 }
 0x180   : > { %5793 = vmatprep.subr.bf16.mxu0 %v7485_v30  ;;  %6080 = vmatprep.subr.bf16.mxu1 %v7487_v61  ;;  %v837_v30 = vld [vmem:[%s8496_s12 + $0x10a0] sm:$0xff]  ;;  %v8853_v61 = vrot.slane %v1279_v20, %v8543_v55 }
 0x181   : > { %v7540_v43 = vcombine.low %v833_v29, %v837_v30 }
 0x183   : > { %5794 = vmatpush1.bf16.msra.mxu0 %v7484_v36  ;;  %6081 = vmatpush1.bf16.msra.mxu1 %v7486_v37  ;;  %v7541_v36 = vcombine.high %v833_v29, %v837_v30  ;;  %v7543_v37 = vcombine.high %v834_v32, %v838_v33  ;;  %v886_v29 = vld [vmem:[%s8496_s12 + $0x1228] sm:$0xff]  ;;  %v7582_v32 = vcombine.low %v874_v18, %v878_v19 }
 0x184   : > { %5795 = vmatprep.subr.bf16.mxu0 %v7493_v38  ;;  %6082 = vmatprep.subr.bf16.mxu1 %v7495_v39  ;;  %v841_v38 = vld [vmem:[%s8496_s12 + $0x10c0] sm:$0xff] }
 0x185   : > { %v845_v39 = vld [vmem:[%s8496_s12 + $0x10e0] sm:$0xff] }
 0x186   : > { %v7548_v53 = vcombine.low %v841_v38, %v845_v39 }
 0x187   : > { %5796 = vmatpush1.bf16.msra.mxu0 %v7492_v46  ;;  %6083 = vmatpush1.bf16.msra.mxu1 %v7494_v47  ;;  %v7549_v46 = vcombine.high %v841_v38, %v845_v39  ;;  %v7551_v47 = vcombine.high %v842_v41, %v846_v42  ;;  %v894_v38 = vld [vmem:[%s8496_s12 + $0x1268] sm:$0xff] }
 0x188   : > { %5797 = vmatprep.subr.bf16.mxu0 %v7501_v48  ;;  %6084 = vmatprep.subr.bf16.mxu1 %v7503_v49  ;;  %v849_v48 = vld [vmem:[%s8496_s12 + $0x1100] sm:$0xff] }
 0x189   : > { %v853_v49 = vld [vmem:[%s8496_s12 + $0x1120] sm:$0xff] }
 0x18a   : > { %v7556_v0 = vcombine.low %v849_v48, %v853_v49 }
 0x18b   : > { %5798 = vmatpush1.bf16.msra.mxu0 %v7500_v56  ;;  %6085 = vmatpush1.bf16.msra.mxu1 %v7502_v57  ;;  %v7557_v56 = vcombine.high %v849_v48, %v853_v49  ;;  %v7559_v57 = vcombine.high %v850_v51, %v854_v52  ;;  %v902_v48 = vld [vmem:[%s8496_s12 + $0x12a8] sm:$0xff] }
 0x18c   : > { %5799 = vmatprep.subr.bf16.mxu0 %v7509_v58  ;;  %6086 = vmatprep.subr.bf16.mxu1 %v7511_v59  ;;  %v857_v58 = vld [vmem:[%s8496_s12 + $0x1140] sm:$0xff] }
 0x18d   : > { %v861_v59 = vld [vmem:[%s8496_s12 + $0x1160] sm:$0xff] }
 0x18e   : > { %v7564_v12 = vcombine.low %v857_v58, %v861_v59 }
 0x18f   : > { %5800 = vmatpush1.bf16.msra.mxu0 %v7508_v4  ;;  %6087 = vmatpush1.bf16.msra.mxu1 %v7510_v5  ;;  %v7565_v4 = vcombine.high %v857_v58, %v861_v59  ;;  %v7567_v5 = vcombine.high %v858_v62, %v862_v63  ;;  %v910_v58 = vld [vmem:[%s8496_s12 + $0x12e8] sm:$0xff] }
 0x190   : > { %5801 = vmatprep.subr.bf16.mxu0 %v7517_v6  ;;  %6088 = vmatprep.subr.bf16.mxu1 %v7519_v31  ;;  %v865_v6 = vld [vmem:[%s8496_s12 + $0x1180] sm:$0xff] }
 0x191   : > { %v869_v31 = vld [vmem:[%s8496_s12 + $0x11a0] sm:$0xff] }
 0x192   : > { %v7572_v20 = vcombine.low %v865_v6, %v869_v31 }
 0x193   : > { %5802 = vmatpush1.bf16.msra.mxu0 %v7516_v14  ;;  %6089 = vmatpush1.bf16.msra.mxu1 %v7518_v15  ;;  %v7573_v14 = vcombine.high %v865_v6, %v869_v31  ;;  %v7575_v15 = vcombine.high %v866_v8, %v870_v9  ;;  %v918_v6 = vld [vmem:[%s8496_s12 + $0x1328] sm:$0xff] }
 0x194   : > { %5812 = vmatprep.subr.bf16.mxu0 %v7525_v16  ;;  %6099 = vmatprep.subr.bf16.mxu1 %v7527_v17  ;;  %v873_v16 = vld [vmem:[%s8496_s12 + $0x11c0] sm:$0xff] }
 0x195   : > { %v877_v17 = vld [vmem:[%s8496_s12 + $0x11e0] sm:$0xff] }
 0x196   : > { %5804 = vmatmul.mubr.bf16.vlgmr.msra.gmra.mrb[0].mxu0 %v8846_v21  ;;  %6091 = vmatmul.mubr.bf16.vlgmr.msra.gmra.mrb[0].mxu1 %v8846_v21  ;;  %v7581_v23 = vcombine.high %v873_v16, %v877_v17  ;;  %v7580_v30 = vcombine.low %v873_v16, %v877_v17  ;;  %v926_v16 = vld [vmem:[%s8496_s12 + $0x1368] sm:$0xff] }
 0x197   : > { %5813 = vmatpush1.bf16.msra.mxu0 %v7524_v24  ;;  %6100 = vmatpush1.bf16.msra.mxu1 %v7526_v26  ;;  %v7583_v24 = vcombine.high %v874_v18, %v878_v19  ;;  %v881_v26 = vld [vmem:[%s8496_s12 + $0x1200] sm:$0xff] }
 0x198   : > { %5814 = vmatprep.subr.bf16.mxu0 %v7533_v27  ;;  %6101 = vmatprep.subr.bf16.mxu1 %v7535_v28  ;;  %v885_v27 = vld [vmem:[%s8496_s12 + $0x1220] sm:$0xff]  ;;  %v882_v28 = vld [vmem:[%s8496_s12 + $0x1208] sm:$0xff] }
 0x199   : > { %5844 = vmatprep.mubr.bf16.mxu0 %v8853_v61  ;;  %6131 = vmatprep.mubr.bf16.mxu1 %v8853_v61  ;;  %v7589_v33 = vcombine.high %v881_v26, %v885_v27  ;;  %v7588_v39 = vcombine.low %v881_v26, %v885_v27  ;;  %v7590_v41 = vcombine.low %v882_v28, %v886_v29  ;;  %v934_v26 = vld [vmem:[%s8496_s12 + $0x13a8] sm:$0xff] }
 0x19b   : > { %5815 = vmatpush1.bf16.msra.mxu0 %v7532_v1  ;;  %6102 = vmatpush1.bf16.msra.mxu1 %v7534_v35  ;;  %v7591_v1 = vcombine.high %v882_v28, %v886_v29  ;;  %v889_v35 = vld [vmem:[%s8496_s12 + $0x1240] sm:$0xff] }
 0x19c   : > { %5816 = vmatprep.subr.bf16.mxu0 %v7541_v36  ;;  %6103 = vmatprep.subr.bf16.mxu1 %v7543_v37  ;;  %v893_v36 = vld [vmem:[%s8496_s12 + $0x1260] sm:$0xff]  ;;  %v890_v37 = vld [vmem:[%s8496_s12 + $0x1248] sm:$0xff] }
 0x19d   : > { %v7597_v42 = vcombine.high %v889_v35, %v893_v36  ;;  %v7596_v49 = vcombine.low %v889_v35, %v893_v36  ;;  %v7598_v51 = vcombine.low %v890_v37, %v894_v38  ;;  %v942_v35 = vld [vmem:[%s8496_s12 + $0x13e8] sm:$0xff] }
 0x19f   : > { %5817 = vmatpush1.bf16.msra.mxu0 %v7540_v43  ;;  %6104 = vmatpush1.bf16.msra.mxu1 %v7542_v44  ;;  %v7599_v43 = vcombine.high %v890_v37, %v894_v38  ;;  %v897_v44 = vld [vmem:[%s8496_s12 + $0x1280] sm:$0xff] }
 0x1a0   : > { %5818 = vmatprep.subr.bf16.mxu0 %v7549_v46  ;;  %6105 = vmatprep.subr.bf16.mxu1 %v7551_v47  ;;  %v901_v46 = vld [vmem:[%s8496_s12 + $0x12a0] sm:$0xff]  ;;  %v898_v47 = vld [vmem:[%s8496_s12 + $0x1288] sm:$0xff] }
 0x1a1   : > { %v7605_v52 = vcombine.high %v897_v44, %v901_v46  ;;  %v7604_v59 = vcombine.low %v897_v44, %v901_v46  ;;  %v7606_v62 = vcombine.low %v898_v47, %v902_v48  ;;  %v950_v44 = vld [vmem:[%s8496_s12 + $0x1428] sm:$0xff] }
 0x1a3   : > { %5819 = vmatpush1.bf16.msra.mxu0 %v7548_v53  ;;  %6106 = vmatpush1.bf16.msra.mxu1 %v7550_v54  ;;  %v7607_v53 = vcombine.high %v898_v47, %v902_v48  ;;  %v905_v54 = vld [vmem:[%s8496_s12 + $0x12c0] sm:$0xff] }
 0x1a4   : > { %5820 = vmatprep.subr.bf16.mxu0 %v7557_v56  ;;  %6107 = vmatprep.subr.bf16.mxu1 %v7559_v57  ;;  %v909_v56 = vld [vmem:[%s8496_s12 + $0x12e0] sm:$0xff]  ;;  %v906_v57 = vld [vmem:[%s8496_s12 + $0x12c8] sm:$0xff] }
 0x1a5   : > { %v7613_v63 = vcombine.high %v905_v54, %v909_v56  ;;  %v7612_v31 = vcombine.low %v905_v54, %v909_v56  ;;  %v7614_v8 = vcombine.low %v906_v57, %v910_v58  ;;  %v954_v54 = vld [vmem:[%s8496_s12 + $0x1448] sm:$0xff] }
 0x1a6   : > { %v958_v56 = vld [vmem:[%s8496_s12 + $0x1468] sm:$0xff] }
 0x1a7   : > { %5821 = vmatpush1.bf16.msra.mxu0 %v7556_v0  ;;  %6108 = vmatpush1.bf16.msra.mxu1 %v7558_v2  ;;  %v7615_v0 = vcombine.high %v906_v57, %v910_v58  ;;  %v913_v2 = vld [vmem:[%s8496_s12 + $0x1300] sm:$0xff] }
 0x1a8   : > { %5822 = vmatprep.subr.bf16.mxu0 %v7565_v4  ;;  %6109 = vmatprep.subr.bf16.mxu1 %v7567_v5  ;;  %v917_v4 = vld [vmem:[%s8496_s12 + $0x1320] sm:$0xff]  ;;  %v914_v5 = vld [vmem:[%s8496_s12 + $0x1308] sm:$0xff] }
 0x1a9   : > { %v7621_v9 = vcombine.high %v913_v2, %v917_v4  ;;  %v7620_v17 = vcombine.low %v913_v2, %v917_v4  ;;  %v7622_v18 = vcombine.low %v914_v5, %v918_v6  ;;  %v8929_v2 = vcombine.high %v8853_v61, %v8853_v61  ;;  %v966_v4 = vld [vmem:[%s8496_s12 + $0x14a8] sm:$0xff] }
 0x1ab   : > { %5823 = vmatpush1.bf16.msra.mxu0 %v7564_v12  ;;  %6110 = vmatpush1.bf16.msra.mxu1 %v7566_v13  ;;  %v7623_v12 = vcombine.high %v914_v5, %v918_v6  ;;  %v921_v13 = vld [vmem:[%s8496_s12 + $0x1340] sm:$0xff]  ;;  %v7662_v6 = vcombine.low %v954_v54, %v958_v56 }
 0x1ac   : > { %5824 = vmatprep.subr.bf16.mxu0 %v7573_v14  ;;  %6111 = vmatprep.subr.bf16.mxu1 %v7575_v15  ;;  %v925_v14 = vld [vmem:[%s8496_s12 + $0x1360] sm:$0xff]  ;;  %v922_v15 = vld [vmem:[%s8496_s12 + $0x1348] sm:$0xff] }
 0x1ad   : > { %v7629_v19 = vcombine.high %v921_v13, %v925_v14  ;;  %v7628_v27 = vcombine.low %v921_v13, %v925_v14  ;;  %v7630_v28 = vcombine.low %v922_v15, %v926_v16  ;;  %v970_v13 = vld [vmem:[%s8496_s12 + $0x14c8] sm:$0xff] }
 0x1ae   : > { %v974_v14 = vld [vmem:[%s8496_s12 + $0x14e8] sm:$0xff] }
 0x1af   : > { %5825 = vmatpush1.bf16.msra.mxu0 %v7572_v20  ;;  %6112 = vmatpush1.bf16.msra.mxu1 %v7574_v22  ;;  %v7631_v20 = vcombine.high %v922_v15, %v926_v16  ;;  %v929_v22 = vld [vmem:[%s8496_s12 + $0x1380] sm:$0xff] }
 0x1b0   : > { %5826 = vmatprep.subr.bf16.mxu0 %v7581_v23  ;;  %6113 = vmatprep.subr.bf16.mxu1 %v7583_v24  ;;  %v933_v23 = vld [vmem:[%s8496_s12 + $0x13a0] sm:$0xff]  ;;  %v930_v24 = vld [vmem:[%s8496_s12 + $0x1388] sm:$0xff] }
 0x1b1   : > { %v7637_v29 = vcombine.high %v929_v22, %v933_v23  ;;  %v7636_v36 = vcombine.low %v929_v22, %v933_v23  ;;  %v7638_v37 = vcombine.low %v930_v24, %v934_v26  ;;  %v978_v22 = vld [vmem:[%s8496_s12 + $0x1508] sm:$0xff] }
 0x1b2   : > { %v982_v23 = vld [vmem:[%s8496_s12 + $0x1528] sm:$0xff] }
 0x1b3   : > { %5827 = vmatpush1.bf16.msra.mxu0 %v7580_v30  ;;  %6114 = vmatpush1.bf16.msra.mxu1 %v7582_v32  ;;  %v7639_v30 = vcombine.high %v930_v24, %v934_v26  ;;  %v937_v32 = vld [vmem:[%s8496_s12 + $0x13c0] sm:$0xff]  ;;  %v7678_v26 = vcombine.low %v970_v13, %v974_v14 }
 0x1b4   : > { %5828 = vmatprep.subr.bf16.mxu0 %v7589_v33  ;;  %6115 = vmatprep.subr.bf16.mxu1 %v7591_v1  ;;  %v941_v33 = vld [vmem:[%s8496_s12 + $0x13e0] sm:$0xff]  ;;  %v938_v1 = vld [vmem:[%s8496_s12 + $0x13c8] sm:$0xff] }
 0x1b5   : > { %v7645_v38 = vcombine.high %v937_v32, %v941_v33  ;;  %v7644_v46 = vcombine.low %v937_v32, %v941_v33  ;;  %v7646_v47 = vcombine.low %v938_v1, %v942_v35  ;;  %v986_v32 = vld [vmem:[%s8496_s12 + $0x1548] sm:$0xff] }
 0x1b6   : > { %v990_v33 = vld [vmem:[%s8496_s12 + $0x1568] sm:$0xff] }
 0x1b7   : > { %5829 = vmatpush1.bf16.msra.mxu0 %v7588_v39  ;;  %6116 = vmatpush1.bf16.msra.mxu1 %v7590_v41  ;;  %v7647_v39 = vcombine.high %v938_v1, %v942_v35  ;;  %v945_v41 = vld [vmem:[%s8496_s12 + $0x1400] sm:$0xff]  ;;  %v7686_v35 = vcombine.low %v978_v22, %v982_v23 }
 0x1b8   : > { %5830 = vmatprep.subr.bf16.mxu0 %v7597_v42  ;;  %6117 = vmatprep.subr.bf16.mxu1 %v7599_v43  ;;  %v949_v42 = vld [vmem:[%s8496_s12 + $0x1420] sm:$0xff]  ;;  %v946_v43 = vld [vmem:[%s8496_s12 + $0x1408] sm:$0xff] }
 0x1b9   : > { %v7653_v48 = vcombine.high %v945_v41, %v949_v42  ;;  %v7652_v57 = vcombine.low %v945_v41, %v949_v42  ;;  %v7654_v58 = vcombine.low %v946_v43, %v950_v44  ;;  %v994_v41 = vld [vmem:[%s8496_s12 + $0x1588] sm:$0xff] }
 0x1ba   : > { %v998_v42 = vld [vmem:[%s8496_s12 + $0x15a8] sm:$0xff] }
 0x1bb   : > { %5831 = vmatpush1.bf16.msra.mxu0 %v7596_v49  ;;  %6118 = vmatpush1.bf16.msra.mxu1 %v7598_v51  ;;  %v7655_v49 = vcombine.high %v946_v43, %v950_v44  ;;  %v953_v51 = vld [vmem:[%s8496_s12 + $0x1440] sm:$0xff]  ;;  %v7694_v44 = vcombine.low %v986_v32, %v990_v33 }
 0x1bc   : > { %5832 = vmatprep.subr.bf16.mxu0 %v7605_v52  ;;  %6119 = vmatprep.subr.bf16.mxu1 %v7607_v53  ;;  %v957_v52 = vld [vmem:[%s8496_s12 + $0x1460] sm:$0xff]  ;;  %v8921_v53 = vrot.slane %v8836_v10, %v8543_v55  ;;  %v962_v10 = vld [vmem:[%s8496_s12 + $0x1488] sm:$0xff] }
 0x1bd   : > { %v7660_v5 = vcombine.low %v953_v51, %v957_v52  ;;  %v7670_v16 = vcombine.low %v962_v10, %v966_v4 }
 0x1bf   : > { %5833 = vmatpush1.bf16.msra.mxu0 %v7604_v59  ;;  %6120 = vmatpush1.bf16.msra.mxu1 %v7606_v62  ;;  %v7661_v59 = vcombine.high %v953_v51, %v957_v52  ;;  %v7663_v62 = vcombine.high %v954_v54, %v958_v56  ;;  %v1002_v51 = vld [vmem:[%s8496_s12 + $0x15c8] sm:$0xff]  ;;  %v7702_v56 = vcombine.low %v994_v41, %v998_v42 }
 0x1c0   : > { %5834 = vmatprep.subr.bf16.mxu0 %v7613_v63  ;;  %6121 = vmatprep.subr.bf16.mxu1 %v7615_v0  ;;  %v961_v63 = vld [vmem:[%s8496_s12 + $0x1480] sm:$0xff]  ;;  %v1006_v52 = vld [vmem:[%s8496_s12 + $0x15e8] sm:$0xff] }
 0x1c1   : > { %v965_v0 = vld [vmem:[%s8496_s12 + $0x14a0] sm:$0xff] }
 0x1c2   : > { %v7668_v15 = vcombine.low %v961_v63, %v965_v0 }
 0x1c3   : > { %5835 = vmatpush1.bf16.msra.mxu0 %v7612_v31  ;;  %6122 = vmatpush1.bf16.msra.mxu1 %v7614_v8  ;;  %v7669_v31 = vcombine.high %v961_v63, %v965_v0  ;;  %v7671_v8 = vcombine.high %v962_v10, %v966_v4  ;;  %v1010_v63 = vld [vmem:[%s8496_s12 + $0x1608] sm:$0xff]  ;;  %v7710_v4 = vcombine.low %v1002_v51, %v1006_v52 }
 0x1c4   : > { %5836 = vmatprep.subr.bf16.mxu0 %v7621_v9  ;;  %6123 = vmatprep.subr.bf16.mxu1 %v7623_v12  ;;  %v969_v9 = vld [vmem:[%s8496_s12 + $0x14c0] sm:$0xff]  ;;  %v1014_v0 = vld [vmem:[%s8496_s12 + $0x1628] sm:$0xff] }
 0x1c5   : > { %v973_v12 = vld [vmem:[%s8496_s12 + $0x14e0] sm:$0xff] }
 0x1c6   : > { %v7676_v24 = vcombine.low %v969_v9, %v973_v12 }
 0x1c7   : > { %5837 = vmatpush1.bf16.msra.mxu0 %v7620_v17  ;;  %6124 = vmatpush1.bf16.msra.mxu1 %v7622_v18  ;;  %v7677_v17 = vcombine.high %v969_v9, %v973_v12  ;;  %v7679_v18 = vcombine.high %v970_v13, %v974_v14  ;;  %v1018_v9 = vld [vmem:[%s8496_s12 + $0x1648] sm:$0xff]  ;;  %v7718_v14 = vcombine.low %v1010_v63, %v1014_v0 }
 0x1c8   : > { %5838 = vmatprep.subr.bf16.mxu0 %v7629_v19  ;;  %6125 = vmatprep.subr.bf16.mxu1 %v7631_v20  ;;  %v977_v19 = vld [vmem:[%s8496_s12 + $0x1500] sm:$0xff]  ;;  %v1022_v12 = vld [vmem:[%s8496_s12 + $0x1668] sm:$0xff] }
 0x1c9   : > { %v981_v20 = vld [vmem:[%s8496_s12 + $0x1520] sm:$0xff] }
 0x1ca   : > { %v7684_v1 = vcombine.low %v977_v19, %v981_v20 }
 0x1cb   : > { %5839 = vmatpush1.bf16.msra.mxu0 %v7628_v27  ;;  %6126 = vmatpush1.bf16.msra.mxu1 %v7630_v28  ;;  %v7685_v27 = vcombine.high %v977_v19, %v981_v20  ;;  %v7687_v28 = vcombine.high %v978_v22, %v982_v23  ;;  %v1026_v19 = vld [vmem:[%s8496_s12 + $0x1688] sm:$0xff]  ;;  %v7726_v23 = vcombine.low %v1018_v9, %v1022_v12 }
 0x1cc   : > { %5840 = vmatprep.subr.bf16.mxu0 %v7637_v29  ;;  %6127 = vmatprep.subr.bf16.mxu1 %v7639_v30  ;;  %v985_v29 = vld [vmem:[%s8496_s12 + $0x1540] sm:$0xff]  ;;  %v1030_v20 = vld [vmem:[%s8496_s12 + $0x16a8] sm:$0xff] }
 0x1cd   : > { %v989_v30 = vld [vmem:[%s8496_s12 + $0x1560] sm:$0xff] }
 0x1ce   : > { %v7692_v43 = vcombine.low %v985_v29, %v989_v30 }
 0x1cf   : > { %5841 = vmatpush1.bf16.msra.mxu0 %v7636_v36  ;;  %6128 = vmatpush1.bf16.msra.mxu1 %v7638_v37  ;;  %v7693_v36 = vcombine.high %v985_v29, %v989_v30  ;;  %v7695_v37 = vcombine.high %v986_v32, %v990_v33  ;;  %v1034_v29 = vld [vmem:[%s8496_s12 + $0x16c8] sm:$0xff]  ;;  %v7734_v33 = vcombine.low %v1026_v19, %v1030_v20 }
 0x1d0   : > { %5842 = vmatprep.subr.bf16.mxu0 %v7645_v38  ;;  %6129 = vmatprep.subr.bf16.mxu1 %v7647_v39  ;;  %v993_v38 = vld [vmem:[%s8496_s12 + $0x1580] sm:$0xff]  ;;  %v1038_v30 = vld [vmem:[%s8496_s12 + $0x16e8] sm:$0xff] }
 0x1d1   : > { %v997_v39 = vld [vmem:[%s8496_s12 + $0x15a0] sm:$0xff] }
 0x1d2   : > { %v7700_v54 = vcombine.low %v993_v38, %v997_v39 }
 0x1d3   : > { %5843 = vmatpush1.bf16.msra.mxu0 %v7644_v46  ;;  %6130 = vmatpush1.bf16.msra.mxu1 %v7646_v47  ;;  %v7701_v46 = vcombine.high %v993_v38, %v997_v39  ;;  %v7703_v47 = vcombine.high %v994_v41, %v998_v42  ;;  %v1042_v38 = vld [vmem:[%s8496_s12 + $0x1708] sm:$0xff]  ;;  %v7742_v42 = vcombine.low %v1034_v29, %v1038_v30 }
 0x1d4   : > { %5853 = vmatprep.subr.bf16.mxu0 %v7653_v48  ;;  %6140 = vmatprep.subr.bf16.mxu1 %v7655_v49  ;;  %v1001_v48 = vld [vmem:[%s8496_s12 + $0x15c0] sm:$0xff]  ;;  %v1046_v39 = vld [vmem:[%s8496_s12 + $0x1728] sm:$0xff] }
 0x1d5   : > { %v1005_v49 = vld [vmem:[%s8496_s12 + $0x15e0] sm:$0xff] }
 0x1d6   : > { %5845 = vmatmul.mubr.bf16.vlgmr.msra.gmra.mrb[0].mxu0 %v8921_v53  ;;  %6132 = vmatmul.mubr.bf16.vlgmr.msra.gmra.mrb[0].mxu1 %v8921_v53  ;;  %v7708_v10 = vcombine.low %v1001_v48, %v1005_v49 }
 0x1d7   : > { %5854 = vmatpush1.bf16.msra.mxu0 %v7652_v57  ;;  %6141 = vmatpush1.bf16.msra.mxu1 %v7654_v58  ;;  %v7709_v57 = vcombine.high %v1001_v48, %v1005_v49  ;;  %v7711_v58 = vcombine.high %v1002_v51, %v1006_v52  ;;  %v1050_v48 = vld [vmem:[%s8496_s12 + $0x1748] sm:$0xff]  ;;  %v7750_v52 = vcombine.low %v1042_v38, %v1046_v39 }
 0x1d8   : > { %5855 = vmatprep.subr.bf16.mxu0 %v7661_v59  ;;  %6142 = vmatprep.subr.bf16.mxu1 %v7663_v62  ;;  %v1009_v59 = vld [vmem:[%s8496_s12 + $0x1600] sm:$0xff]  ;;  %v1054_v49 = vld [vmem:[%s8496_s12 + $0x1768] sm:$0xff] }
 0x1d9   : > { %5885 = vmatprep.mubr.bf16.mxu0 %v8929_v2  ;;  %6172 = vmatprep.mubr.bf16.mxu1 %v8929_v2  ;;  %v1013_v62 = vld [vmem:[%s8496_s12 + $0x1620] sm:$0xff] }
 0x1da   : > { %v7716_v13 = vcombine.low %v1009_v59, %v1013_v62 }
 0x1db   : > { %5856 = vmatpush1.bf16.msra.mxu0 %v7660_v5  ;;  %6143 = vmatpush1.bf16.msra.mxu1 %v7662_v6  ;;  %v7717_v5 = vcombine.high %v1009_v59, %v1013_v62  ;;  %v7719_v6 = vcombine.high %v1010_v63, %v1014_v0  ;;  %v1058_v59 = vld [vmem:[%s8496_s12 + $0x1788] sm:$0xff]  ;;  %v7758_v0 = vcombine.low %v1050_v48, %v1054_v49 }
 0x1dc   : > { %5857 = vmatprep.subr.bf16.mxu0 %v7669_v31  ;;  %6144 = vmatprep.subr.bf16.mxu1 %v7671_v8  ;;  %v1017_v31 = vld [vmem:[%s8496_s12 + $0x1640] sm:$0xff]  ;;  %v1062_v62 = vld [vmem:[%s8496_s12 + $0x17a8] sm:$0xff] }
 0x1dd   : > { %v1021_v8 = vld [vmem:[%s8496_s12 + $0x1660] sm:$0xff] }
 0x1de   : > { %v7724_v22 = vcombine.low %v1017_v31, %v1021_v8 }
 0x1df   : > { %5858 = vmatpush1.bf16.msra.mxu0 %v7668_v15  ;;  %6145 = vmatpush1.bf16.msra.mxu1 %v7670_v16  ;;  %v7725_v15 = vcombine.high %v1017_v31, %v1021_v8  ;;  %v7727_v16 = vcombine.high %v1018_v9, %v1022_v12  ;;  %v1264_v31 = vcombine.high %v8830_v3, %v8830_v3  ;;  %v1066_v8 = vld [vmem:[%s8496_s12 + $0x17c8] sm:$0xff] }
 0x1e0   : > { %5859 = vmatprep.subr.bf16.mxu0 %v7677_v17  ;;  %6146 = vmatprep.subr.bf16.mxu1 %v7679_v18  ;;  %v1025_v17 = vld [vmem:[%s8496_s12 + $0x1680] sm:$0xff]  ;;  %v1070_v9 = vld [vmem:[%s8496_s12 + $0x17e8] sm:$0xff] }
 0x1e1   : > { %v1029_v18 = vld [vmem:[%s8496_s12 + $0x16a0] sm:$0xff]  ;;  %v1074_v3 = vld [vmem:[%s8496_s12 + $0x1808] sm:$0xff] }
 0x1e2   : > { %v7732_v32 = vcombine.low %v1025_v17, %v1029_v18 }
 0x1e3   : > { %5860 = vmatpush1.bf16.msra.mxu0 %v7676_v24  ;;  %6147 = vmatpush1.bf16.msra.mxu1 %v7678_v26  ;;  %v7733_v24 = vcombine.high %v1025_v17, %v1029_v18  ;;  %v7735_v26 = vcombine.high %v1026_v19, %v1030_v20  ;;  %v1077_v17 = vld [vmem:[%s8496_s12 + $0x1820] sm:$0xff]  ;;  %v8994_v18 = vrot.slane %v1264_v31, %v8543_v55  ;;  %v1078_v19 = vld [vmem:[%s8496_s12 + $0x1828] sm:$0xff] }
 0x1e4   : > { %5861 = vmatprep.subr.bf16.mxu0 %v7685_v27  ;;  %6148 = vmatprep.subr.bf16.mxu1 %v7687_v28  ;;  %v1033_v27 = vld [vmem:[%s8496_s12 + $0x16c0] sm:$0xff] }
 0x1e5   : > { %v1037_v28 = vld [vmem:[%s8496_s12 + $0x16e0] sm:$0xff] }
 0x1e6   : > { %v7740_v41 = vcombine.low %v1033_v27, %v1037_v28  ;;  %v1113_v31 = vld [vmem:[%s8496_s12 + $0x1940] sm:$0xff] }
 0x1e7   : > { %5862 = vmatpush1.bf16.msra.mxu0 %v7684_v1  ;;  %6149 = vmatpush1.bf16.msra.mxu1 %v7686_v35  ;;  %v7741_v1 = vcombine.high %v1033_v27, %v1037_v28  ;;  %v7743_v35 = vcombine.high %v1034_v29, %v1038_v30  ;;  %v1085_v27 = vld [vmem:[%s8496_s12 + $0x1860] sm:$0xff]  ;;  %v1280_v28 = vcombine.high %v8994_v18, %v8994_v18  ;;  %v1082_v30 = vld [vmem:[%s8496_s12 + $0x1848] sm:$0xff] }
 0x1e8   : > { %5863 = vmatprep.subr.bf16.mxu0 %v7693_v36  ;;  %6150 = vmatprep.subr.bf16.mxu1 %v7695_v37  ;;  %v1041_v36 = vld [vmem:[%s8496_s12 + $0x1700] sm:$0xff]  ;;  %v9004_v29 = vcombine.high %v8921_v53, %v8921_v53 }
 0x1e9   : > { %v1045_v37 = vld [vmem:[%s8496_s12 + $0x1720] sm:$0xff] }
 0x1ea   : > { %v7748_v51 = vcombine.low %v1041_v36, %v1045_v37 }
 0x1eb   : > { %5864 = vmatpush1.bf16.msra.mxu0 %v7692_v43  ;;  %6151 = vmatpush1.bf16.msra.mxu1 %v7694_v44  ;;  %v7749_v43 = vcombine.high %v1041_v36, %v1045_v37  ;;  %v7751_v44 = vcombine.high %v1042_v38, %v1046_v39  ;;  %v1089_v37 = vld [vmem:[%s8496_s12 + $0x1880] sm:$0xff]  ;;  %v9011_v39 = vrot.slane %v1280_v28, %v8543_v55 }
 0x1ec   : > { %5865 = vmatprep.subr.bf16.mxu0 %v7701_v46  ;;  %6152 = vmatprep.subr.bf16.mxu1 %v7703_v47  ;;  %v1049_v46 = vld [vmem:[%s8496_s12 + $0x1740] sm:$0xff] }
 0x1ed   : > { %v1053_v47 = vld [vmem:[%s8496_s12 + $0x1760] sm:$0xff] }
 0x1ee   : > { %v7756_v63 = vcombine.low %v1049_v46, %v1053_v47  ;;  %v1093_v38 = vld [vmem:[%s8496_s12 + $0x18a0] sm:$0xff] }
 0x1ef   : > { %5866 = vmatpush1.bf16.msra.mxu0 %v7700_v54  ;;  %6153 = vmatpush1.bf16.msra.mxu1 %v7702_v56  ;;  %v7757_v54 = vcombine.high %v1049_v46, %v1053_v47  ;;  %v7759_v56 = vcombine.high %v1050_v48, %v1054_v49  ;;  %v7797_v46 = vcombine.high %v1089_v37, %v1093_v38  ;;  %v1097_v48 = vld [vmem:[%s8496_s12 + $0x18c0] sm:$0xff] }
 0x1f0   : > { %5867 = vmatprep.subr.bf16.mxu0 %v7709_v57  ;;  %6154 = vmatprep.subr.bf16.mxu1 %v7711_v58  ;;  %v1057_v57 = vld [vmem:[%s8496_s12 + $0x1780] sm:$0xff] }
 0x1f1   : > { %v1061_v58 = vld [vmem:[%s8496_s12 + $0x17a0] sm:$0xff] }
 0x1f2   : > { %v7764_v12 = vcombine.low %v1057_v57, %v1061_v58  ;;  %v1101_v49 = vld [vmem:[%s8496_s12 + $0x18e0] sm:$0xff] }
 0x1f3   : > { %5868 = vmatpush1.bf16.msra.mxu0 %v7708_v10  ;;  %6155 = vmatpush1.bf16.msra.mxu1 %v7710_v4  ;;  %v7765_v10 = vcombine.high %v1057_v57, %v1061_v58  ;;  %v7767_v4 = vcombine.high %v1058_v59, %v1062_v62  ;;  %v7805_v57 = vcombine.high %v1097_v48, %v1101_v49  ;;  %v1133_v28 = vld [vmem:[%s8496_s12 + $0x19e0] sm:$0xff] }
 0x1f4   : > { %5869 = vmatprep.subr.bf16.mxu0 %v7717_v5  ;;  %6156 = vmatprep.subr.bf16.mxu1 %v7719_v6  ;;  %v1065_v5 = vld [vmem:[%s8496_s12 + $0x17c0] sm:$0xff] }
 0x1f5   : > { %v1069_v6 = vld [vmem:[%s8496_s12 + $0x17e0] sm:$0xff] }
 0x1f6   : > { %v7772_v20 = vcombine.low %v1065_v5, %v1069_v6 }
 0x1f7   : > { %5870 = vmatpush1.bf16.msra.mxu0 %v7716_v13  ;;  %6157 = vmatpush1.bf16.msra.mxu1 %v7718_v14  ;;  %v7766_v13 = vcombine.low %v1058_v59, %v1062_v62  ;;  %v7773_v14 = vcombine.high %v1065_v5, %v1069_v6  ;;  %v1105_v59 = vld [vmem:[%s8496_s12 + $0x1900] sm:$0xff] }
 0x1f8   : > { %5871 = vmatprep.subr.bf16.mxu0 %v7725_v15  ;;  %6158 = vmatprep.subr.bf16.mxu1 %v7727_v16  ;;  %v7775_v15 = vcombine.high %v1066_v8, %v1070_v9  ;;  %v1073_v16 = vld [vmem:[%s8496_s12 + $0x1800] sm:$0xff] }
 0x1f9   : > { %v1109_v62 = vld [vmem:[%s8496_s12 + $0x1920] sm:$0xff] }
 0x1fa   : > { %v7813_v5 = vcombine.high %v1105_v59, %v1109_v62 }
 0x1fb   : > { %5872 = vmatpush1.bf16.msra.mxu0 %v7724_v22  ;;  %6159 = vmatpush1.bf16.msra.mxu1 %v7726_v23  ;;  %v7774_v22 = vcombine.low %v1066_v8, %v1070_v9  ;;  %v7781_v23 = vcombine.high %v1073_v16, %v1077_v17  ;;  %v1117_v8 = vld [vmem:[%s8496_s12 + $0x1960] sm:$0xff]  ;;  %v1114_v9 = vld [vmem:[%s8496_s12 + $0x1948] sm:$0xff] }
 0x1fc   : > { %5873 = vmatprep.subr.bf16.mxu0 %v7733_v24  ;;  %6160 = vmatprep.subr.bf16.mxu1 %v7735_v26  ;;  %v7783_v24 = vcombine.high %v1074_v3, %v1078_v19  ;;  %v1081_v26 = vld [vmem:[%s8496_s12 + $0x1840] sm:$0xff] }
 0x1ff   : > { %5874 = vmatpush1.bf16.msra.mxu0 %v7732_v32  ;;  %6161 = vmatpush1.bf16.msra.mxu1 %v7734_v33  ;;  %v1086_v32 = vld [vmem:[%s8496_s12 + $0x1868] sm:$0xff]  ;;  %v7780_v33 = vcombine.low %v1073_v16, %v1077_v17  ;;  %v1121_v17 = vld [vmem:[%s8496_s12 + $0x1980] sm:$0xff] }
 0x200   : > { %5875 = vmatprep.subr.bf16.mxu0 %v7741_v1  ;;  %6162 = vmatprep.subr.bf16.mxu1 %v7743_v35  ;;  %v7782_v1 = vcombine.low %v1074_v3, %v1078_v19  ;;  %v7789_v35 = vcombine.high %v1081_v26, %v1085_v27  ;;  %v7791_v36 = vcombine.high %v1082_v30, %v1086_v32  ;;  %v1125_v3 = vld [vmem:[%s8496_s12 + $0x19a0] sm:$0xff]  ;;  %v1122_v19 = vld [vmem:[%s8496_s12 + $0x1988] sm:$0xff] }
 0x203   : > { %5876 = vmatpush1.bf16.msra.mxu0 %v7740_v41  ;;  %6163 = vmatpush1.bf16.msra.mxu1 %v7742_v42  ;;  %v1090_v41 = vld [vmem:[%s8496_s12 + $0x1888] sm:$0xff] }
 0x204   : > { %5877 = vmatprep.subr.bf16.mxu0 %v7749_v43  ;;  %6164 = vmatprep.subr.bf16.mxu1 %v7751_v44  ;;  %v1094_v42 = vld [vmem:[%s8496_s12 + $0x18a8] sm:$0xff]  ;;  %v7788_v43 = vcombine.low %v1081_v26, %v1085_v27  ;;  %v7790_v44 = vcombine.low %v1082_v30, %v1086_v32  ;;  %v1129_v27 = vld [vmem:[%s8496_s12 + $0x19c0] sm:$0xff] }
 0x205   : > { %v7799_v47 = vcombine.high %v1090_v41, %v1094_v42  ;;  %v1130_v30 = vld [vmem:[%s8496_s12 + $0x19c8] sm:$0xff] }
 0x206   : > { %v1134_v32 = vld [vmem:[%s8496_s12 + $0x19e8] sm:$0xff] }
 0x207   : > { %5878 = vmatpush1.bf16.msra.mxu0 %v7748_v51  ;;  %6165 = vmatpush1.bf16.msra.mxu1 %v7750_v52  ;;  %v1098_v51 = vld [vmem:[%s8496_s12 + $0x18c8] sm:$0xff] }
 0x208   : > { %5879 = vmatprep.subr.bf16.mxu0 %v7757_v54  ;;  %6166 = vmatprep.subr.bf16.mxu1 %v7759_v56  ;;  %v1102_v52 = vld [vmem:[%s8496_s12 + $0x18e8] sm:$0xff]  ;;  %v7796_v54 = vcombine.low %v1089_v37, %v1093_v38  ;;  %v7798_v56 = vcombine.low %v1090_v41, %v1094_v42  ;;  %v1137_v37 = vld [vmem:[%s8496_s12 + $0x1a00] sm:$0xff] }
 0x209   : > { %v7807_v58 = vcombine.high %v1098_v51, %v1102_v52  ;;  %v1141_v38 = vld [vmem:[%s8496_s12 + $0x1a20] sm:$0xff]  ;;  %v1138_v41 = vld [vmem:[%s8496_s12 + $0x1a08] sm:$0xff] }
 0x20a   : > { %v1142_v42 = vld [vmem:[%s8496_s12 + $0x1a28] sm:$0xff] }
 0x20b   : > { %5880 = vmatpush1.bf16.msra.mxu0 %v7756_v63  ;;  %6167 = vmatpush1.bf16.msra.mxu1 %v7758_v0  ;;  %v1106_v63 = vld [vmem:[%s8496_s12 + $0x1908] sm:$0xff] }
 0x20c   : > { %5881 = vmatprep.subr.bf16.mxu0 %v7765_v10  ;;  %6168 = vmatprep.subr.bf16.mxu1 %v7767_v4  ;;  %v1110_v0 = vld [vmem:[%s8496_s12 + $0x1928] sm:$0xff]  ;;  %v7804_v10 = vcombine.low %v1097_v48, %v1101_v49  ;;  %v7806_v4 = vcombine.low %v1098_v51, %v1102_v52  ;;  %v1145_v48 = vld [vmem:[%s8496_s12 + $0x1a40] sm:$0xff] }
 0x20d   : > { %v7815_v6 = vcombine.high %v1106_v63, %v1110_v0  ;;  %v1149_v49 = vld [vmem:[%s8496_s12 + $0x1a60] sm:$0xff]  ;;  %v1146_v51 = vld [vmem:[%s8496_s12 + $0x1a48] sm:$0xff] }
 0x20e   : > { %v1150_v52 = vld [vmem:[%s8496_s12 + $0x1a68] sm:$0xff] }
 0x20f   : > { %5882 = vmatpush1.bf16.msra.mxu0 %v7764_v12  ;;  %6169 = vmatpush1.bf16.msra.mxu1 %v7766_v13  ;;  %v1118_v12 = vld [vmem:[%s8496_s12 + $0x1968] sm:$0xff]  ;;  %v7812_v13 = vcombine.low %v1105_v59, %v1109_v62  ;;  %v1153_v59 = vld [vmem:[%s8496_s12 + $0x1a80] sm:$0xff] }
 0x210   : > { %5883 = vmatprep.subr.bf16.mxu0 %v7773_v14  ;;  %6170 = vmatprep.subr.bf16.mxu1 %v7775_v15  ;;  %v7814_v14 = vcombine.low %v1106_v63, %v1110_v0  ;;  %v7821_v15 = vcombine.high %v1113_v31, %v1117_v8  ;;  %v7823_v16 = vcombine.high %v1114_v9, %v1118_v12  ;;  %v1157_v62 = vld [vmem:[%s8496_s12 + $0x1aa0] sm:$0xff]  ;;  %v1154_v63 = vld [vmem:[%s8496_s12 + $0x1a88] sm:$0xff] }
 0x211   : > { %v1158_v0 = vld [vmem:[%s8496_s12 + $0x1aa8] sm:$0xff] }
 0x213   : > { %5884 = vmatpush1.bf16.msra.mxu0 %v7772_v20  ;;  %6171 = vmatpush1.bf16.msra.mxu1 %v7774_v22  ;;  %v1126_v20 = vld [vmem:[%s8496_s12 + $0x19a8] sm:$0xff]  ;;  %v7820_v22 = vcombine.low %v1113_v31, %v1117_v8  ;;  %v1161_v31 = vld [vmem:[%s8496_s12 + $0x1ac0] sm:$0xff] }
 0x214   : > { %5894 = vmatprep.subr.bf16.mxu0 %v7781_v23  ;;  %6181 = vmatprep.subr.bf16.mxu1 %v7783_v24  ;;  %v7822_v23 = vcombine.low %v1114_v9, %v1118_v12  ;;  %v7829_v24 = vcombine.high %v1121_v17, %v1125_v3  ;;  %v7831_v26 = vcombine.high %v1122_v19, %v1126_v20  ;;  %v1165_v8 = vld [vmem:[%s8496_s12 + $0x1ae0] sm:$0xff]  ;;  %v1162_v9 = vld [vmem:[%s8496_s12 + $0x1ac8] sm:$0xff] }
 0x215   : > { %v1166_v12 = vld [vmem:[%s8496_s12 + $0x1ae8] sm:$0xff] }
 0x216   : > { %5886 = vmatmul.mubr.bf16.vlgmr.msra.gmra.mrb[0].mxu0 %v9004_v29  ;;  %6173 = vmatmul.mubr.bf16.vlgmr.msra.gmra.mrb[0].mxu1 %v9004_v29 }
 0x217   : > { %5895 = vmatpush1.bf16.msra.mxu0 %v7780_v33  ;;  %6182 = vmatpush1.bf16.msra.mxu1 %v7782_v1  ;;  %v7828_v33 = vcombine.low %v1121_v17, %v1125_v3  ;;  %v7830_v1 = vcombine.low %v1122_v19, %v1126_v20  ;;  %v307_v17 = vld [vmem:[%s8496_s12 + $0x10] sm:$0xff]  ;;  %v308_v19 = vld [vmem:[%s8496_s12 + $0x18] sm:$0xff] }
 0x218   : > { %5896 = vmatprep.subr.bf16.mxu0 %v7789_v35  ;;  %6183 = vmatprep.subr.bf16.mxu1 %v7791_v36  ;;  %v7837_v35 = vcombine.high %v1129_v27, %v1133_v28  ;;  %v7839_v36 = vcombine.high %v1130_v30, %v1134_v32  ;;  %v311_v3 = vld [vmem:[%s8496_s12 + $0x30] sm:$0xff]  ;;  %v312_v20 = vld [vmem:[%s8496_s12 + $0x38] sm:$0xff] }
 0x219   : > { %7876 = vmatprep.mubr.msk.bf16.mxu0 %vm5644_vm1, %v9011_v39  ;;  %7877 = vmatprep.mubr.msk.bf16.mxu1 %vm5644_vm1, %v9011_v39 }
 0x21b   : > { %5897 = vmatpush1.bf16.msra.mxu0 %v7788_v43  ;;  %6184 = vmatpush1.bf16.msra.mxu1 %v7790_v44  ;;  %v7836_v43 = vcombine.low %v1129_v27, %v1133_v28  ;;  %v7838_v44 = vcombine.low %v1130_v30, %v1134_v32  ;;  %v315_v27 = vld [vmem:[%s8496_s12 + $0x50] sm:$0xff]  ;;  %v9065_v30 = vrot.slane %v8994_v18, %v8543_v55  ;;  %v316_v32 = vld [vmem:[%s8496_s12 + $0x58] sm:$0xff] }
 0x21c   : > { %5898 = vmatprep.subr.bf16.mxu0 %v7797_v46  ;;  %6185 = vmatprep.subr.bf16.mxu1 %v7799_v47  ;;  %v7845_v46 = vcombine.high %v1137_v37, %v1141_v38  ;;  %v7847_v47 = vcombine.high %v1138_v41, %v1142_v42  ;;  %v319_v28 = vld [vmem:[%s8496_s12 + $0x70] sm:$0xff]  ;;  %v324_v55 = vld [vmem:[%s8496_s12 + $0x98] sm:$0xff] }
 0x21d   : > { %v328_v18 = vld [vmem:[%s8496_s12 + $0xb8] sm:$0xff] }
 0x21f   : > { %5899 = vmatpush1.bf16.msra.mxu0 %v7796_v54  ;;  %6186 = vmatpush1.bf16.msra.mxu1 %v7798_v56  ;;  %v7844_v54 = vcombine.low %v1137_v37, %v1141_v38  ;;  %v7846_v56 = vcombine.low %v1138_v41, %v1142_v42  ;;  %v323_v38 = vld [vmem:[%s8496_s12 + $0x90] sm:$0xff]  ;;  %v7024_v42 = vcombine.low %v315_v27, %v319_v28 }
 0x220   : > { %5900 = vmatprep.subr.bf16.mxu0 %v7805_v57  ;;  %6187 = vmatprep.subr.bf16.mxu1 %v7807_v58  ;;  %v7853_v57 = vcombine.high %v1145_v48, %v1149_v49  ;;  %v7855_v58 = vcombine.high %v1146_v51, %v1150_v52  ;;  %v327_v41 = vld [vmem:[%s8496_s12 + $0xb0] sm:$0xff] }
 0x223   : > { %5901 = vmatpush1.bf16.msra.mxu0 %v7804_v10  ;;  %6188 = vmatpush1.bf16.msra.mxu1 %v7806_v4  ;;  %v7852_v10 = vcombine.low %v1145_v48, %v1149_v49  ;;  %v7854_v4 = vcombine.low %v1146_v51, %v1150_v52  ;;  %v335_v48 = vld [vmem:[%s8496_s12 + $0xf0] sm:$0xff]  ;;  %v332_v49 = vld [vmem:[%s8496_s12 + $0xd8] sm:$0xff]  ;;  %v7032_v52 = vcombine.low %v323_v38, %v327_v41 }
 0x224   : > { %5902 = vmatprep.subr.bf16.mxu0 %v7813_v5  ;;  %6189 = vmatprep.subr.bf16.mxu1 %v7815_v6  ;;  %v7861_v5 = vcombine.high %v1153_v59, %v1157_v62  ;;  %v7863_v6 = vcombine.high %v1154_v63, %v1158_v0  ;;  %v336_v51 = vld [vmem:[%s8496_s12 + $0xf8] sm:$0xff] }
 0x227   : > { %5903 = vmatpush1.bf16.msra.mxu0 %v7812_v13  ;;  %6190 = vmatpush1.bf16.msra.mxu1 %v7814_v14  ;;  %v7860_v13 = vcombine.low %v1153_v59, %v1157_v62  ;;  %v7862_v14 = vcombine.low %v1154_v63, %v1158_v0  ;;  %v343_v59 = vld [vmem:[%s8496_s12 + $0x130] sm:$0xff]  ;;  %v340_v62 = vld [vmem:[%s8496_s12 + $0x118] sm:$0xff] }
 0x228   : > { %5904 = vmatprep.subr.bf16.mxu0 %v7821_v15  ;;  %6191 = vmatprep.subr.bf16.mxu1 %v7823_v16  ;;  %v7869_v15 = vcombine.high %v1161_v31, %v1165_v8  ;;  %v7871_v16 = vcombine.high %v1162_v9, %v1166_v12  ;;  %v344_v63 = vld [vmem:[%s8496_s12 + $0x138] sm:$0xff] }
 0x22b   : > { %5905 = vmatpush1.bf16.msra.mxu0 %v7820_v22  ;;  %6192 = vmatpush1.bf16.msra.mxu1 %v7822_v23  ;;  %v7868_v22 = vcombine.low %v1161_v31, %v1165_v8  ;;  %v7870_v23 = vcombine.low %v1162_v9, %v1166_v12  ;;  %v348_v31 = vld [vmem:[%s8496_s12 + $0x158] sm:$0xff]  ;;  %v7050_v12 = vcombine.low %v340_v62, %v344_v63 }
 0x22c   : > { %5906 = vmatprep.subr.bf16.mxu0 %v7829_v24  ;;  %6193 = vmatprep.subr.bf16.mxu1 %v7831_v26  ;;  %v7017_v24 = vcombine.high %v307_v17, %v311_v3  ;;  %v7019_v26 = vcombine.high %v308_v19, %v312_v20  ;;  %v352_v8 = vld [vmem:[%s8496_s12 + $0x178] sm:$0xff] }
 0x22f   : > { %5907 = vmatpush1.bf16.msra.mxu0 %v7828_v33  ;;  %6194 = vmatpush1.bf16.msra.mxu1 %v7830_v1  ;;  %v320_v33 = vld [vmem:[%s8496_s12 + $0x78] sm:$0xff]  ;;  %v7016_v1 = vcombine.low %v307_v17, %v311_v3 }
 0x230   : > { %5908 = vmatprep.subr.bf16.mxu0 %v7837_v35  ;;  %6195 = vmatprep.subr.bf16.mxu1 %v7839_v36  ;;  %v7018_v35 = vcombine.low %v308_v19, %v312_v20  ;;  %v7025_v36 = vcombine.high %v315_v27, %v319_v28  ;;  %v7027_v37 = vcombine.high %v316_v32, %v320_v33  ;;  %v356_v17 = vld [vmem:[%s8496_s12 + $0x198] sm:$0xff] }
 0x231   : > { %v360_v3 = vld [vmem:[%s8496_s12 + $0x1b8] sm:$0xff]  ;;  %v7058_v20 = vcombine.low %v348_v31, %v352_v8 }
 0x232   : > { %v364_v27 = vld [vmem:[%s8496_s12 + $0x1d8] sm:$0xff] }
 0x233   : > { %5909 = vmatpush1.bf16.msra.mxu0 %v7836_v43  ;;  %6196 = vmatpush1.bf16.msra.mxu1 %v7838_v44  ;;  %v7026_v43 = vcombine.low %v316_v32, %v320_v33  ;;  %v7033_v44 = vcombine.high %v323_v38, %v327_v41  ;;  %v368_v28 = vld [vmem:[%s8496_s12 + $0x1f8] sm:$0xff]  ;;  %v7066_v33 = vcombine.low %v356_v17, %v360_v3 }
 0x234   : > { %5910 = vmatprep.subr.bf16.mxu0 %v7845_v46  ;;  %6197 = vmatprep.subr.bf16.mxu1 %v7847_v47  ;;  %v7035_v46 = vcombine.high %v324_v55, %v328_v18  ;;  %v331_v47 = vld [vmem:[%s8496_s12 + $0xd0] sm:$0xff]  ;;  %v372_v38 = vld [vmem:[%s8496_s12 + $0x218] sm:$0xff] }
 0x235   : > { %v7040_v0 = vcombine.low %v331_v47, %v335_v48  ;;  %v376_v41 = vld [vmem:[%s8496_s12 + $0x238] sm:$0xff] }
 0x237   : > { %5911 = vmatpush1.bf16.msra.mxu0 %v7844_v54  ;;  %6198 = vmatpush1.bf16.msra.mxu1 %v7846_v56  ;;  %v7034_v54 = vcombine.low %v324_v55, %v328_v18  ;;  %v7041_v56 = vcombine.high %v331_v47, %v335_v48  ;;  %v7074_v18 = vcombine.low %v364_v27, %v368_v28  ;;  %v380_v47 = vld [vmem:[%s8496_s12 + $0x258] sm:$0xff] }
 0x238   : > { %5912 = vmatprep.subr.bf16.mxu0 %v7853_v57  ;;  %6199 = vmatprep.subr.bf16.mxu1 %v7855_v58  ;;  %v7043_v57 = vcombine.high %v332_v49, %v336_v51  ;;  %v339_v58 = vld [vmem:[%s8496_s12 + $0x110] sm:$0xff]  ;;  %v384_v48 = vld [vmem:[%s8496_s12 + $0x278] sm:$0xff] }
 0x239   : > { %v7048_v9 = vcombine.low %v339_v58, %v343_v59 }
 0x23b   : > { %5913 = vmatpush1.bf16.msra.mxu0 %v7852_v10  ;;  %6200 = vmatpush1.bf16.msra.mxu1 %v7854_v4  ;;  %v7049_v10 = vcombine.high %v339_v58, %v343_v59  ;;  %v7051_v4 = vcombine.high %v340_v62, %v344_v63  ;;  %v388_v58 = vld [vmem:[%s8496_s12 + $0x298] sm:$0xff]  ;;  %v7090_v63 = vcombine.low %v380_v47, %v384_v48 }
 0x23c   : > { %5914 = vmatprep.subr.bf16.mxu0 %v7861_v5  ;;  %6201 = vmatprep.subr.bf16.mxu1 %v7863_v6  ;;  %v347_v5 = vld [vmem:[%s8496_s12 + $0x150] sm:$0xff]  ;;  %v392_v59 = vld [vmem:[%s8496_s12 + $0x2b8] sm:$0xff] }
 0x23d   : > { %v351_v6 = vld [vmem:[%s8496_s12 + $0x170] sm:$0xff] }
 0x23e   : > { %v7056_v19 = vcombine.low %v347_v5, %v351_v6 }
 0x23f   : > { %5915 = vmatpush1.bf16.msra.mxu0 %v7860_v13  ;;  %6202 = vmatpush1.bf16.msra.mxu1 %v7862_v14  ;;  %v7057_v13 = vcombine.high %v347_v5, %v351_v6  ;;  %v7059_v14 = vcombine.high %v348_v31, %v352_v8  ;;  %v396_v5 = vld [vmem:[%s8496_s12 + $0x2d8] sm:$0xff]  ;;  %v7098_v8 = vcombine.low %v388_v58, %v392_v59 }
 0x240   : > { %5916 = vmatprep.subr.bf16.mxu0 %v7869_v15  ;;  %6203 = vmatprep.subr.bf16.mxu1 %v7871_v16  ;;  %v355_v15 = vld [vmem:[%s8496_s12 + $0x190] sm:$0xff]  ;;  %v400_v6 = vld [vmem:[%s8496_s12 + $0x2f8] sm:$0xff] }
 0x241   : > { %v359_v16 = vld [vmem:[%s8496_s12 + $0x1b0] sm:$0xff] }
 0x242   : > { %v7064_v32 = vcombine.low %v355_v15, %v359_v16 }
 0x243   : > { %5917 = vmatpush1.bf16.msra.mxu0 %v7868_v22  ;;  %6204 = vmatpush1.bf16.msra.mxu1 %v7870_v23  ;;  %v7065_v22 = vcombine.high %v355_v15, %v359_v16  ;;  %v7067_v23 = vcombine.high %v356_v17, %v360_v3  ;;  %v404_v15 = vld [vmem:[%s8496_s12 + $0x318] sm:$0xff]  ;;  %v7106_v3 = vcombine.low %v396_v5, %v400_v6 }
 0x244   : > { %6222 = vmatprep.subr.bf16.mxu0 %v7017_v24  ;;  %6509 = vmatprep.subr.bf16.mxu1 %v7019_v26  ;;  %v363_v24 = vld [vmem:[%s8496_s12 + $0x1d0] sm:$0xff]  ;;  %v408_v16 = vld [vmem:[%s8496_s12 + $0x338] sm:$0xff] }
 0x245   : > { %v367_v26 = vld [vmem:[%s8496_s12 + $0x1f0] sm:$0xff] }
 0x246   : > { %5927 = vmatmul.mubr.bf16.vlgmr.msra.gmra.mrb[0].mxu0 %v9065_v30  ;;  %6214 = vmatmul.mubr.bf16.vlgmr.msra.gmra.mrb[0].mxu1 %v9065_v30  ;;  %v7072_v55 = vcombine.low %v363_v24, %v367_v26 }
 0x247   : > { %6223 = vmatpush1.bf16.msra.mxu0 %v7016_v1  ;;  %6510 = vmatpush1.bf16.msra.mxu1 %v7018_v35  ;;  %v7073_v1 = vcombine.high %v363_v24, %v367_v26  ;;  %v7075_v35 = vcombine.high %v364_v27, %v368_v28  ;;  %v412_v24 = vld [vmem:[%s8496_s12 + $0x358] sm:$0xff]  ;;  %v7114_v28 = vcombine.low %v404_v15, %v408_v16 }
 0x248   : > { %6224 = vmatprep.subr.bf16.mxu0 %v7025_v36  ;;  %6511 = vmatprep.subr.bf16.mxu1 %v7027_v37  ;;  %v371_v36 = vld [vmem:[%s8496_s12 + $0x210] sm:$0xff]  ;;  %v416_v26 = vld [vmem:[%s8496_s12 + $0x378] sm:$0xff] }
 0x249   : > { %6254 = vmatprep.mubr.bf16.mxu0 %v8562_v11  ;;  %6541 = vmatprep.mubr.bf16.mxu1 %v8562_v11  ;;  %v7042_v11 = vcombine.low %v332_v49, %v336_v51  ;;  %v375_v37 = vld [vmem:[%s8496_s12 + $0x230] sm:$0xff]  ;;  %v7082_v51 = vcombine.low %v372_v38, %v376_v41 }
 0x24a   : > { %v7080_v49 = vcombine.low %v371_v36, %v375_v37 }
 0x24b   : > { %6225 = vmatpush1.bf16.msra.mxu0 %v7024_v42  ;;  %6512 = vmatpush1.bf16.msra.mxu1 %v7026_v43  ;;  %v7081_v42 = vcombine.high %v371_v36, %v375_v37  ;;  %v7083_v43 = vcombine.high %v372_v38, %v376_v41  ;;  %v420_v36 = vld [vmem:[%s8496_s12 + $0x398] sm:$0xff]  ;;  %v7122_v41 = vcombine.low %v412_v24, %v416_v26 }
 0x24c   : > { %6226 = vmatprep.subr.bf16.mxu0 %v7033_v44  ;;  %6513 = vmatprep.subr.bf16.mxu1 %v7035_v46  ;;  %v379_v44 = vld [vmem:[%s8496_s12 + $0x250] sm:$0xff]  ;;  %v424_v37 = vld [vmem:[%s8496_s12 + $0x3b8] sm:$0xff] }
 0x24d   : > { %v383_v46 = vld [vmem:[%s8496_s12 + $0x270] sm:$0xff] }
 0x24e   : > { %v7088_v62 = vcombine.low %v379_v44, %v383_v46 }
 0x24f   : > { %6227 = vmatpush1.bf16.msra.mxu0 %v7032_v52  ;;  %6514 = vmatpush1.bf16.msra.mxu1 %v7034_v54  ;;  %v7089_v52 = vcombine.high %v379_v44, %v383_v46  ;;  %v7091_v54 = vcombine.high %v380_v47, %v384_v48  ;;  %v428_v44 = vld [vmem:[%s8496_s12 + $0x3d8] sm:$0xff]  ;;  %v7130_v48 = vcombine.low %v420_v36, %v424_v37 }
 0x250   : > { %6228 = vmatprep.subr.bf16.mxu0 %v7041_v56  ;;  %6515 = vmatprep.subr.bf16.mxu1 %v7043_v57  ;;  %v387_v56 = vld [vmem:[%s8496_s12 + $0x290] sm:$0xff]  ;;  %v432_v46 = vld [vmem:[%s8496_s12 + $0x3f8] sm:$0xff] }
 0x251   : > { %v391_v57 = vld [vmem:[%s8496_s12 + $0x2b0] sm:$0xff] }
 0x252   : > { %v7096_v31 = vcombine.low %v387_v56, %v391_v57 }
 0x253   : > { %6229 = vmatpush1.bf16.msra.mxu0 %v7040_v0  ;;  %6516 = vmatpush1.bf16.msra.mxu1 %v7042_v11  ;;  %v7097_v0 = vcombine.high %v387_v56, %v391_v57  ;;  %v7099_v11 = vcombine.high %v388_v58, %v392_v59  ;;  %v436_v56 = vld [vmem:[%s8496_s12 + $0x418] sm:$0xff]  ;;  %v7138_v59 = vcombine.low %v428_v44, %v432_v46 }
 0x254   : > { %6230 = vmatprep.subr.bf16.mxu0 %v7049_v10  ;;  %6517 = vmatprep.subr.bf16.mxu1 %v7051_v4  ;;  %v395_v10 = vld [vmem:[%s8496_s12 + $0x2d0] sm:$0xff]  ;;  %v440_v57 = vld [vmem:[%s8496_s12 + $0x438] sm:$0xff] }
 0x255   : > { %v399_v4 = vld [vmem:[%s8496_s12 + $0x2f0] sm:$0xff] }
 0x256   : > { %v7104_v17 = vcombine.low %v395_v10, %v399_v4 }
 0x257   : > { %6231 = vmatpush1.bf16.msra.mxu0 %v7048_v9  ;;  %6518 = vmatpush1.bf16.msra.mxu1 %v7050_v12  ;;  %v7105_v9 = vcombine.high %v395_v10, %v399_v4  ;;  %v7107_v12 = vcombine.high %v396_v5, %v400_v6  ;;  %v444_v10 = vld [vmem:[%s8496_s12 + $0x458] sm:$0xff]  ;;  %v7146_v6 = vcombine.low %v436_v56, %v440_v57 }
 0x258   : > { %6232 = vmatprep.subr.bf16.mxu0 %v7057_v13  ;;  %6519 = vmatprep.subr.bf16.mxu1 %v7059_v14  ;;  %v403_v13 = vld [vmem:[%s8496_s12 + $0x310] sm:$0xff]  ;;  %v448_v4 = vld [vmem:[%s8496_s12 + $0x478] sm:$0xff] }
 0x259   : > { %v407_v14 = vld [vmem:[%s8496_s12 + $0x330] sm:$0xff] }
 0x25a   : > { %v7112_v27 = vcombine.low %v403_v13, %v407_v14 }
 0x25b   : > { %6233 = vmatpush1.bf16.msra.mxu0 %v7056_v19  ;;  %6520 = vmatpush1.bf16.msra.mxu1 %v7058_v20  ;;  %v7113_v19 = vcombine.high %v403_v13, %v407_v14  ;;  %v7115_v20 = vcombine.high %v404_v15, %v408_v16  ;;  %v452_v13 = vld [vmem:[%s8496_s12 + $0x498] sm:$0xff]  ;;  %v7154_v16 = vcombine.low %v444_v10, %v448_v4 }
 0x25c   : > { %6234 = vmatprep.subr.bf16.mxu0 %v7065_v22  ;;  %6521 = vmatprep.subr.bf16.mxu1 %v7067_v23  ;;  %v411_v22 = vld [vmem:[%s8496_s12 + $0x350] sm:$0xff]  ;;  %v456_v14 = vld [vmem:[%s8496_s12 + $0x4b8] sm:$0xff] }
 0x25d   : > { %v415_v23 = vld [vmem:[%s8496_s12 + $0x370] sm:$0xff] }
 0x25e   : > { %v7120_v38 = vcombine.low %v411_v22, %v415_v23 }
 0x25f   : > { %6235 = vmatpush1.bf16.msra.mxu0 %v7064_v32  ;;  %6522 = vmatpush1.bf16.msra.mxu1 %v7066_v33  ;;  %v7121_v32 = vcombine.high %v411_v22, %v415_v23  ;;  %v7123_v33 = vcombine.high %v412_v24, %v416_v26  ;;  %v460_v22 = vld [vmem:[%s8496_s12 + $0x4d8] sm:$0xff]  ;;  %v7162_v24 = vcombine.low %v452_v13, %v456_v14 }
 0x260   : > { %6236 = vmatprep.subr.bf16.mxu0 %v7073_v1  ;;  %6523 = vmatprep.subr.bf16.mxu1 %v7075_v35  ;;  %v419_v1 = vld [vmem:[%s8496_s12 + $0x390] sm:$0xff]  ;;  %v464_v23 = vld [vmem:[%s8496_s12 + $0x4f8] sm:$0xff] }
 0x261   : > { %v423_v35 = vld [vmem:[%s8496_s12 + $0x3b0] sm:$0xff] }
 0x262   : > { %v7128_v47 = vcombine.low %v419_v1, %v423_v35 }
 0x263   : > { %6237 = vmatpush1.bf16.msra.mxu0 %v7072_v55  ;;  %6524 = vmatpush1.bf16.msra.mxu1 %v7074_v18  ;;  %v7129_v55 = vcombine.high %v419_v1, %v423_v35  ;;  %v7131_v18 = vcombine.high %v420_v36, %v424_v37  ;;  %v472_v1 = vld [vmem:[%s8496_s12 + $0x538] sm:$0xff] }
 0x264   : > { %6238 = vmatprep.subr.bf16.mxu0 %v7081_v42  ;;  %6525 = vmatprep.subr.bf16.mxu1 %v7083_v43  ;;  %v427_v42 = vld [vmem:[%s8496_s12 + $0x3d0] sm:$0xff] }
 0x265   : > { %v431_v43 = vld [vmem:[%s8496_s12 + $0x3f0] sm:$0xff] }
 0x266   : > { %v7136_v58 = vcombine.low %v427_v42, %v431_v43 }
 0x267   : > { %6239 = vmatpush1.bf16.msra.mxu0 %v7080_v49  ;;  %6526 = vmatpush1.bf16.msra.mxu1 %v7082_v51  ;;  %v7137_v49 = vcombine.high %v427_v42, %v431_v43  ;;  %v7139_v51 = vcombine.high %v428_v44, %v432_v46 }
 0x268   : > { %6240 = vmatprep.subr.bf16.mxu0 %v7089_v52  ;;  %6527 = vmatprep.subr.bf16.mxu1 %v7091_v54  ;;  %v435_v52 = vld [vmem:[%s8496_s12 + $0x410] sm:$0xff] }
 0x269   : > { %v439_v54 = vld [vmem:[%s8496_s12 + $0x430] sm:$0xff] }
 0x26a   : > { %v7144_v5 = vcombine.low %v435_v52, %v439_v54 }
 0x26b   : > { %6241 = vmatpush1.bf16.msra.mxu0 %v7088_v62  ;;  %6528 = vmatpush1.bf16.msra.mxu1 %v7090_v63  ;;  %v7145_v62 = vcombine.high %v435_v52, %v439_v54  ;;  %v7147_v63 = vcombine.high %v436_v56, %v440_v57 }
 0x26c   : > { %6242 = vmatprep.subr.bf16.mxu0 %v7097_v0  ;;  %6529 = vmatprep.subr.bf16.mxu1 %v7099_v11  ;;  %v443_v0 = vld [vmem:[%s8496_s12 + $0x450] sm:$0xff] }
 0x26d   : > { %v447_v11 = vld [vmem:[%s8496_s12 + $0x470] sm:$0xff] }
 0x26e   : > { %v7152_v15 = vcombine.low %v443_v0, %v447_v11 }
 0x26f   : > { %6243 = vmatpush1.bf16.msra.mxu0 %v7096_v31  ;;  %6530 = vmatpush1.bf16.msra.mxu1 %v7098_v8  ;;  %v7153_v31 = vcombine.high %v443_v0, %v447_v11  ;;  %v7155_v8 = vcombine.high %v444_v10, %v448_v4 }
 0x270   : > { %6244 = vmatprep.subr.bf16.mxu0 %v7105_v9  ;;  %6531 = vmatprep.subr.bf16.mxu1 %v7107_v12  ;;  %v451_v9 = vld [vmem:[%s8496_s12 + $0x490] sm:$0xff] }
 0x271   : > { %v455_v12 = vld [vmem:[%s8496_s12 + $0x4b0] sm:$0xff] }
 0x273   : > { %6245 = vmatpush1.bf16.msra.mxu0 %v7104_v17  ;;  %6532 = vmatpush1.bf16.msra.mxu1 %v7106_v3  ;;  %v7161_v17 = vcombine.high %v451_v9, %v455_v12  ;;  %v7163_v3 = vcombine.high %v452_v13, %v456_v14 }
 0x274   : > { %6246 = vmatprep.subr.bf16.mxu0 %v7113_v19  ;;  %6533 = vmatprep.subr.bf16.mxu1 %v7115_v20  ;;  %v459_v19 = vld [vmem:[%s8496_s12 + $0x4d0] sm:$0xff] }
 0x275   : > { %v463_v20 = vld [vmem:[%s8496_s12 + $0x4f0] sm:$0xff] }
 0x276   : > { %v7169_v26 = vcombine.high %v459_v19, %v463_v20  ;;  %v7168_v35 = vcombine.low %v459_v19, %v463_v20 }
 0x277   : > { %6247 = vmatpush1.bf16.msra.mxu0 %v7112_v27  ;;  %6534 = vmatpush1.bf16.msra.mxu1 %v7114_v28  ;;  %v7171_v27 = vcombine.high %v460_v22, %v464_v23  ;;  %v467_v28 = vld [vmem:[%s8496_s12 + $0x510] sm:$0xff] }
 0x278   : > { %6248 = vmatprep.subr.bf16.mxu0 %v7121_v32  ;;  %6535 = vmatprep.subr.bf16.mxu1 %v7123_v33  ;;  %v471_v32 = vld [vmem:[%s8496_s12 + $0x530] sm:$0xff]  ;;  %v468_v33 = vld [vmem:[%s8496_s12 + $0x518] sm:$0xff] }
 0x279   : > { %v7177_v36 = vcombine.high %v467_v28, %v471_v32  ;;  %v7179_v37 = vcombine.high %v468_v33, %v472_v1  ;;  %v7176_v42 = vcombine.low %v467_v28, %v471_v32  ;;  %v7178_v43 = vcombine.low %v468_v33, %v472_v1 }
 0x27b   : > { %6249 = vmatpush1.bf16.msra.mxu0 %v7120_v38  ;;  %6536 = vmatpush1.bf16.msra.mxu1 %v7122_v41  ;;  %v475_v38 = vld [vmem:[%s8496_s12 + $0x550] sm:$0xff] }
 0x27c   : > { %6250 = vmatprep.subr.bf16.mxu0 %v7129_v55  ;;  %6537 = vmatprep.subr.bf16.mxu1 %v7131_v18  ;;  %v479_v41 = vld [vmem:[%s8496_s12 + $0x570] sm:$0xff]  ;;  %v476_v55 = vld [vmem:[%s8496_s12 + $0x558] sm:$0xff] }
 0x27d   : > { %v480_v18 = vld [vmem:[%s8496_s12 + $0x578] sm:$0xff]  ;;  %v7185_v44 = vcombine.high %v475_v38, %v479_v41  ;;  %v7184_v52 = vcombine.low %v475_v38, %v479_v41 }
 0x27e   : > { %v7187_v46 = vcombine.high %v476_v55, %v480_v18  ;;  %v7186_v54 = vcombine.low %v476_v55, %v480_v18 }
 0x27f   : > { %6251 = vmatpush1.bf16.msra.mxu0 %v7128_v47  ;;  %6538 = vmatpush1.bf16.msra.mxu1 %v7130_v48  ;;  %v483_v47 = vld [vmem:[%s8496_s12 + $0x590] sm:$0xff] }
 0x280   : > { %6252 = vmatprep.subr.bf16.mxu0 %v7137_v49  ;;  %6539 = vmatprep.subr.bf16.mxu1 %v7139_v51  ;;  %v487_v48 = vld [vmem:[%s8496_s12 + $0x5b0] sm:$0xff]  ;;  %v484_v49 = vld [vmem:[%s8496_s12 + $0x598] sm:$0xff] }
 0x281   : > { %v488_v51 = vld [vmem:[%s8496_s12 + $0x5b8] sm:$0xff]  ;;  %v7193_v56 = vcombine.high %v483_v47, %v487_v48  ;;  %v7192_v0 = vcombine.low %v483_v47, %v487_v48 }
 0x282   : > { %v7195_v57 = vcombine.high %v484_v49, %v488_v51  ;;  %v7194_v11 = vcombine.low %v484_v49, %v488_v51 }
 0x283   : > { %6253 = vmatpush1.bf16.msra.mxu0 %v7136_v58  ;;  %6540 = vmatpush1.bf16.msra.mxu1 %v7138_v59  ;;  %v491_v58 = vld [vmem:[%s8496_s12 + $0x5d0] sm:$0xff] }
 0x284   : > { %6263 = vmatprep.subr.bf16.mxu0 %v7145_v62  ;;  %6550 = vmatprep.subr.bf16.mxu1 %v7147_v63  ;;  %v495_v59 = vld [vmem:[%s8496_s12 + $0x5f0] sm:$0xff]  ;;  %v492_v62 = vld [vmem:[%s8496_s12 + $0x5d8] sm:$0xff] }
 0x285   : > { %v496_v63 = vld [vmem:[%s8496_s12 + $0x5f8] sm:$0xff]  ;;  %v7201_v10 = vcombine.high %v491_v58, %v495_v59 }
 0x286   : > { %6255 = vmatmul.mubr.bf16.vlgmr.msra.gmra.mrb[4].mxu0 %v8604_v25  ;;  %6542 = vmatmul.mubr.bf16.vlgmr.msra.gmra.mrb[4].mxu1 %v8604_v25  ;;  %v7160_v25 = vcombine.low %v451_v9, %v455_v12  ;;  %v7203_v4 = vcombine.high %v492_v62, %v496_v63  ;;  %v7200_v9 = vcombine.low %v491_v58, %v495_v59 }
 0x287   : > { %6264 = vmatpush1.bf16.msra.mxu0 %v7144_v5  ;;  %6551 = vmatpush1.bf16.msra.mxu1 %v7146_v6  ;;  %v499_v5 = vld [vmem:[%s8496_s12 + $0x610] sm:$0xff]  ;;  %v7202_v12 = vcombine.low %v492_v62, %v496_v63 }
 0x288   : > { %6265 = vmatprep.subr.bf16.mxu0 %v7153_v31  ;;  %6552 = vmatprep.subr.bf16.mxu1 %v7155_v8  ;;  %v503_v6 = vld [vmem:[%s8496_s12 + $0x630] sm:$0xff]  ;;  %v500_v31 = vld [vmem:[%s8496_s12 + $0x618] sm:$0xff] }
 0x289   : > { %6295 = vmatprep.mubr.bf16.mxu0 %v8612_v34  ;;  %6582 = vmatprep.mubr.bf16.mxu1 %v8612_v34  ;;  %v7170_v34 = vcombine.low %v460_v22, %v464_v23  ;;  %v504_v8 = vld [vmem:[%s8496_s12 + $0x638] sm:$0xff]  ;;  %v7209_v13 = vcombine.high %v499_v5, %v503_v6  ;;  %v7208_v19 = vcombine.low %v499_v5, %v503_v6 }
 0x28a   : > { %v7211_v14 = vcombine.high %v500_v31, %v504_v8  ;;  %v7210_v20 = vcombine.low %v500_v31, %v504_v8 }
 0x28b   : > { %6266 = vmatpush1.bf16.msra.mxu0 %v7152_v15  ;;  %6553 = vmatpush1.bf16.msra.mxu1 %v7154_v16  ;;  %v507_v15 = vld [vmem:[%s8496_s12 + $0x650] sm:$0xff] }
 0x28c   : > { %6267 = vmatprep.subr.bf16.mxu0 %v7161_v17  ;;  %6554 = vmatprep.subr.bf16.mxu1 %v7163_v3  ;;  %v511_v16 = vld [vmem:[%s8496_s12 + $0x670] sm:$0xff]  ;;  %v508_v17 = vld [vmem:[%s8496_s12 + $0x658] sm:$0xff] }
 0x28d   : > { %v512_v3 = vld [vmem:[%s8496_s12 + $0x678] sm:$0xff]  ;;  %v7217_v22 = vcombine.high %v507_v15, %v511_v16  ;;  %v7216_v28 = vcombine.low %v507_v15, %v511_v16 }
 0x28e   : > { %v7219_v23 = vcombine.high %v508_v17, %v512_v3  ;;  %v7218_v32 = vcombine.low %v508_v17, %v512_v3 }
 0x28f   : > { %6268 = vmatpush1.bf16.msra.mxu0 %v7160_v25  ;;  %6555 = vmatpush1.bf16.msra.mxu1 %v7162_v24  ;;  %v515_v25 = vld [vmem:[%s8496_s12 + $0x690] sm:$0xff] }
 0x290   : > { %6269 = vmatprep.subr.bf16.mxu0 %v7169_v26  ;;  %6556 = vmatprep.subr.bf16.mxu1 %v7171_v27  ;;  %v519_v24 = vld [vmem:[%s8496_s12 + $0x6b0] sm:$0xff]  ;;  %v516_v26 = vld [vmem:[%s8496_s12 + $0x698] sm:$0xff] }
 0x291   : > { %v520_v27 = vld [vmem:[%s8496_s12 + $0x6b8] sm:$0xff]  ;;  %v7225_v33 = vcombine.high %v515_v25, %v519_v24  ;;  %v7224_v38 = vcombine.low %v515_v25, %v519_v24 }
 0x292   : > { %v7227_v1 = vcombine.high %v516_v26, %v520_v27  ;;  %v7226_v41 = vcombine.low %v516_v26, %v520_v27 }
 0x293   : > { %6270 = vmatpush1.bf16.msra.mxu0 %v7168_v35  ;;  %6557 = vmatpush1.bf16.msra.mxu1 %v7170_v34  ;;  %v523_v35 = vld [vmem:[%s8496_s12 + $0x6d0] sm:$0xff] }
 0x294   : > { %6271 = vmatprep.subr.bf16.mxu0 %v7177_v36  ;;  %6558 = vmatprep.subr.bf16.mxu1 %v7179_v37  ;;  %v527_v34 = vld [vmem:[%s8496_s12 + $0x6f0] sm:$0xff]  ;;  %v524_v36 = vld [vmem:[%s8496_s12 + $0x6d8] sm:$0xff] }
 0x295   : > { %v528_v37 = vld [vmem:[%s8496_s12 + $0x6f8] sm:$0xff]  ;;  %v7233_v55 = vcombine.high %v523_v35, %v527_v34  ;;  %v7232_v47 = vcombine.low %v523_v35, %v527_v34 }
 0x296   : > { %v7235_v18 = vcombine.high %v524_v36, %v528_v37  ;;  %v7234_v48 = vcombine.low %v524_v36, %v528_v37 }
 0x297   : > { %6272 = vmatpush1.bf16.msra.mxu0 %v7176_v42  ;;  %6559 = vmatpush1.bf16.msra.mxu1 %v7178_v43  ;;  %v531_v42 = vld [vmem:[%s8496_s12 + $0x710] sm:$0xff] }
 0x298   : > { %6273 = vmatprep.subr.bf16.mxu0 %v7185_v44  ;;  %6560 = vmatprep.subr.bf16.mxu1 %v7187_v46  ;;  %v535_v43 = vld [vmem:[%s8496_s12 + $0x730] sm:$0xff]  ;;  %v532_v44 = vld [vmem:[%s8496_s12 + $0x718] sm:$0xff] }
 0x299   : > { %v536_v46 = vld [vmem:[%s8496_s12 + $0x738] sm:$0xff]  ;;  %v7241_v49 = vcombine.high %v531_v42, %v535_v43  ;;  %v7240_v58 = vcombine.low %v531_v42, %v535_v43 }
 0x29a   : > { %v7243_v51 = vcombine.high %v532_v44, %v536_v46  ;;  %v7242_v59 = vcombine.low %v532_v44, %v536_v46 }
 0x29b   : > { %6274 = vmatpush1.bf16.msra.mxu0 %v7184_v52  ;;  %6561 = vmatpush1.bf16.msra.mxu1 %v7186_v54  ;;  %v539_v52 = vld [vmem:[%s8496_s12 + $0x750] sm:$0xff] }
 0x29c   : > { %6275 = vmatprep.subr.bf16.mxu0 %v7193_v56  ;;  %6562 = vmatprep.subr.bf16.mxu1 %v7195_v57  ;;  %v543_v54 = vld [vmem:[%s8496_s12 + $0x770] sm:$0xff]  ;;  %v540_v56 = vld [vmem:[%s8496_s12 + $0x758] sm:$0xff] }
 0x29d   : > { %v544_v57 = vld [vmem:[%s8496_s12 + $0x778] sm:$0xff]  ;;  %v7249_v62 = vcombine.high %v539_v52, %v543_v54  ;;  %v7248_v5 = vcombine.low %v539_v52, %v543_v54 }
 0x29e   : > { %v7251_v63 = vcombine.high %v540_v56, %v544_v57  ;;  %v7250_v6 = vcombine.low %v540_v56, %v544_v57  ;;  %v595_v57 = vld [vmem:[%s8496_s12 + $0x910] sm:$0xff] }
 0x29f   : > { %6276 = vmatpush1.bf16.msra.mxu0 %v7192_v0  ;;  %6563 = vmatpush1.bf16.msra.mxu1 %v7194_v11  ;;  %v547_v0 = vld [vmem:[%s8496_s12 + $0x790] sm:$0xff] }
 0x2a0   : > { %6277 = vmatprep.subr.bf16.mxu0 %v7201_v10  ;;  %6564 = vmatprep.subr.bf16.mxu1 %v7203_v4  ;;  %v551_v11 = vld [vmem:[%s8496_s12 + $0x7b0] sm:$0xff]  ;;  %v548_v10 = vld [vmem:[%s8496_s12 + $0x798] sm:$0xff] }
 0x2a1   : > { %v552_v4 = vld [vmem:[%s8496_s12 + $0x7b8] sm:$0xff]  ;;  %v7257_v31 = vcombine.high %v547_v0, %v551_v11  ;;  %v7256_v15 = vcombine.low %v547_v0, %v551_v11 }
 0x2a2   : > { %v7259_v8 = vcombine.high %v548_v10, %v552_v4  ;;  %v7258_v16 = vcombine.low %v548_v10, %v552_v4  ;;  %v603_v10 = vld [vmem:[%s8496_s12 + $0x950] sm:$0xff] }
 0x2a3   : > { %6278 = vmatpush1.bf16.msra.mxu0 %v7200_v9  ;;  %6565 = vmatpush1.bf16.msra.mxu1 %v7202_v12  ;;  %v555_v9 = vld [vmem:[%s8496_s12 + $0x7d0] sm:$0xff] }
 0x2a4   : > { %6279 = vmatprep.subr.bf16.mxu0 %v7209_v13  ;;  %6566 = vmatprep.subr.bf16.mxu1 %v7211_v14  ;;  %v559_v12 = vld [vmem:[%s8496_s12 + $0x7f0] sm:$0xff]  ;;  %v556_v13 = vld [vmem:[%s8496_s12 + $0x7d8] sm:$0xff] }
 0x2a5   : > { %v560_v14 = vld [vmem:[%s8496_s12 + $0x7f8] sm:$0xff]  ;;  %v7265_v17 = vcombine.high %v555_v9, %v559_v12  ;;  %v7264_v25 = vcombine.low %v555_v9, %v559_v12  ;;  %v607_v4 = vld [vmem:[%s8496_s12 + $0x970] sm:$0xff] }
 0x2a6   : > { %v7267_v3 = vcombine.high %v556_v13, %v560_v14  ;;  %v7266_v24 = vcombine.low %v556_v13, %v560_v14  ;;  %v7313_v9 = vcombine.high %v603_v10, %v607_v4  ;;  %v611_v13 = vld [vmem:[%s8496_s12 + $0x990] sm:$0xff] }
 0x2a7   : > { %6280 = vmatpush1.bf16.msra.mxu0 %v7208_v19  ;;  %6567 = vmatpush1.bf16.msra.mxu1 %v7210_v20  ;;  %v563_v19 = vld [vmem:[%s8496_s12 + $0x810] sm:$0xff] }
 0x2a8   : > { %6281 = vmatprep.subr.bf16.mxu0 %v7217_v22  ;;  %6568 = vmatprep.subr.bf16.mxu1 %v7219_v23  ;;  %v567_v20 = vld [vmem:[%s8496_s12 + $0x830] sm:$0xff]  ;;  %v564_v22 = vld [vmem:[%s8496_s12 + $0x818] sm:$0xff] }
 0x2a9   : > { %v568_v23 = vld [vmem:[%s8496_s12 + $0x838] sm:$0xff]  ;;  %v7273_v26 = vcombine.high %v563_v19, %v567_v20  ;;  %v7272_v35 = vcombine.low %v563_v19, %v567_v20  ;;  %v615_v14 = vld [vmem:[%s8496_s12 + $0x9b0] sm:$0xff] }
 0x2aa   : > { %v7275_v27 = vcombine.high %v564_v22, %v568_v23  ;;  %v7274_v34 = vcombine.low %v564_v22, %v568_v23  ;;  %v7321_v19 = vcombine.high %v611_v13, %v615_v14  ;;  %v619_v22 = vld [vmem:[%s8496_s12 + $0x9d0] sm:$0xff] }
 0x2ab   : > { %6282 = vmatpush1.bf16.msra.mxu0 %v7216_v28  ;;  %6569 = vmatpush1.bf16.msra.mxu1 %v7218_v32  ;;  %v571_v28 = vld [vmem:[%s8496_s12 + $0x850] sm:$0xff] }
 0x2ac   : > { %6283 = vmatprep.subr.bf16.mxu0 %v7225_v33  ;;  %6570 = vmatprep.subr.bf16.mxu1 %v7227_v1  ;;  %v575_v32 = vld [vmem:[%s8496_s12 + $0x870] sm:$0xff]  ;;  %v572_v33 = vld [vmem:[%s8496_s12 + $0x858] sm:$0xff] }
 0x2ad   : > { %v576_v1 = vld [vmem:[%s8496_s12 + $0x878] sm:$0xff]  ;;  %v7281_v36 = vcombine.high %v571_v28, %v575_v32  ;;  %v7280_v42 = vcombine.low %v571_v28, %v575_v32  ;;  %v623_v23 = vld [vmem:[%s8496_s12 + $0x9f0] sm:$0xff] }
 0x2ae   : > { %v7283_v37 = vcombine.high %v572_v33, %v576_v1  ;;  %v7282_v43 = vcombine.low %v572_v33, %v576_v1  ;;  %v7329_v28 = vcombine.high %v619_v22, %v623_v23  ;;  %v627_v33 = vld [vmem:[%s8496_s12 + $0xa10] sm:$0xff] }
 0x2af   : > { %6284 = vmatpush1.bf16.msra.mxu0 %v7224_v38  ;;  %6571 = vmatpush1.bf16.msra.mxu1 %v7226_v41  ;;  %v579_v38 = vld [vmem:[%s8496_s12 + $0x890] sm:$0xff] }
 0x2b0   : > { %6285 = vmatprep.subr.bf16.mxu0 %v7233_v55  ;;  %6572 = vmatprep.subr.bf16.mxu1 %v7235_v18  ;;  %v583_v41 = vld [vmem:[%s8496_s12 + $0x8b0] sm:$0xff]  ;;  %v580_v55 = vld [vmem:[%s8496_s12 + $0x898] sm:$0xff] }
 0x2b1   : > { %v584_v18 = vld [vmem:[%s8496_s12 + $0x8b8] sm:$0xff]  ;;  %v7289_v44 = vcombine.high %v579_v38, %v583_v41  ;;  %v631_v1 = vld [vmem:[%s8496_s12 + $0xa30] sm:$0xff] }
 0x2b2   : > { %v7291_v46 = vcombine.high %v580_v55, %v584_v18  ;;  %v7290_v52 = vcombine.low %v580_v55, %v584_v18  ;;  %v635_v55 = vld [vmem:[%s8496_s12 + $0xa50] sm:$0xff] }
 0x2b3   : > { %6286 = vmatpush1.bf16.msra.mxu0 %v7232_v47  ;;  %6573 = vmatpush1.bf16.msra.mxu1 %v7234_v48  ;;  %v587_v47 = vld [vmem:[%s8496_s12 + $0x8d0] sm:$0xff] }
 0x2b4   : > { %6287 = vmatprep.subr.bf16.mxu0 %v7241_v49  ;;  %6574 = vmatprep.subr.bf16.mxu1 %v7243_v51  ;;  %v591_v48 = vld [vmem:[%s8496_s12 + $0x8f0] sm:$0xff]  ;;  %v588_v49 = vld [vmem:[%s8496_s12 + $0x8d8] sm:$0xff] }
 0x2b5   : > { %v592_v51 = vld [vmem:[%s8496_s12 + $0x8f8] sm:$0xff]  ;;  %v7297_v54 = vcombine.high %v587_v47, %v591_v48  ;;  %v639_v18 = vld [vmem:[%s8496_s12 + $0xa70] sm:$0xff] }
 0x2b6   : > { %v7299_v56 = vcombine.high %v588_v49, %v592_v51 }
 0x2b7   : > { %6288 = vmatpush1.bf16.msra.mxu0 %v7240_v58  ;;  %6575 = vmatpush1.bf16.msra.mxu1 %v7242_v59  ;;  %v599_v58 = vld [vmem:[%s8496_s12 + $0x930] sm:$0xff]  ;;  %v596_v59 = vld [vmem:[%s8496_s12 + $0x918] sm:$0xff] }
 0x2b8   : > { %6289 = vmatprep.subr.bf16.mxu0 %v7249_v62  ;;  %6576 = vmatprep.subr.bf16.mxu1 %v7251_v63  ;;  %v600_v62 = vld [vmem:[%s8496_s12 + $0x938] sm:$0xff]  ;;  %v7296_v63 = vcombine.low %v587_v47, %v591_v48  ;;  %v7305_v0 = vcombine.high %v595_v57, %v599_v58  ;;  %v7345_v47 = vcombine.high %v635_v55, %v639_v18 }
 0x2b9   : > { %v7307_v11 = vcombine.high %v596_v59, %v600_v62 }
 0x2bb   : > { %6290 = vmatpush1.bf16.msra.mxu0 %v7248_v5  ;;  %6577 = vmatpush1.bf16.msra.mxu1 %v7250_v6  ;;  %v604_v5 = vld [vmem:[%s8496_s12 + $0x958] sm:$0xff] }
 0x2bc   : > { %6291 = vmatprep.subr.bf16.mxu0 %v7257_v31  ;;  %6578 = vmatprep.subr.bf16.mxu1 %v7259_v8  ;;  %v608_v6 = vld [vmem:[%s8496_s12 + $0x978] sm:$0xff]  ;;  %v7304_v31 = vcombine.low %v595_v57, %v599_v58  ;;  %v7306_v8 = vcombine.low %v596_v59, %v600_v62  ;;  %v651_v59 = vld [vmem:[%s8496_s12 + $0xad0] sm:$0xff] }
 0x2bd   : > { %v7315_v12 = vcombine.high %v604_v5, %v608_v6  ;;  %v655_v62 = vld [vmem:[%s8496_s12 + $0xaf0] sm:$0xff] }
 0x2bf   : > { %6292 = vmatpush1.bf16.msra.mxu0 %v7256_v15  ;;  %6579 = vmatpush1.bf16.msra.mxu1 %v7258_v16  ;;  %v612_v15 = vld [vmem:[%s8496_s12 + $0x998] sm:$0xff] }
 0x2c0   : > { %6293 = vmatprep.subr.bf16.mxu0 %v7265_v17  ;;  %6580 = vmatprep.subr.bf16.mxu1 %v7267_v3  ;;  %v616_v16 = vld [vmem:[%s8496_s12 + $0x9b8] sm:$0xff]  ;;  %v7312_v17 = vcombine.low %v603_v10, %v607_v4  ;;  %v7314_v3 = vcombine.low %v604_v5, %v608_v6  ;;  %v7361_v10 = vcombine.high %v651_v59, %v655_v62  ;;  %v659_v5 = vld [vmem:[%s8496_s12 + $0xb10] sm:$0xff] }
 0x2c1   : > { %v7323_v20 = vcombine.high %v612_v15, %v616_v16  ;;  %v663_v6 = vld [vmem:[%s8496_s12 + $0xb30] sm:$0xff] }
 0x2c3   : > { %6294 = vmatpush1.bf16.msra.mxu0 %v7264_v25  ;;  %6581 = vmatpush1.bf16.msra.mxu1 %v7266_v24  ;;  %v620_v25 = vld [vmem:[%s8496_s12 + $0x9d8] sm:$0xff] }
 0x2c4   : > { %6304 = vmatprep.subr.bf16.mxu0 %v7273_v26  ;;  %6591 = vmatprep.subr.bf16.mxu1 %v7275_v27  ;;  %v624_v24 = vld [vmem:[%s8496_s12 + $0x9f8] sm:$0xff]  ;;  %v7320_v26 = vcombine.low %v611_v13, %v615_v14  ;;  %v7322_v27 = vcombine.low %v612_v15, %v616_v16  ;;  %v7369_v13 = vcombine.high %v659_v5, %v663_v6  ;;  %v667_v15 = vld [vmem:[%s8496_s12 + $0xb50] sm:$0xff] }
 0x2c5   : > { %v7331_v32 = vcombine.high %v620_v25, %v624_v24  ;;  %v671_v16 = vld [vmem:[%s8496_s12 + $0xb70] sm:$0xff] }
 0x2c6   : > { %6296 = vmatmul.mubr.bf16.vlgmr.msra.gmra.mrb[4].mxu0 %v8687_v40  ;;  %6583 = vmatmul.mubr.bf16.vlgmr.msra.gmra.mrb[4].mxu1 %v8687_v40  ;;  %v7288_v40 = vcombine.low %v579_v38, %v583_v41  ;;  %v7337_v38 = vcombine.high %v627_v33, %v631_v1 }
 0x2c7   : > { %6305 = vmatpush1.bf16.msra.mxu0 %v7272_v35  ;;  %6592 = vmatpush1.bf16.msra.mxu1 %v7274_v34  ;;  %v628_v35 = vld [vmem:[%s8496_s12 + $0xa18] sm:$0xff] }
 0x2c8   : > { %6306 = vmatprep.subr.bf16.mxu0 %v7281_v36  ;;  %6593 = vmatprep.subr.bf16.mxu1 %v7283_v37  ;;  %v632_v34 = vld [vmem:[%s8496_s12 + $0xa38] sm:$0xff]  ;;  %v7328_v36 = vcombine.low %v619_v22, %v623_v23  ;;  %v7330_v37 = vcombine.low %v620_v25, %v624_v24  ;;  %v7377_v22 = vcombine.high %v667_v15, %v671_v16  ;;  %v675_v25 = vld [vmem:[%s8496_s12 + $0xb90] sm:$0xff] }
 0x2c9   : > { %6336 = vmatprep.mubr.bf16.mxu0 %v8694_v50  ;;  %6623 = vmatprep.mubr.bf16.mxu1 %v8694_v50  ;;  %v7298_v50 = vcombine.low %v588_v49, %v592_v51  ;;  %v7339_v41 = vcombine.high %v628_v35, %v632_v34  ;;  %v643_v49 = vld [vmem:[%s8496_s12 + $0xa90] sm:$0xff] }
 0x2ca   : > { %v647_v51 = vld [vmem:[%s8496_s12 + $0xab0] sm:$0xff] }
 0x2cb   : > { %6307 = vmatpush1.bf16.msra.mxu0 %v7280_v42  ;;  %6594 = vmatpush1.bf16.msra.mxu1 %v7282_v43  ;;  %v636_v42 = vld [vmem:[%s8496_s12 + $0xa58] sm:$0xff]  ;;  %v7353_v57 = vcombine.high %v643_v49, %v647_v51  ;;  %v679_v24 = vld [vmem:[%s8496_s12 + $0xbb0] sm:$0xff] }
 0x2cc   : > { %6308 = vmatprep.subr.bf16.mxu0 %v7289_v44  ;;  %6595 = vmatprep.subr.bf16.mxu1 %v7291_v46  ;;  %v640_v43 = vld [vmem:[%s8496_s12 + $0xa78] sm:$0xff]  ;;  %v7336_v44 = vcombine.low %v627_v33, %v631_v1  ;;  %v7338_v46 = vcombine.low %v628_v35, %v632_v34  ;;  %v7385_v33 = vcombine.high %v675_v25, %v679_v24  ;;  %v683_v35 = vld [vmem:[%s8496_s12 + $0xbd0] sm:$0xff] }
 0x2cd   : > { %v7347_v48 = vcombine.high %v636_v42, %v640_v43  ;;  %v687_v34 = vld [vmem:[%s8496_s12 + $0xbf0] sm:$0xff] }
 0x2cf   : > { %6309 = vmatpush1.bf16.msra.mxu0 %v7288_v40  ;;  %6596 = vmatpush1.bf16.msra.mxu1 %v7290_v52  ;;  %v644_v40 = vld [vmem:[%s8496_s12 + $0xa98] sm:$0xff] }
 0x2d0   : > { %6310 = vmatprep.subr.bf16.mxu0 %v7297_v54  ;;  %6597 = vmatprep.subr.bf16.mxu1 %v7299_v56  ;;  %v648_v52 = vld [vmem:[%s8496_s12 + $0xab8] sm:$0xff]  ;;  %v7344_v54 = vcombine.low %v635_v55, %v639_v18  ;;  %v7346_v56 = vcombine.low %v636_v42, %v640_v43  ;;  %v7393_v55 = vcombine.high %v683_v35, %v687_v34  ;;  %v691_v42 = vld [vmem:[%s8496_s12 + $0xc10] sm:$0xff] }
 0x2d1   : > { %v7355_v58 = vcombine.high %v644_v40, %v648_v52  ;;  %v695_v43 = vld [vmem:[%s8496_s12 + $0xc30] sm:$0xff] }
 0x2d3   : > { %6311 = vmatpush1.bf16.msra.mxu0 %v7296_v63  ;;  %6598 = vmatpush1.bf16.msra.mxu1 %v7298_v50  ;;  %v652_v63 = vld [vmem:[%s8496_s12 + $0xad8] sm:$0xff] }
 0x2d4   : > { %6312 = vmatprep.subr.bf16.mxu0 %v7305_v0  ;;  %6599 = vmatprep.subr.bf16.mxu1 %v7307_v11  ;;  %v656_v50 = vld [vmem:[%s8496_s12 + $0xaf8] sm:$0xff]  ;;  %v7352_v0 = vcombine.low %v643_v49, %v647_v51  ;;  %v7354_v11 = vcombine.low %v644_v40, %v648_v52  ;;  %v7401_v49 = vcombine.high %v691_v42, %v695_v43  ;;  %v699_v40 = vld [vmem:[%s8496_s12 + $0xc50] sm:$0xff] }
 0x2d5   : > { %v7363_v4 = vcombine.high %v652_v63, %v656_v50  ;;  %v703_v52 = vld [vmem:[%s8496_s12 + $0xc70] sm:$0xff] }
 0x2d7   : > { %6313 = vmatpush1.bf16.msra.mxu0 %v7304_v31  ;;  %6600 = vmatpush1.bf16.msra.mxu1 %v7306_v8  ;;  %v660_v31 = vld [vmem:[%s8496_s12 + $0xb18] sm:$0xff] }
 0x2d8   : > { %6314 = vmatprep.subr.bf16.mxu0 %v7313_v9  ;;  %6601 = vmatprep.subr.bf16.mxu1 %v7315_v12  ;;  %v664_v8 = vld [vmem:[%s8496_s12 + $0xb38] sm:$0xff]  ;;  %v7360_v9 = vcombine.low %v651_v59, %v655_v62  ;;  %v7362_v12 = vcombine.low %v652_v63, %v656_v50  ;;  %v7409_v59 = vcombine.high %v699_v40, %v703_v52  ;;  %v707_v63 = vld [vmem:[%s8496_s12 + $0xc90] sm:$0xff] }
 0x2d9   : > { %v7371_v14 = vcombine.high %v660_v31, %v664_v8  ;;  %v711_v50 = vld [vmem:[%s8496_s12 + $0xcb0] sm:$0xff] }
 0x2db   : > { %6315 = vmatpush1.bf16.msra.mxu0 %v7312_v17  ;;  %6602 = vmatpush1.bf16.msra.mxu1 %v7314_v3  ;;  %v668_v17 = vld [vmem:[%s8496_s12 + $0xb58] sm:$0xff] }
 0x2dc   : > { %6316 = vmatprep.subr.bf16.mxu0 %v7321_v19  ;;  %6603 = vmatprep.subr.bf16.mxu1 %v7323_v20  ;;  %v672_v3 = vld [vmem:[%s8496_s12 + $0xb78] sm:$0xff]  ;;  %v7368_v19 = vcombine.low %v659_v5, %v663_v6  ;;  %v7370_v20 = vcombine.low %v660_v31, %v664_v8  ;;  %v7417_v5 = vcombine.high %v707_v63, %v711_v50  ;;  %v715_v31 = vld [vmem:[%s8496_s12 + $0xcd0] sm:$0xff] }
 0x2dd   : > { %v7379_v23 = vcombine.high %v668_v17, %v672_v3  ;;  %v719_v8 = vld [vmem:[%s8496_s12 + $0xcf0] sm:$0xff] }
 0x2df   : > { %6317 = vmatpush1.bf16.msra.mxu0 %v7320_v26  ;;  %6604 = vmatpush1.bf16.msra.mxu1 %v7322_v27  ;;  %v676_v26 = vld [vmem:[%s8496_s12 + $0xb98] sm:$0xff] }
 0x2e0   : > { %6318 = vmatprep.subr.bf16.mxu0 %v7329_v28  ;;  %6605 = vmatprep.subr.bf16.mxu1 %v7331_v32  ;;  %v680_v27 = vld [vmem:[%s8496_s12 + $0xbb8] sm:$0xff]  ;;  %v7376_v28 = vcombine.low %v667_v15, %v671_v16  ;;  %v7378_v32 = vcombine.low %v668_v17, %v672_v3  ;;  %v723_v16 = vld [vmem:[%s8496_s12 + $0xd10] sm:$0xff] }
 0x2e1   : > { %v7387_v1 = vcombine.high %v676_v26, %v680_v27  ;;  %v727_v17 = vld [vmem:[%s8496_s12 + $0xd30] sm:$0xff]  ;;  %v724_v3 = vld [vmem:[%s8496_s12 + $0xd18] sm:$0xff] }
 0x2e3   : > { %6319 = vmatpush1.bf16.msra.mxu0 %v7328_v36  ;;  %6606 = vmatpush1.bf16.msra.mxu1 %v7330_v37  ;;  %v684_v36 = vld [vmem:[%s8496_s12 + $0xbd8] sm:$0xff] }
 0x2e4   : > { %6320 = vmatprep.subr.bf16.mxu0 %v7337_v38  ;;  %6607 = vmatprep.subr.bf16.mxu1 %v7339_v41  ;;  %v688_v37 = vld [vmem:[%s8496_s12 + $0xbf8] sm:$0xff]  ;;  %v7384_v38 = vcombine.low %v675_v25, %v679_v24  ;;  %v7386_v41 = vcombine.low %v676_v26, %v680_v27  ;;  %v731_v25 = vld [vmem:[%s8496_s12 + $0xd50] sm:$0xff]  ;;  %v1175_v26 = vsub.s32 0, %v8536_v45 }
 0x2e5   : > { %v7395_v18 = vcombine.high %v684_v36, %v688_v37  ;;  %v735_v24 = vld [vmem:[%s8496_s12 + $0xd70] sm:$0xff]  ;;  %v732_v27 = vld [vmem:[%s8496_s12 + $0xd58] sm:$0xff] }
 0x2e7   : > { %6321 = vmatpush1.bf16.msra.mxu0 %v7336_v44  ;;  %6608 = vmatpush1.bf16.msra.mxu1 %v7338_v46  ;;  %v692_v44 = vld [vmem:[%s8496_s12 + $0xc18] sm:$0xff] }
 0x2e8   : > { %6322 = vmatprep.subr.bf16.mxu0 %v7345_v47  ;;  %6609 = vmatprep.subr.bf16.mxu1 %v7347_v48  ;;  %v696_v46 = vld [vmem:[%s8496_s12 + $0xc38] sm:$0xff]  ;;  %v7392_v47 = vcombine.low %v683_v35, %v687_v34  ;;  %v7394_v48 = vcombine.low %v684_v36, %v688_v37  ;;  %v1179_v35 = vsub.s32 1, %v8536_v45  ;;  %v1187_v34 = vsub.s32 3, %v8536_v45 }
 0x2e9   : > { %v7403_v51 = vcombine.high %v692_v44, %v696_v46  ;;  %v7441_v37 = vcombine.high %v731_v25, %v735_v24 }
 0x2eb   : > { %6323 = vmatpush1.bf16.msra.mxu0 %v7344_v54  ;;  %6610 = vmatpush1.bf16.msra.mxu1 %v7346_v56  ;;  %v700_v54 = vld [vmem:[%s8496_s12 + $0xc58] sm:$0xff] }
 0x2ec   : > { %6324 = vmatprep.subr.bf16.mxu0 %v7353_v57  ;;  %6611 = vmatprep.subr.bf16.mxu1 %v7355_v58  ;;  %v704_v56 = vld [vmem:[%s8496_s12 + $0xc78] sm:$0xff]  ;;  %v7400_v57 = vcombine.low %v691_v42, %v695_v43  ;;  %v7402_v58 = vcombine.low %v692_v44, %v696_v46 }
 0x2ed   : > { %v7411_v62 = vcombine.high %v700_v54, %v704_v56  ;;  %v9311_v43 = vld [vmem:[%s8496_s12 + $0xd98] sm:$0xff] }
 0x2ee   : > { %v9314_v44 = vld [vmem:[%s8496_s12 + $0xdb8] sm:$0xff] }
 0x2ef   : > { %6325 = vmatpush1.bf16.msra.mxu0 %v7352_v0  ;;  %6612 = vmatpush1.bf16.msra.mxu1 %v7354_v11  ;;  %v708_v0 = vld [vmem:[%s8496_s12 + $0xc98] sm:$0xff] }
 0x2f0   : > { %6326 = vmatprep.subr.bf16.mxu0 %v7361_v10  ;;  %6613 = vmatprep.subr.bf16.mxu1 %v7363_v4  ;;  %v712_v11 = vld [vmem:[%s8496_s12 + $0xcb8] sm:$0xff]  ;;  %v7408_v10 = vcombine.low %v699_v40, %v703_v52  ;;  %v7410_v4 = vcombine.low %v700_v54, %v704_v56  ;;  %v9319_v54 = vld [vmem:[%s8496_s12 + $0xdd0] sm:$0xff] }
 0x2f1   : > { %v7419_v6 = vcombine.high %v708_v0, %v712_v11  ;;  %v9322_v56 = vld [vmem:[%s8496_s12 + $0xdf0] sm:$0xff] }
 0x2f3   : > { %6327 = vmatpush1.bf16.msra.mxu0 %v7360_v9  ;;  %6614 = vmatpush1.bf16.msra.mxu1 %v7362_v12  ;;  %v716_v9 = vld [vmem:[%s8496_s12 + $0xcd8] sm:$0xff] }
 0x2f4   : > { %6328 = vmatprep.subr.bf16.mxu0 %v7369_v13  ;;  %6615 = vmatprep.subr.bf16.mxu1 %v7371_v14  ;;  %v720_v12 = vld [vmem:[%s8496_s12 + $0xcf8] sm:$0xff]  ;;  %v7418_v13 = vcombine.low %v708_v0, %v712_v11  ;;  %v7425_v14 = vcombine.high %v715_v31, %v719_v8 }
 0x2f5   : > { %v7427_v15 = vcombine.high %v716_v9, %v720_v12  ;;  %v752_v0 = vld [vmem:[%s8496_s12 + $0xdf8] sm:$0xff] }
 0x2f7   : > { %6329 = vmatpush1.bf16.msra.mxu0 %v7368_v19  ;;  %6616 = vmatpush1.bf16.msra.mxu1 %v7370_v20  ;;  %v728_v19 = vld [vmem:[%s8496_s12 + $0xd38] sm:$0xff]  ;;  %v7424_v20 = vcombine.low %v715_v31, %v719_v8 }
 0x2f8   : > { %6330 = vmatprep.subr.bf16.mxu0 %v7377_v22  ;;  %6617 = vmatprep.subr.bf16.mxu1 %v7379_v23  ;;  %v7433_v22 = vcombine.high %v723_v16, %v727_v17  ;;  %v7435_v23 = vcombine.high %v724_v3, %v728_v19  ;;  %v7434_v36 = vcombine.low %v724_v3, %v728_v19  ;;  %v755_v19 = vld [vmem:[%s8496_s12 + $0xe10] sm:$0xff] }
 0x2fb   : > { %6331 = vmatpush1.bf16.msra.mxu0 %v7376_v28  ;;  %6618 = vmatpush1.bf16.msra.mxu1 %v7378_v32  ;;  %v736_v28 = vld [vmem:[%s8496_s12 + $0xd78] sm:$0xff]  ;;  %v7432_v32 = vcombine.low %v723_v16, %v727_v17 }
 0x2fc   : > { %6332 = vmatprep.subr.bf16.mxu0 %v7385_v33  ;;  %6619 = vmatprep.subr.bf16.mxu1 %v7387_v1  ;;  %v1171_v33 = vld [vmem:[%s9295_s8] sm:$0xff]  ;;  %v1183_v1 = vsub.s32 2, %v8536_v45  ;;  %v7442_v40 = vcombine.low %v732_v27, %v736_v28 }
 0x2fd   : > { %v1176_v42 = vrot.slane %v1171_v33, %v1175_v26 }
 0x2fe   : > { %v1184_v46 = vrot.slane %v1171_v33, %v1183_v1 }
 0x2ff   : > { %6333 = vmatpush1.bf16.msra.mxu0 %v7384_v38  ;;  %6620 = vmatpush1.bf16.msra.mxu1 %v7386_v41  ;;  %v6821_v38 = vld [vmem:[%s9301_s16] sm:$0xff]  ;;  %v7443_v41 = vcombine.high %v732_v27, %v736_v28 }
 0x300   : > { %6334 = vmatprep.subr.bf16.mxu0 %v7393_v55  ;;  %6621 = vmatprep.subr.bf16.mxu1 %v7395_v18  ;;  %v9305_v55 = vld [vmem:[%s8496_s12 + $0xd90] sm:$0xff]  ;;  %v756_v27 = vld [vmem:[%s8496_s12 + $0xe18] sm:$0xff] }
 0x301   : > { %v9308_v18 = vld [vmem:[%s8496_s12 + $0xdb0] sm:$0xff]  ;;  %v760_v28 = vld [vmem:[%s8496_s12 + $0xe38] sm:$0xff] }
 0x302   : > { %v7449_v52 = vcombine.high %v9305_v55, %v9308_v18 }
 0x303   : > { %6335 = vmatpush1.bf16.msra.mxu0 %v7392_v47  ;;  %6622 = vmatpush1.bf16.msra.mxu1 %v7394_v48  ;;  %v1180_v47 = vrot.slane %v1171_v33, %v1179_v35  ;;  %v1188_v48 = vrot.slane %v1171_v33, %v1187_v34 }
 0x304   : > { %6345 = vmatprep.subr.bf16.mxu0 %v7401_v49  ;;  %6632 = vmatprep.subr.bf16.mxu1 %v7403_v51  ;;  %v7440_v49 = vcombine.low %v731_v25, %v735_v24  ;;  %v6827_v51 = vrot.slane %v6821_v38, %v1175_v26 }
 0x306   : > { %6337 = vmatmul.mubr.bf16.vlgmr.msra.gmra.mrb[4].mxu0 %v8762_v60  ;;  %6624 = vmatmul.mubr.bf16.vlgmr.msra.gmra.mrb[4].mxu1 %v8762_v60  ;;  %v7416_v60 = vcombine.low %v707_v63, %v711_v50  ;;  %v7451_v63 = vcombine.high %v9311_v43, %v9314_v44  ;;  %v748_v50 = vld [vmem:[%s8496_s12 + $0xdd8] sm:$0xff] }
 0x307   : > { %6346 = vmatpush1.bf16.msra.mxu0 %v7400_v57  ;;  %6633 = vmatpush1.bf16.msra.mxu1 %v7402_v58  ;;  %v6835_v58 = vrot.slane %v6821_v38, %v1183_v1  ;;  %v7459_v3 = vcombine.high %v748_v50, %v752_v0  ;;  %v7458_v26 = vcombine.low %v748_v50, %v752_v0 }
 0x308   : > { %6347 = vmatprep.subr.bf16.mxu0 %v7409_v59  ;;  %6634 = vmatprep.subr.bf16.mxu1 %v7411_v62  ;;  %v7448_v59 = vcombine.low %v9305_v55, %v9308_v18  ;;  %v7450_v62 = vcombine.low %v9311_v43, %v9314_v44  ;;  %v763_v55 = vld [vmem:[%s8496_s12 + $0xe50] sm:$0xff]  ;;  %v764_v44 = vld [vmem:[%s8496_s12 + $0xe58] sm:$0xff] }
 0x309   : > { %6377 = vmatprep.mubr.bf16.mxu0 %v8770_v7  ;;  %6664 = vmatprep.mubr.bf16.mxu1 %v8770_v7  ;;  %v7426_v7 = vcombine.low %v716_v9, %v720_v12  ;;  %v767_v18 = vld [vmem:[%s8496_s12 + $0xe70] sm:$0xff] }
 0x30b   : > { %6348 = vmatpush1.bf16.msra.mxu0 %v7408_v10  ;;  %6635 = vmatpush1.bf16.msra.mxu1 %v7410_v4 }
 0x30c   : > { %6349 = vmatprep.subr.bf16.mxu0 %v7417_v5  ;;  %6636 = vmatprep.subr.bf16.mxu1 %v7419_v6  ;;  %v6831_v5 = vrot.slane %v6821_v38, %v1179_v35  ;;  %v6839_v6 = vrot.slane %v6821_v38, %v1187_v34 }
 0x30f   : > { %6350 = vmatpush1.bf16.msra.mxu0 %v7416_v60  ;;  %6637 = vmatpush1.bf16.msra.mxu1 %v7418_v13  ;;  %v7456_v60 = vcombine.low %v9319_v54, %v9322_v56  ;;  %v7457_v13 = vcombine.high %v9319_v54, %v9322_v56  ;;  %v771_v54 = vld [vmem:[%s8496_s12 + $0xe90] sm:$0xff] }
 0x310   : > { %6351 = vmatprep.subr.bf16.mxu0 %v7425_v14  ;;  %6638 = vmatprep.subr.bf16.mxu1 %v7427_v15  ;;  %v775_v56 = vld [vmem:[%s8496_s12 + $0xeb0] sm:$0xff] }
 0x313   : > { %6352 = vmatpush1.bf16.msra.mxu0 %v7424_v20  ;;  %6639 = vmatpush1.bf16.msra.mxu1 %v7426_v7  ;;  %v759_v20 = vld [vmem:[%s8496_s12 + $0xe30] sm:$0xff] }
 0x314   : > { %6353 = vmatprep.subr.bf16.mxu0 %v7433_v22  ;;  %6640 = vmatprep.subr.bf16.mxu1 %v7435_v23  ;;  %v7465_v35 = vcombine.high %v755_v19, %v759_v20 }
 0x317   : > { %6354 = vmatpush1.bf16.msra.mxu0 %v7432_v32  ;;  %6641 = vmatpush1.bf16.msra.mxu1 %v7434_v36 }
 0x318   : > { %6355 = vmatprep.subr.bf16.mxu0 %v7441_v37  ;;  %6642 = vmatprep.subr.bf16.mxu1 %v7443_v41  ;;  %v7467_v41 = vcombine.high %v756_v27, %v760_v28 }
 0x319   : > { %v5928_v57 = vpop.f32.mrb[0].mxu0  ;;  %v6215_v10 = vpop.f32.mrb[0].mxu1 }
 0x31a   : > { %v7884_v11 = vadd.f32 %v5928_v57, %v1176_v42  ;;  %v5930_v4 = vpop.f32.mrb[1].mxu0  ;;  %v7886_v31 = vadd.f32 %v6215_v10, %v1184_v46  ;;  %v6217_v9 = vpop.f32.mrb[1].mxu1  ;;  %v768_v46 = vld [vmem:[%s8496_s12 + $0xe78] sm:$0xff] }
 0x31b   : > { %v7885_v8 = vadd.f32 %v5930_v4, %v1180_v47  ;;  %v5932_v12 = vpop.f32.mrb[2].mxu0  ;;  %6356 = vmatpush1.bf16.msra.mxu0 %v7440_v49  ;;  %v7887_v15 = vadd.f32 %v6217_v9, %v1188_v48  ;;  %v6219_v16 = vpop.f32.mrb[2].mxu1  ;;  %6643 = vmatpush1.bf16.msra.mxu1 %v7442_v40  ;;  %v7464_v48 = vcombine.low %v755_v19, %v759_v20  ;;  %v779_v4 = vld [vmem:[%s8496_s12 + $0xed0] sm:$0xff] }
 0x31c   : > { %vm6796_vm3 = vcmp.gt.f32.partialorder %v7884_v11, 0.0  ;;  %v6804_v14 = vmul.f32 0.25, %v7884_v11  ;;  %v5933_v17 = vpop.f32.mrb[3].mxu0  ;;  %6357 = vmatprep.subr.bf16.mxu0 %v7449_v52  ;;  %vm6798_vm4 = vcmp.gt.f32.partialorder %v7886_v31, 0.0  ;;  %v6806_v7 = vmul.f32 0.25, %v7886_v31  ;;  %v6220_v23 = vpop.f32.mrb[3].mxu1  ;;  %6644 = vmatprep.subr.bf16.mxu1 %v7451_v63 }
 0x31d   : > { %vm6797_vm5 = vcmp.gt.f32.partialorder %v7885_v8, 0.0  ;;  %v6805_v22 = vmul.f32 0.25, %v7885_v8  ;;  %vm6799_vm6 = vcmp.gt.f32.partialorder %v7887_v15, 0.0  ;;  %v6807_v24 = vmul.f32 0.25, %v7887_v15  ;;  %v792_v16 = vld [vmem:[%s8496_s12 + $0xf38] sm:$0xff] }
 0x31e   : > { %v6812_v25 = vsel %vm6796_vm3, %v7884_v11, %v6804_v14  ;;  %v6814_v33 = vsel %vm6798_vm4, %v7886_v31, %v6806_v7  ;;  %v7473_v40 = vcombine.high %v763_v55, %v767_v18  ;;  %v7475_v52 = vcombine.high %v764_v44, %v768_v46  ;;  %v784_v31 = vld [vmem:[%s8496_s12 + $0xef8] sm:$0xff]  ;;  %v791_v14 = vld [vmem:[%s8496_s12 + $0xf30] sm:$0xff] }
 0x31f   : > { %v6864_v32 = vmul.f32 %v6827_v51, %v6812_v25  ;;  %v6813_v1 = vsel %vm6797_vm5, %v7885_v8, %v6805_v22  ;;  %6358 = vmatpush1.bf16.msra.mxu0 %v7448_v59  ;;  %v6866_v34 = vmul.f32 %v6835_v58, %v6814_v33  ;;  %v6815_v37 = vsel %vm6799_vm6, %v7887_v15, %v6807_v24  ;;  %v772_v59 = vld [vmem:[%s8496_s12 + $0xe98] sm:$0xff]  ;;  %v795_v7 = vld [vmem:[%s8496_s12 + $0xf50] sm:$0xff] }
 0x320   : > { %v6865_v36 = vmul.f32 %v6831_v5, %v6813_v1  ;;  %6645 = vmatpush1.bf16.msra.mxu1 %v7450_v62  ;;  %6359 = vmatprep.subr.bf16.mxu0 %v7457_v13  ;;  %v6867_v43 = vmul.f32 %v6839_v6, %v6815_v37  ;;  %v7466_v51 = vcombine.low %v756_v27, %v760_v28  ;;  %v776_v62 = vld [vmem:[%s8496_s12 + $0xeb8] sm:$0xff]  ;;  %v783_v5 = vld [vmem:[%s8496_s12 + $0xef0] sm:$0xff] }
 0x321   : > { %v6873_v38 = vsel %vm6872_vm2, %v6864_v32, 0.0  ;;  %6646 = vmatprep.subr.bf16.mxu1 %v7459_v3  ;;  %v6876_v49 = vsel %vm6872_vm2, %v6866_v34, 0.0  ;;  %v7472_v63 = vcombine.low %v763_v55, %v767_v18  ;;  %v7474_v0 = vcombine.low %v764_v44, %v768_v46  ;;  %v780_v6 = vld [vmem:[%s8496_s12 + $0xed8] sm:$0xff]  ;;  %v787_v13 = vld [vmem:[%s8496_s12 + $0xf10] sm:$0xff] }
 0x322   : > { %v6874_v42 = vsel %vm6872_vm2, %v6865_v36, 0.0  ;;  %v6878_v58 = vsel %vm6872_vm2, %v6867_v43, 0.0  ;;  %v7481_v11 = vcombine.high %v771_v54, %v775_v56  ;;  %v7483_v10 = vcombine.high %v772_v59, %v776_v62  ;;  %v788_v15 = vld [vmem:[%s8496_s12 + $0xf18] sm:$0xff]  ;;  %v799_v22 = vld [vmem:[%s8496_s12 + $0xf70] sm:$0xff] }
 0x323   : > { %v6875_v47 = vadd.f32 %v6874_v42, %v6873_v38  ;;  %6360 = vmatpush1.bf16.msra.mxu0 %v7456_v60  ;;  %v7480_v8 = vcombine.low %v771_v54, %v775_v56  ;;  %v7482_v9 = vcombine.low %v772_v59, %v776_v62  ;;  %v7489_v12 = vcombine.high %v779_v4, %v783_v5  ;;  %v796_v23 = vld [vmem:[%s8496_s12 + $0xf58] sm:$0xff]  ;;  %v803_v32 = vld [vmem:[%s8496_s12 + $0xf90] sm:$0xff] }
 0x324   : > { %6647 = vmatpush1.bf16.msra.mxu1 %v7458_v26  ;;  %6361 = vmatprep.subr.bf16.mxu0 %v7465_v35  ;;  %v7491_v60 = vcombine.high %v780_v6, %v784_v31  ;;  %v7488_v17 = vcombine.low %v779_v4, %v783_v5  ;;  %v7490_v3 = vcombine.low %v780_v6, %v784_v31  ;;  %v800_v25 = vld [vmem:[%s8496_s12 + $0xf78] sm:$0xff]  ;;  %v807_v33 = vld [vmem:[%s8496_s12 + $0xfb0] sm:$0xff] }
 0x325   : > { %6648 = vmatprep.subr.bf16.mxu1 %v7467_v41  ;;  %v6877_v57 = vadd.f32 %v6876_v49, %v6875_v47  ;;  %v7497_v19 = vcombine.high %v787_v13, %v791_v14  ;;  %v7499_v20 = vcombine.high %v788_v15, %v792_v16  ;;  %v7496_v24 = vcombine.low %v787_v13, %v791_v14  ;;  %v804_v1 = vld [vmem:[%s8496_s12 + $0xf98] sm:$0xff]  ;;  %v811_v41 = vld [vmem:[%s8496_s12 + $0xfd0] sm:$0xff] }
 0x326   : > { %v7498_v26 = vcombine.low %v788_v15, %v792_v16  ;;  %v7505_v27 = vcombine.high %v795_v7, %v799_v22  ;;  %v7507_v28 = vcombine.high %v796_v23, %v800_v25  ;;  %v808_v35 = vld [vmem:[%s8496_s12 + $0xfb8] sm:$0xff]  ;;  %v7504_v34 = vcombine.low %v795_v7, %v799_v22  ;;  %v815_v55 = vld [vmem:[%s8496_s12 + $0xff0] sm:$0xff] }
 0x327   : > { %6362 = vmatpush1.bf16.msra.mxu0 %v7464_v48  ;;  %v9353_v50 = vadd.f32 %v6878_v58, %v6877_v57  ;;  %v7506_v36 = vcombine.low %v796_v23, %v800_v25  ;;  %v7513_v37 = vcombine.high %v803_v32, %v807_v33  ;;  %v7515_v38 = vcombine.high %v804_v1, %v808_v35  ;;  %v812_v18 = vld [vmem:[%s8496_s12 + $0xfd8] sm:$0xff]  ;;  %v819_v48 = vld [vmem:[%s8496_s12 + $0x1010] sm:$0xff] }
 0x328   : > { %6649 = vmatpush1.bf16.msra.mxu1 %v7466_v51  ;;  %6363 = vmatprep.subr.bf16.mxu0 %v7473_v40  ;;  %v816_v42 = vld [vmem:[%s8496_s12 + $0xff8] sm:$0xff]  ;;  %v7512_v43 = vcombine.low %v803_v32, %v807_v33  ;;  %v7514_v44 = vcombine.low %v804_v1, %v808_v35  ;;  %v7521_v46 = vcombine.high %v811_v41, %v815_v55  ;;  %v823_v49 = vld [vmem:[%s8496_s12 + $0x1030] sm:$0xff] }
 0x329   : > { %6650 = vmatprep.subr.bf16.mxu1 %v7475_v52  ;;  %v7523_v47 = vcombine.high %v812_v18, %v816_v42  ;;  %v820_v51 = vld [vmem:[%s8496_s12 + $0x1018] sm:$0xff]  ;;  %v7520_v52 = vcombine.low %v811_v41, %v815_v55  ;;  %v7522_v54 = vcombine.low %v812_v18, %v816_v42  ;;  %v7529_v56 = vcombine.high %v819_v48, %v823_v49  ;;  %v827_v58 = vld [vmem:[%s8496_s12 + $0x1050] sm:$0xff] }
 0x32a   : > { %v824_v40 = vld [vmem:[%s8496_s12 + $0x1038] sm:$0xff]  ;;  %v831_v59 = vld [vmem:[%s8496_s12 + $0x1070] sm:$0xff] }
 0x32b   : > { %6364 = vmatpush1.bf16.msra.mxu0 %v7472_v63  ;;  %v7531_v57 = vcombine.high %v820_v51, %v824_v40  ;;  %v828_v62 = vld [vmem:[%s8496_s12 + $0x1058] sm:$0xff]  ;;  %v835_v5 = vld [vmem:[%s8496_s12 + $0x1090] sm:$0xff] }
 0x32c   : > { %6651 = vmatpush1.bf16.msra.mxu1 %v7474_v0  ;;  %6365 = vmatprep.subr.bf16.mxu0 %v7481_v11  ;;  %v832_v63 = vld [vmem:[%s8496_s12 + $0x1078] sm:$0xff]  ;;  %v7528_v0 = vcombine.low %v819_v48, %v823_v49  ;;  %v7530_v11 = vcombine.low %v820_v51, %v824_v40  ;;  %v839_v6 = vld [vmem:[%s8496_s12 + $0x10b0] sm:$0xff] }
 0x32d   : > { %6652 = vmatprep.subr.bf16.mxu1 %v7483_v10  ;;  %v7537_v10 = vcombine.high %v827_v58, %v831_v59  ;;  %v7539_v4 = vcombine.high %v828_v62, %v832_v63  ;;  %v836_v31 = vld [vmem:[%s8496_s12 + $0x1098] sm:$0xff]  ;;  %v843_v14 = vld [vmem:[%s8496_s12 + $0x10d0] sm:$0xff] }
 0x32e   : > { %v847_v15 = vld [vmem:[%s8496_s12 + $0x10f0] sm:$0xff]  ;;  %v844_v16 = vld [vmem:[%s8496_s12 + $0x10d8] sm:$0xff] }
 0x32f   : > { %6366 = vmatpush1.bf16.msra.mxu0 %v7480_v8  ;;  %v840_v8 = vld [vmem:[%s8496_s12 + $0x10b8] sm:$0xff]  ;;  %v851_v7 = vld [vmem:[%s8496_s12 + $0x1110] sm:$0xff] }
 0x330   : > { %6653 = vmatpush1.bf16.msra.mxu1 %v7482_v9  ;;  %6367 = vmatprep.subr.bf16.mxu0 %v7489_v12  ;;  %v7536_v9 = vcombine.low %v827_v58, %v831_v59  ;;  %v7538_v12 = vcombine.low %v828_v62, %v832_v63  ;;  %v7547_v13 = vcombine.high %v836_v31, %v840_v8  ;;  %v855_v22 = vld [vmem:[%s8496_s12 + $0x1130] sm:$0xff]  ;;  %v852_v23 = vld [vmem:[%s8496_s12 + $0x1118] sm:$0xff] }
 0x331   : > { %6654 = vmatprep.subr.bf16.mxu1 %v7491_v60  ;;  %v7545_v60 = vcombine.high %v835_v5, %v839_v6  ;;  %v856_v25 = vld [vmem:[%s8496_s12 + $0x1138] sm:$0xff]  ;;  %v863_v32 = vld [vmem:[%s8496_s12 + $0x1170] sm:$0xff]  ;;  %v7560_v35 = vcombine.low %v851_v7, %v855_v22 }
 0x332   : > { %v860_v33 = vld [vmem:[%s8496_s12 + $0x1158] sm:$0xff]  ;;  %v871_v41 = vld [vmem:[%s8496_s12 + $0x11b0] sm:$0xff] }
 0x333   : > { %6368 = vmatpush1.bf16.msra.mxu0 %v7488_v17  ;;  %v848_v17 = vld [vmem:[%s8496_s12 + $0x10f8] sm:$0xff]  ;;  %v879_v48 = vld [vmem:[%s8496_s12 + $0x11f0] sm:$0xff] }
 0x334   : > { %6655 = vmatpush1.bf16.msra.mxu1 %v7490_v3  ;;  %6369 = vmatprep.subr.bf16.mxu0 %v7497_v19  ;;  %v7546_v3 = vcombine.low %v836_v31, %v840_v8  ;;  %v7553_v19 = vcombine.high %v843_v14, %v847_v15  ;;  %v864_v1 = vld [vmem:[%s8496_s12 + $0x1178] sm:$0xff]  ;;  %v887_v58 = vld [vmem:[%s8496_s12 + $0x1230] sm:$0xff] }
 0x335   : > { %6656 = vmatprep.subr.bf16.mxu1 %v7499_v20  ;;  %v7555_v20 = vcombine.high %v844_v16, %v848_v17  ;;  %v868_v55 = vld [vmem:[%s8496_s12 + $0x1198] sm:$0xff] }
 0x336   : > { %v872_v18 = vld [vmem:[%s8496_s12 + $0x11b8] sm:$0xff] }
 0x337   : > { %6370 = vmatpush1.bf16.msra.mxu0 %v7496_v24  ;;  %v7552_v24 = vcombine.low %v843_v14, %v847_v15  ;;  %v876_v49 = vld [vmem:[%s8496_s12 + $0x11d8] sm:$0xff]  ;;  %v903_v14 = vld [vmem:[%s8496_s12 + $0x12b0] sm:$0xff] }
 0x338   : > { %6657 = vmatpush1.bf16.msra.mxu1 %v7498_v26  ;;  %6371 = vmatprep.subr.bf16.mxu0 %v7505_v27  ;;  %v7561_v26 = vcombine.high %v851_v7, %v855_v22  ;;  %v7563_v27 = vcombine.high %v852_v23, %v856_v25  ;;  %v880_v51 = vld [vmem:[%s8496_s12 + $0x11f8] sm:$0xff]  ;;  %v911_v7 = vld [vmem:[%s8496_s12 + $0x12f0] sm:$0xff] }
 0x339   : > { %6658 = vmatprep.subr.bf16.mxu1 %v7507_v28  ;;  %v859_v28 = vld [vmem:[%s8496_s12 + $0x1150] sm:$0xff]  ;;  %v884_v59 = vld [vmem:[%s8496_s12 + $0x1218] sm:$0xff] }
 0x33a   : > { %v7568_v42 = vcombine.low %v859_v28, %v863_v32  ;;  %v888_v62 = vld [vmem:[%s8496_s12 + $0x1238] sm:$0xff] }
 0x33b   : > { %6372 = vmatpush1.bf16.msra.mxu0 %v7504_v34  ;;  %v7562_v34 = vcombine.low %v852_v23, %v856_v25  ;;  %v896_v31 = vld [vmem:[%s8496_s12 + $0x1278] sm:$0xff] }
 0x33c   : > { %6659 = vmatpush1.bf16.msra.mxu1 %v7506_v36  ;;  %6373 = vmatprep.subr.bf16.mxu0 %v7513_v37  ;;  %v7569_v36 = vcombine.high %v859_v28, %v863_v32  ;;  %v7571_v37 = vcombine.high %v860_v33, %v864_v1  ;;  %v900_v15 = vld [vmem:[%s8496_s12 + $0x1298] sm:$0xff]  ;;  %v919_v28 = vld [vmem:[%s8496_s12 + $0x1330] sm:$0xff] }
 0x33d   : > { %6660 = vmatprep.subr.bf16.mxu1 %v7515_v38  ;;  %v867_v38 = vld [vmem:[%s8496_s12 + $0x1190] sm:$0xff]  ;;  %v908_v22 = vld [vmem:[%s8496_s12 + $0x12d8] sm:$0xff] }
 0x33e   : > { %v7576_v40 = vcombine.low %v867_v38, %v871_v41  ;;  %v912_v23 = vld [vmem:[%s8496_s12 + $0x12f8] sm:$0xff] }
 0x33f   : > { %6374 = vmatpush1.bf16.msra.mxu0 %v7512_v43  ;;  %v7570_v43 = vcombine.low %v860_v33, %v864_v1  ;;  %v916_v32 = vld [vmem:[%s8496_s12 + $0x1318] sm:$0xff] }
 0x340   : > { %6661 = vmatpush1.bf16.msra.mxu1 %v7514_v44  ;;  %6375 = vmatprep.subr.bf16.mxu0 %v7521_v46  ;;  %v7577_v44 = vcombine.high %v867_v38, %v871_v41  ;;  %v7579_v46 = vcombine.high %v868_v55, %v872_v18  ;;  %v920_v33 = vld [vmem:[%s8496_s12 + $0x1338] sm:$0xff]  ;;  %v927_v38 = vld [vmem:[%s8496_s12 + $0x1370] sm:$0xff] }
 0x341   : > { %6662 = vmatprep.subr.bf16.mxu1 %v7523_v47  ;;  %v875_v47 = vld [vmem:[%s8496_s12 + $0x11d0] sm:$0xff]  ;;  %v924_v41 = vld [vmem:[%s8496_s12 + $0x1358] sm:$0xff] }
 0x342   : > { %v7584_v63 = vcombine.low %v875_v47, %v879_v48 }
 0x343   : > { %6376 = vmatpush1.bf16.msra.mxu0 %v7520_v52  ;;  %v7578_v52 = vcombine.low %v868_v55, %v872_v18  ;;  %v928_v55 = vld [vmem:[%s8496_s12 + $0x1378] sm:$0xff] }
 0x344   : > { %6663 = vmatpush1.bf16.msra.mxu1 %v7522_v54  ;;  %6386 = vmatprep.subr.bf16.mxu0 %v7529_v56  ;;  %v7585_v54 = vcombine.high %v875_v47, %v879_v48  ;;  %v7587_v56 = vcombine.high %v876_v49, %v880_v51  ;;  %v935_v47 = vld [vmem:[%s8496_s12 + $0x13b0] sm:$0xff]  ;;  %v932_v48 = vld [vmem:[%s8496_s12 + $0x1398] sm:$0xff] }
 0x345   : > { %6673 = vmatprep.subr.bf16.mxu1 %v7531_v57  ;;  %v883_v57 = vld [vmem:[%s8496_s12 + $0x1210] sm:$0xff] }
 0x346   : > { %6378 = vmatmul.mubr.bf16.vlgmr.msra.gmra.mrb[4].mxu0 %v8846_v21  ;;  %v7592_v8 = vcombine.low %v883_v57, %v887_v58 }
 0x347   : > { %6387 = vmatpush1.bf16.msra.mxu0 %v7528_v0  ;;  %6665 = vmatmul.mubr.bf16.vlgmr.msra.gmra.mrb[4].mxu1 %v8846_v21  ;;  %v7544_v21 = vcombine.low %v835_v5, %v839_v6  ;;  %v7586_v0 = vcombine.low %v876_v49, %v880_v51  ;;  %v895_v5 = vld [vmem:[%s8496_s12 + $0x1270] sm:$0xff]  ;;  %v892_v6 = vld [vmem:[%s8496_s12 + $0x1258] sm:$0xff] }
 0x348   : > { %6674 = vmatpush1.bf16.msra.mxu1 %v7530_v11  ;;  %6388 = vmatprep.subr.bf16.mxu0 %v7537_v10  ;;  %v7593_v11 = vcombine.high %v883_v57, %v887_v58  ;;  %v7595_v10 = vcombine.high %v884_v59, %v888_v62  ;;  %v936_v49 = vld [vmem:[%s8496_s12 + $0x13b8] sm:$0xff]  ;;  %v943_v57 = vld [vmem:[%s8496_s12 + $0x13f0] sm:$0xff] }
 0x349   : > { %6675 = vmatprep.subr.bf16.mxu1 %v7539_v4  ;;  %6418 = vmatprep.mubr.bf16.mxu0 %v8853_v61  ;;  %v891_v4 = vld [vmem:[%s8496_s12 + $0x1250] sm:$0xff]  ;;  %v940_v58 = vld [vmem:[%s8496_s12 + $0x13d8] sm:$0xff] }
 0x34a   : > { %6705 = vmatprep.mubr.bf16.mxu1 %v8853_v61  ;;  %v7554_v61 = vcombine.low %v844_v16, %v848_v17  ;;  %v904_v16 = vld [vmem:[%s8496_s12 + $0x12b8] sm:$0xff]  ;;  %v7600_v17 = vcombine.low %v891_v4, %v895_v5 }
 0x34b   : > { %6389 = vmatpush1.bf16.msra.mxu0 %v7536_v9  ;;  %v7594_v9 = vcombine.low %v884_v59, %v888_v62  ;;  %v944_v59 = vld [vmem:[%s8496_s12 + $0x13f8] sm:$0xff] }
 0x34c   : > { %6676 = vmatpush1.bf16.msra.mxu1 %v7538_v12  ;;  %6390 = vmatprep.subr.bf16.mxu0 %v7545_v60  ;;  %v7601_v12 = vcombine.high %v891_v4, %v895_v5  ;;  %v7603_v60 = vcombine.high %v892_v6, %v896_v31  ;;  %v951_v4 = vld [vmem:[%s8496_s12 + $0x1430] sm:$0xff]  ;;  %v948_v5 = vld [vmem:[%s8496_s12 + $0x1418] sm:$0xff] }
 0x34d   : > { %6677 = vmatprep.subr.bf16.mxu1 %v7547_v13  ;;  %v899_v13 = vld [vmem:[%s8496_s12 + $0x1290] sm:$0xff] }
 0x34e   : > { %v7608_v25 = vcombine.low %v899_v13, %v903_v14 }
 0x34f   : > { %6391 = vmatpush1.bf16.msra.mxu0 %v7544_v21  ;;  %v7602_v21 = vcombine.low %v892_v6, %v896_v31  ;;  %v952_v6 = vld [vmem:[%s8496_s12 + $0x1438] sm:$0xff] }
 0x350   : > { %6678 = vmatpush1.bf16.msra.mxu1 %v7546_v3  ;;  %6392 = vmatprep.subr.bf16.mxu0 %v7553_v19  ;;  %v7609_v3 = vcombine.high %v899_v13, %v903_v14  ;;  %v7611_v19 = vcombine.high %v900_v15, %v904_v16  ;;  %v959_v13 = vld [vmem:[%s8496_s12 + $0x1470] sm:$0xff]  ;;  %v956_v14 = vld [vmem:[%s8496_s12 + $0x1458] sm:$0xff] }
 0x351   : > { %6679 = vmatprep.subr.bf16.mxu1 %v7555_v20  ;;  %v907_v20 = vld [vmem:[%s8496_s12 + $0x12d0] sm:$0xff] }
 0x352   : > { %v7616_v1 = vcombine.low %v907_v20, %v911_v7 }
 0x353   : > { %6393 = vmatpush1.bf16.msra.mxu0 %v7552_v24  ;;  %v7610_v24 = vcombine.low %v900_v15, %v904_v16  ;;  %v960_v15 = vld [vmem:[%s8496_s12 + $0x1478] sm:$0xff] }
 0x354   : > { %6680 = vmatpush1.bf16.msra.mxu1 %v7554_v61  ;;  %6394 = vmatprep.subr.bf16.mxu0 %v7561_v26  ;;  %v7617_v61 = vcombine.high %v907_v20, %v911_v7  ;;  %v7619_v26 = vcombine.high %v908_v22, %v912_v23  ;;  %v967_v20 = vld [vmem:[%s8496_s12 + $0x14b0] sm:$0xff]  ;;  %v964_v7 = vld [vmem:[%s8496_s12 + $0x1498] sm:$0xff] }
 0x355   : > { %6681 = vmatprep.subr.bf16.mxu1 %v7563_v27  ;;  %v915_v27 = vld [vmem:[%s8496_s12 + $0x1310] sm:$0xff] }
 0x356   : > { %v7624_v18 = vcombine.low %v915_v27, %v919_v28 }
 0x357   : > { %6395 = vmatpush1.bf16.msra.mxu0 %v7560_v35  ;;  %v7618_v35 = vcombine.low %v908_v22, %v912_v23  ;;  %v968_v22 = vld [vmem:[%s8496_s12 + $0x14b8] sm:$0xff] }
 0x358   : > { %6682 = vmatpush1.bf16.msra.mxu1 %v7562_v34  ;;  %6396 = vmatprep.subr.bf16.mxu0 %v7569_v36  ;;  %v7625_v34 = vcombine.high %v915_v27, %v919_v28  ;;  %v7627_v36 = vcombine.high %v916_v32, %v920_v33  ;;  %v975_v27 = vld [vmem:[%s8496_s12 + $0x14f0] sm:$0xff]  ;;  %v972_v28 = vld [vmem:[%s8496_s12 + $0x14d8] sm:$0xff] }
 0x359   : > { %6683 = vmatprep.subr.bf16.mxu1 %v7571_v37  ;;  %v923_v37 = vld [vmem:[%s8496_s12 + $0x1350] sm:$0xff] }
 0x35a   : > { %v7632_v51 = vcombine.low %v923_v37, %v927_v38 }
 0x35b   : > { %6397 = vmatpush1.bf16.msra.mxu0 %v7568_v42  ;;  %v7626_v42 = vcombine.low %v916_v32, %v920_v33  ;;  %v976_v32 = vld [vmem:[%s8496_s12 + $0x14f8] sm:$0xff]  ;;  %v7674_v33 = vcombine.low %v964_v7, %v968_v22 }
 0x35c   : > { %6684 = vmatpush1.bf16.msra.mxu1 %v7570_v43  ;;  %6398 = vmatprep.subr.bf16.mxu0 %v7577_v44  ;;  %v7633_v43 = vcombine.high %v923_v37, %v927_v38  ;;  %v7635_v44 = vcombine.high %v924_v41, %v928_v55  ;;  %v980_v37 = vld [vmem:[%s8496_s12 + $0x1518] sm:$0xff] }
 0x35d   : > { %6685 = vmatprep.subr.bf16.mxu1 %v7579_v46  ;;  %v931_v46 = vld [vmem:[%s8496_s12 + $0x1390] sm:$0xff]  ;;  %v984_v38 = vld [vmem:[%s8496_s12 + $0x1538] sm:$0xff] }
 0x35e   : > { %v7640_v62 = vcombine.low %v931_v46, %v935_v47 }
 0x35f   : > { %6399 = vmatpush1.bf16.msra.mxu0 %v7576_v40  ;;  %v7634_v40 = vcombine.low %v924_v41, %v928_v55 }
 0x360   : > { %6686 = vmatpush1.bf16.msra.mxu1 %v7578_v52  ;;  %6400 = vmatprep.subr.bf16.mxu0 %v7585_v54  ;;  %v7641_v52 = vcombine.high %v931_v46, %v935_v47  ;;  %v7643_v54 = vcombine.high %v932_v48, %v936_v49  ;;  %v992_v46 = vld [vmem:[%s8496_s12 + $0x1578] sm:$0xff] }
 0x361   : > { %6687 = vmatprep.subr.bf16.mxu1 %v7587_v56  ;;  %v939_v56 = vld [vmem:[%s8496_s12 + $0x13d0] sm:$0xff] }
 0x362   : > { %v7648_v31 = vcombine.low %v939_v56, %v943_v57 }
 0x363   : > { %6401 = vmatpush1.bf16.msra.mxu0 %v7584_v63  ;;  %v7642_v63 = vcombine.low %v932_v48, %v936_v49  ;;  %v7690_v48 = vcombine.low %v980_v37, %v984_v38 }
 0x364   : > { %6688 = vmatpush1.bf16.msra.mxu1 %v7586_v0  ;;  %6402 = vmatprep.subr.bf16.mxu0 %v7593_v11  ;;  %v7649_v0 = vcombine.high %v939_v56, %v943_v57  ;;  %v7651_v11 = vcombine.high %v940_v58, %v944_v59  ;;  %v1000_v56 = vld [vmem:[%s8496_s12 + $0x15b8] sm:$0xff] }
 0x365   : > { %6689 = vmatprep.subr.bf16.mxu1 %v7595_v10  ;;  %v947_v10 = vld [vmem:[%s8496_s12 + $0x1410] sm:$0xff] }
 0x366   : > { %v7656_v16 = vcombine.low %v947_v10, %v951_v4 }
 0x367   : > { %6403 = vmatpush1.bf16.msra.mxu0 %v7592_v8  ;;  %v7650_v8 = vcombine.low %v940_v58, %v944_v59 }
 0x368   : > { %6690 = vmatpush1.bf16.msra.mxu1 %v7594_v9  ;;  %6404 = vmatprep.subr.bf16.mxu0 %v7601_v12  ;;  %v7657_v9 = vcombine.high %v947_v10, %v951_v4  ;;  %v7659_v12 = vcombine.high %v948_v5, %v952_v6  ;;  %v1008_v10 = vld [vmem:[%s8496_s12 + $0x15f8] sm:$0xff] }
 0x369   : > { %6691 = vmatprep.subr.bf16.mxu1 %v7603_v60  ;;  %v955_v60 = vld [vmem:[%s8496_s12 + $0x1450] sm:$0xff] }
 0x36a   : > { %v7664_v23 = vcombine.low %v955_v60, %v959_v13 }
 0x36b   : > { %6405 = vmatpush1.bf16.msra.mxu0 %v7600_v17  ;;  %v7658_v17 = vcombine.low %v948_v5, %v952_v6 }
 0x36c   : > { %6692 = vmatpush1.bf16.msra.mxu1 %v7602_v21  ;;  %6406 = vmatprep.subr.bf16.mxu0 %v7609_v3  ;;  %v7665_v21 = vcombine.high %v955_v60, %v959_v13  ;;  %v7667_v3 = vcombine.high %v956_v14, %v960_v15  ;;  %v1016_v60 = vld [vmem:[%s8496_s12 + $0x1638] sm:$0xff] }
 0x36d   : > { %6693 = vmatprep.subr.bf16.mxu1 %v7611_v19  ;;  %v963_v19 = vld [vmem:[%s8496_s12 + $0x1490] sm:$0xff] }
 0x36f   : > { %6407 = vmatpush1.bf16.msra.mxu0 %v7608_v25  ;;  %v7666_v25 = vcombine.low %v956_v14, %v960_v15 }
 0x370   : > { %6694 = vmatpush1.bf16.msra.mxu1 %v7610_v24  ;;  %6408 = vmatprep.subr.bf16.mxu0 %v7617_v61  ;;  %v7673_v24 = vcombine.high %v963_v19, %v967_v20  ;;  %v7675_v61 = vcombine.high %v964_v7, %v968_v22 }
 0x371   : > { %6695 = vmatprep.subr.bf16.mxu1 %v7619_v26  ;;  %v971_v26 = vld [vmem:[%s8496_s12 + $0x14d0] sm:$0xff] }
 0x372   : > { %v7680_v41 = vcombine.low %v971_v26, %v975_v27 }
 0x373   : > { %6409 = vmatpush1.bf16.msra.mxu0 %v7616_v1  ;;  %v7681_v1 = vcombine.high %v971_v26, %v975_v27  ;;  %v1032_v26 = vld [vmem:[%s8496_s12 + $0x16b8] sm:$0xff] }
 0x374   : > { %6696 = vmatpush1.bf16.msra.mxu1 %v7618_v35  ;;  %6410 = vmatprep.subr.bf16.mxu0 %v7625_v34  ;;  %v7683_v35 = vcombine.high %v972_v28, %v976_v32  ;;  %v979_v34 = vld [vmem:[%s8496_s12 + $0x1510] sm:$0xff] }
 0x375   : > { %6697 = vmatprep.subr.bf16.mxu1 %v7627_v36  ;;  %v983_v36 = vld [vmem:[%s8496_s12 + $0x1530] sm:$0xff] }
 0x376   : > { %v7689_v55 = vcombine.high %v979_v34, %v983_v36  ;;  %v7688_v47 = vcombine.low %v979_v34, %v983_v36  ;;  %v1040_v34 = vld [vmem:[%s8496_s12 + $0x16f8] sm:$0xff] }
 0x377   : > { %6411 = vmatpush1.bf16.msra.mxu0 %v7624_v18  ;;  %v7691_v18 = vcombine.high %v980_v37, %v984_v38 }
 0x378   : > { %6698 = vmatpush1.bf16.msra.mxu1 %v7626_v42  ;;  %6412 = vmatprep.subr.bf16.mxu0 %v7633_v43  ;;  %v987_v42 = vld [vmem:[%s8496_s12 + $0x1550] sm:$0xff] }
 0x379   : > { %6699 = vmatprep.subr.bf16.mxu1 %v7635_v44  ;;  %v991_v43 = vld [vmem:[%s8496_s12 + $0x1570] sm:$0xff]  ;;  %v988_v44 = vld [vmem:[%s8496_s12 + $0x1558] sm:$0xff] }
 0x37a   : > { %v7697_v49 = vcombine.high %v987_v42, %v991_v43  ;;  %v7696_v57 = vcombine.low %v987_v42, %v991_v43  ;;  %v7698_v58 = vcombine.low %v988_v44, %v992_v46  ;;  %v1048_v42 = vld [vmem:[%s8496_s12 + $0x1738] sm:$0xff] }
 0x37b   : > { %6413 = vmatpush1.bf16.msra.mxu0 %v7632_v51  ;;  %v7699_v51 = vcombine.high %v988_v44, %v992_v46 }
 0x37c   : > { %6700 = vmatpush1.bf16.msra.mxu1 %v7634_v40  ;;  %6414 = vmatprep.subr.bf16.mxu0 %v7641_v52  ;;  %v995_v40 = vld [vmem:[%s8496_s12 + $0x1590] sm:$0xff] }
 0x37d   : > { %6701 = vmatprep.subr.bf16.mxu1 %v7643_v54  ;;  %v999_v52 = vld [vmem:[%s8496_s12 + $0x15b0] sm:$0xff]  ;;  %v996_v54 = vld [vmem:[%s8496_s12 + $0x1598] sm:$0xff] }
 0x37e   : > { %v7705_v59 = vcombine.high %v995_v40, %v999_v52  ;;  %v7704_v4 = vcombine.low %v995_v40, %v999_v52  ;;  %v7706_v5 = vcombine.low %v996_v54, %v1000_v56  ;;  %v1056_v40 = vld [vmem:[%s8496_s12 + $0x1778] sm:$0xff] }
 0x37f   : > { %6415 = vmatpush1.bf16.msra.mxu0 %v7640_v62  ;;  %v7707_v62 = vcombine.high %v996_v54, %v1000_v56 }
 0x380   : > { %6702 = vmatpush1.bf16.msra.mxu1 %v7642_v63  ;;  %6416 = vmatprep.subr.bf16.mxu0 %v7649_v0  ;;  %v1003_v63 = vld [vmem:[%s8496_s12 + $0x15d0] sm:$0xff] }
 0x381   : > { %6703 = vmatprep.subr.bf16.mxu1 %v7651_v11  ;;  %v1007_v0 = vld [vmem:[%s8496_s12 + $0x15f0] sm:$0xff]  ;;  %v1004_v11 = vld [vmem:[%s8496_s12 + $0x15d8] sm:$0xff] }
 0x382   : > { %v7713_v6 = vcombine.high %v1003_v63, %v1007_v0  ;;  %v7712_v13 = vcombine.low %v1003_v63, %v1007_v0  ;;  %v7714_v14 = vcombine.low %v1004_v11, %v1008_v10  ;;  %v1064_v63 = vld [vmem:[%s8496_s12 + $0x17b8] sm:$0xff] }
 0x383   : > { %6417 = vmatpush1.bf16.msra.mxu0 %v7648_v31  ;;  %v7715_v31 = vcombine.high %v1004_v11, %v1008_v10 }
 0x384   : > { %6704 = vmatpush1.bf16.msra.mxu1 %v7650_v8  ;;  %6427 = vmatprep.subr.bf16.mxu0 %v7657_v9  ;;  %v1011_v8 = vld [vmem:[%s8496_s12 + $0x1610] sm:$0xff] }
 0x385   : > { %6714 = vmatprep.subr.bf16.mxu1 %v7659_v12  ;;  %v1015_v9 = vld [vmem:[%s8496_s12 + $0x1630] sm:$0xff]  ;;  %v1012_v12 = vld [vmem:[%s8496_s12 + $0x1618] sm:$0xff] }
 0x386   : > { %6419 = vmatmul.mubr.bf16.vlgmr.msra.gmra.mrb[4].mxu0 %v8921_v53  ;;  %v7721_v15 = vcombine.high %v1011_v8, %v1015_v9  ;;  %v7722_v7 = vcombine.low %v1012_v12, %v1016_v60 }
 0x387   : > { %6428 = vmatpush1.bf16.msra.mxu0 %v7656_v16  ;;  %6706 = vmatmul.mubr.bf16.vlgmr.msra.gmra.mrb[4].mxu1 %v8921_v53  ;;  %v7672_v53 = vcombine.low %v963_v19, %v967_v20  ;;  %v7723_v16 = vcombine.high %v1012_v12, %v1016_v60  ;;  %v1024_v19 = vld [vmem:[%s8496_s12 + $0x1678] sm:$0xff]  ;;  %v7720_v20 = vcombine.low %v1011_v8, %v1015_v9 }
 0x388   : > { %6715 = vmatpush1.bf16.msra.mxu1 %v7658_v17  ;;  %6429 = vmatprep.subr.bf16.mxu0 %v7665_v21  ;;  %v1019_v17 = vld [vmem:[%s8496_s12 + $0x1650] sm:$0xff]  ;;  %v1072_v8 = vld [vmem:[%s8496_s12 + $0x17f8] sm:$0xff] }
 0x389   : > { %6716 = vmatprep.subr.bf16.mxu1 %v7667_v3  ;;  %6459 = vmatprep.mubr.bf16.mxu0 %v8929_v2  ;;  %v1023_v21 = vld [vmem:[%s8496_s12 + $0x1670] sm:$0xff]  ;;  %v1020_v3 = vld [vmem:[%s8496_s12 + $0x1658] sm:$0xff] }
 0x38a   : > { %6746 = vmatprep.mubr.bf16.mxu1 %v8929_v2  ;;  %v7682_v2 = vcombine.low %v972_v28, %v976_v32  ;;  %v7729_v22 = vcombine.high %v1019_v17, %v1023_v21  ;;  %v7728_v27 = vcombine.low %v1019_v17, %v1023_v21  ;;  %v7730_v28 = vcombine.low %v1020_v3, %v1024_v19  ;;  %v1080_v17 = vld [vmem:[%s8496_s12 + $0x1838] sm:$0xff] }
 0x38b   : > { %6430 = vmatpush1.bf16.msra.mxu0 %v7664_v23  ;;  %v7731_v23 = vcombine.high %v1020_v3, %v1024_v19 }
 0x38c   : > { %6717 = vmatpush1.bf16.msra.mxu1 %v7666_v25  ;;  %6431 = vmatprep.subr.bf16.mxu0 %v7673_v24  ;;  %v1027_v25 = vld [vmem:[%s8496_s12 + $0x1690] sm:$0xff] }
 0x38d   : > { %6718 = vmatprep.subr.bf16.mxu1 %v7675_v61  ;;  %v1031_v24 = vld [vmem:[%s8496_s12 + $0x16b0] sm:$0xff]  ;;  %v1028_v61 = vld [vmem:[%s8496_s12 + $0x1698] sm:$0xff] }
 0x38e   : > { %v7737_v32 = vcombine.high %v1027_v25, %v1031_v24  ;;  %v7736_v36 = vcombine.low %v1027_v25, %v1031_v24  ;;  %v7738_v37 = vcombine.low %v1028_v61, %v1032_v26  ;;  %v1088_v25 = vld [vmem:[%s8496_s12 + $0x1878] sm:$0xff] }
 0x38f   : > { %6432 = vmatpush1.bf16.msra.mxu0 %v7672_v53  ;;  %v7739_v53 = vcombine.high %v1028_v61, %v1032_v26 }
 0x390   : > { %6719 = vmatpush1.bf16.msra.mxu1 %v7674_v33  ;;  %6433 = vmatprep.subr.bf16.mxu0 %v7681_v1  ;;  %v1035_v33 = vld [vmem:[%s8496_s12 + $0x16d0] sm:$0xff] }
 0x391   : > { %6720 = vmatprep.subr.bf16.mxu1 %v7683_v35  ;;  %v1039_v1 = vld [vmem:[%s8496_s12 + $0x16f0] sm:$0xff]  ;;  %v1036_v35 = vld [vmem:[%s8496_s12 + $0x16d8] sm:$0xff] }
 0x392   : > { %v7745_v38 = vcombine.high %v1035_v33, %v1039_v1  ;;  %v7744_v43 = vcombine.low %v1035_v33, %v1039_v1  ;;  %v7746_v44 = vcombine.low %v1036_v35, %v1040_v34  ;;  %v1096_v33 = vld [vmem:[%s8496_s12 + $0x18b8] sm:$0xff] }
 0x393   : > { %6434 = vmatpush1.bf16.msra.mxu0 %v7680_v41  ;;  %v7747_v41 = vcombine.high %v1036_v35, %v1040_v34 }
 0x394   : > { %6721 = vmatpush1.bf16.msra.mxu1 %v7682_v2  ;;  %6435 = vmatprep.subr.bf16.mxu0 %v7689_v55  ;;  %v1043_v2 = vld [vmem:[%s8496_s12 + $0x1710] sm:$0xff] }
 0x395   : > { %6722 = vmatprep.subr.bf16.mxu1 %v7691_v18  ;;  %v1047_v55 = vld [vmem:[%s8496_s12 + $0x1730] sm:$0xff]  ;;  %v1044_v18 = vld [vmem:[%s8496_s12 + $0x1718] sm:$0xff] }
 0x396   : > { %v7753_v46 = vcombine.high %v1043_v2, %v1047_v55  ;;  %v7752_v52 = vcombine.low %v1043_v2, %v1047_v55  ;;  %v7754_v54 = vcombine.low %v1044_v18, %v1048_v42  ;;  %v1104_v2 = vld [vmem:[%s8496_s12 + $0x18f8] sm:$0xff] }
 0x397   : > { %6436 = vmatpush1.bf16.msra.mxu0 %v7688_v47  ;;  %v7755_v47 = vcombine.high %v1044_v18, %v1048_v42 }
 0x398   : > { %6723 = vmatpush1.bf16.msra.mxu1 %v7690_v48  ;;  %6437 = vmatprep.subr.bf16.mxu0 %v7697_v49  ;;  %v1051_v48 = vld [vmem:[%s8496_s12 + $0x1750] sm:$0xff] }
 0x399   : > { %6724 = vmatprep.subr.bf16.mxu1 %v7699_v51  ;;  %v1055_v49 = vld [vmem:[%s8496_s12 + $0x1770] sm:$0xff]  ;;  %v1052_v51 = vld [vmem:[%s8496_s12 + $0x1758] sm:$0xff] }
 0x39a   : > { %v7761_v56 = vcombine.high %v1051_v48, %v1055_v49  ;;  %v7760_v0 = vcombine.low %v1051_v48, %v1055_v49  ;;  %v7762_v11 = vcombine.low %v1052_v51, %v1056_v40 }
 0x39b   : > { %6438 = vmatpush1.bf16.msra.mxu0 %v7696_v57  ;;  %v7763_v57 = vcombine.high %v1052_v51, %v1056_v40  ;;  %v1115_v40 = vld [vmem:[%s8496_s12 + $0x1950] sm:$0xff] }
 0x39c   : > { %6725 = vmatpush1.bf16.msra.mxu1 %v7698_v58  ;;  %6439 = vmatprep.subr.bf16.mxu0 %v7705_v59  ;;  %v1059_v58 = vld [vmem:[%s8496_s12 + $0x1790] sm:$0xff] }
 0x39d   : > { %6726 = vmatprep.subr.bf16.mxu1 %v7707_v62  ;;  %v1063_v59 = vld [vmem:[%s8496_s12 + $0x17b0] sm:$0xff]  ;;  %v1060_v62 = vld [vmem:[%s8496_s12 + $0x1798] sm:$0xff] }
 0x39e   : > { %v7769_v10 = vcombine.high %v1059_v58, %v1063_v59  ;;  %v7768_v9 = vcombine.low %v1059_v58, %v1063_v59  ;;  %v7770_v12 = vcombine.low %v1060_v62, %v1064_v63 }
 0x39f   : > { %6440 = vmatpush1.bf16.msra.mxu0 %v7704_v4  ;;  %v7771_v4 = vcombine.high %v1060_v62, %v1064_v63  ;;  %v1123_v63 = vld [vmem:[%s8496_s12 + $0x1990] sm:$0xff] }
 0x3a0   : > { %6727 = vmatpush1.bf16.msra.mxu1 %v7706_v5  ;;  %6441 = vmatprep.subr.bf16.mxu0 %v7713_v6  ;;  %v1067_v5 = vld [vmem:[%s8496_s12 + $0x17d0] sm:$0xff] }
 0x3a1   : > { %6728 = vmatprep.subr.bf16.mxu1 %v7715_v31  ;;  %v1071_v6 = vld [vmem:[%s8496_s12 + $0x17f0] sm:$0xff]  ;;  %v1068_v31 = vld [vmem:[%s8496_s12 + $0x17d8] sm:$0xff] }
 0x3a2   : > { %v7777_v60 = vcombine.high %v1067_v5, %v1071_v6  ;;  %v7776_v21 = vcombine.low %v1067_v5, %v1071_v6  ;;  %v7778_v3 = vcombine.low %v1068_v31, %v1072_v8 }
 0x3a3   : > { %6442 = vmatpush1.bf16.msra.mxu0 %v7712_v13  ;;  %v7779_v13 = vcombine.high %v1068_v31, %v1072_v8  ;;  %v1131_v8 = vld [vmem:[%s8496_s12 + $0x19d0] sm:$0xff] }
 0x3a4   : > { %6729 = vmatpush1.bf16.msra.mxu1 %v7714_v14  ;;  %6443 = vmatprep.subr.bf16.mxu0 %v7721_v15  ;;  %v1075_v14 = vld [vmem:[%s8496_s12 + $0x1810] sm:$0xff] }
 0x3a5   : > { %6730 = vmatprep.subr.bf16.mxu1 %v7723_v16  ;;  %v1079_v15 = vld [vmem:[%s8496_s12 + $0x1830] sm:$0xff]  ;;  %v1076_v16 = vld [vmem:[%s8496_s12 + $0x1818] sm:$0xff] }
 0x3a6   : > { %v7785_v19 = vcombine.high %v1075_v14, %v1079_v15  ;;  %v7784_v24 = vcombine.low %v1075_v14, %v1079_v15  ;;  %v7786_v61 = vcombine.low %v1076_v16, %v1080_v17 }
 0x3a7   : > { %6444 = vmatpush1.bf16.msra.mxu0 %v7720_v20  ;;  %v7787_v20 = vcombine.high %v1076_v16, %v1080_v17  ;;  %v1139_v17 = vld [vmem:[%s8496_s12 + $0x1a10] sm:$0xff] }
 0x3a8   : > { %6731 = vmatpush1.bf16.msra.mxu1 %v7722_v7  ;;  %6445 = vmatprep.subr.bf16.mxu0 %v7729_v22  ;;  %v1083_v7 = vld [vmem:[%s8496_s12 + $0x1850] sm:$0xff] }
 0x3a9   : > { %6732 = vmatprep.subr.bf16.mxu1 %v7731_v23  ;;  %v1087_v22 = vld [vmem:[%s8496_s12 + $0x1870] sm:$0xff]  ;;  %v1084_v23 = vld [vmem:[%s8496_s12 + $0x1858] sm:$0xff] }
 0x3aa   : > { %v7793_v26 = vcombine.high %v1083_v7, %v1087_v22  ;;  %v7792_v1 = vcombine.low %v1083_v7, %v1087_v22  ;;  %v7794_v35 = vcombine.low %v1084_v23, %v1088_v25 }
 0x3ab   : > { %6446 = vmatpush1.bf16.msra.mxu0 %v7728_v27  ;;  %v7795_v27 = vcombine.high %v1084_v23, %v1088_v25  ;;  %v1147_v25 = vld [vmem:[%s8496_s12 + $0x1a50] sm:$0xff] }
 0x3ac   : > { %6733 = vmatpush1.bf16.msra.mxu1 %v7730_v28  ;;  %6447 = vmatprep.subr.bf16.mxu0 %v7737_v32  ;;  %v1091_v28 = vld [vmem:[%s8496_s12 + $0x1890] sm:$0xff] }
 0x3ad   : > { %6734 = vmatprep.subr.bf16.mxu1 %v7739_v53  ;;  %v1095_v32 = vld [vmem:[%s8496_s12 + $0x18b0] sm:$0xff]  ;;  %v1092_v53 = vld [vmem:[%s8496_s12 + $0x1898] sm:$0xff] }
 0x3ae   : > { %v7801_v34 = vcombine.high %v1091_v28, %v1095_v32  ;;  %v7802_v55 = vcombine.low %v1092_v53, %v1096_v33 }
 0x3af   : > { %6448 = vmatpush1.bf16.msra.mxu0 %v7736_v36  ;;  %v7803_v36 = vcombine.high %v1092_v53, %v1096_v33  ;;  %v1155_v33 = vld [vmem:[%s8496_s12 + $0x1a90] sm:$0xff] }
 0x3b0   : > { %6735 = vmatpush1.bf16.msra.mxu1 %v7738_v37  ;;  %6449 = vmatprep.subr.bf16.mxu0 %v7745_v38  ;;  %v1099_v37 = vld [vmem:[%s8496_s12 + $0x18d0] sm:$0xff] }
 0x3b1   : > { %6736 = vmatprep.subr.bf16.mxu1 %v7747_v41  ;;  %v1103_v38 = vld [vmem:[%s8496_s12 + $0x18f0] sm:$0xff]  ;;  %v1100_v41 = vld [vmem:[%s8496_s12 + $0x18d8] sm:$0xff] }
 0x3b2   : > { %v7809_v18 = vcombine.high %v1099_v37, %v1103_v38  ;;  %v7811_v42 = vcombine.high %v1100_v41, %v1104_v2  ;;  %v7808_v48 = vcombine.low %v1099_v37, %v1103_v38 }
 0x3b3   : > { %6450 = vmatpush1.bf16.msra.mxu0 %v7744_v43  ;;  %v1107_v43 = vld [vmem:[%s8496_s12 + $0x1910] sm:$0xff] }
 0x3b4   : > { %6737 = vmatpush1.bf16.msra.mxu1 %v7746_v44  ;;  %6451 = vmatprep.subr.bf16.mxu0 %v7753_v46  ;;  %v1111_v44 = vld [vmem:[%s8496_s12 + $0x1930] sm:$0xff]  ;;  %v1108_v46 = vld [vmem:[%s8496_s12 + $0x1918] sm:$0xff] }
 0x3b5   : > { %6738 = vmatprep.subr.bf16.mxu1 %v7755_v47  ;;  %v1112_v47 = vld [vmem:[%s8496_s12 + $0x1938] sm:$0xff]  ;;  %v7817_v49 = vcombine.high %v1107_v43, %v1111_v44 }
 0x3b6   : > { %v7819_v51 = vcombine.high %v1108_v46, %v1112_v47  ;;  %v7818_v58 = vcombine.low %v1108_v46, %v1112_v47 }
 0x3b7   : > { %6452 = vmatpush1.bf16.msra.mxu0 %v7752_v52  ;;  %v1119_v52 = vld [vmem:[%s8496_s12 + $0x1970] sm:$0xff] }
 0x3b8   : > { %6739 = vmatpush1.bf16.msra.mxu1 %v7754_v54  ;;  %6453 = vmatprep.subr.bf16.mxu0 %v7761_v56  ;;  %v1116_v54 = vld [vmem:[%s8496_s12 + $0x1958] sm:$0xff]  ;;  %v7825_v59 = vcombine.high %v1115_v40, %v1119_v52 }
 0x3b9   : > { %6740 = vmatprep.subr.bf16.mxu1 %v7763_v57  ;;  %v1120_v56 = vld [vmem:[%s8496_s12 + $0x1978] sm:$0xff]  ;;  %v7816_v57 = vcombine.low %v1107_v43, %v1111_v44 }
 0x3ba   : > { %v7827_v62 = vcombine.high %v1116_v54, %v1120_v56  ;;  %v7826_v5 = vcombine.low %v1116_v54, %v1120_v56 }
 0x3bb   : > { %6454 = vmatpush1.bf16.msra.mxu0 %v7760_v0  ;;  %v1127_v0 = vld [vmem:[%s8496_s12 + $0x19b0] sm:$0xff] }
 0x3bc   : > { %6741 = vmatpush1.bf16.msra.mxu1 %v7762_v11  ;;  %6455 = vmatprep.subr.bf16.mxu0 %v7769_v10  ;;  %v1124_v11 = vld [vmem:[%s8496_s12 + $0x1998] sm:$0xff]  ;;  %v7833_v6 = vcombine.high %v1123_v63, %v1127_v0 }
 0x3bd   : > { %6742 = vmatprep.subr.bf16.mxu1 %v7771_v4  ;;  %v1128_v10 = vld [vmem:[%s8496_s12 + $0x19b8] sm:$0xff]  ;;  %v7824_v4 = vcombine.low %v1115_v40, %v1119_v52  ;;  %v1203_v40 = vsub.s32 7, %v8536_v45 }
 0x3be   : > { %v7835_v31 = vcombine.high %v1124_v11, %v1128_v10  ;;  %v7834_v14 = vcombine.low %v1124_v11, %v1128_v10  ;;  %v8085_v52 = vld [vmem:[%s9295_s8] sm:$0xff] }
 0x3bf   : > { %6456 = vmatpush1.bf16.msra.mxu0 %v7768_v9  ;;  %v1135_v9 = vld [vmem:[%s8496_s12 + $0x19f0] sm:$0xff] }
 0x3c0   : > { %6743 = vmatpush1.bf16.msra.mxu1 %v7770_v12  ;;  %6457 = vmatprep.subr.bf16.mxu0 %v7777_v60  ;;  %v1132_v12 = vld [vmem:[%s8496_s12 + $0x19d8] sm:$0xff]  ;;  %v7841_v15 = vcombine.high %v1131_v8, %v1135_v9 }
 0x3c1   : > { %6744 = vmatprep.subr.bf16.mxu1 %v7779_v13  ;;  %v1136_v60 = vld [vmem:[%s8496_s12 + $0x19f8] sm:$0xff]  ;;  %v7832_v13 = vcombine.low %v1123_v63, %v1127_v0 }
 0x3c2   : > { %v7843_v16 = vcombine.high %v1132_v12, %v1136_v60  ;;  %v7842_v7 = vcombine.low %v1132_v12, %v1136_v60  ;;  %v8086_v11 = vld [vmem:[%s9301_s16] sm:$0xff] }
 0x3c3   : > { %6458 = vmatpush1.bf16.msra.mxu0 %v7776_v21  ;;  %v1143_v21 = vld [vmem:[%s8496_s12 + $0x1a30] sm:$0xff] }
 0x3c4   : > { %6745 = vmatpush1.bf16.msra.mxu1 %v7778_v3  ;;  %6468 = vmatprep.subr.bf16.mxu0 %v7785_v19  ;;  %v1140_v3 = vld [vmem:[%s8496_s12 + $0x1a18] sm:$0xff]  ;;  %v7849_v22 = vcombine.high %v1139_v17, %v1143_v21 }
 0x3c5   : > { %6755 = vmatprep.subr.bf16.mxu1 %v7787_v20  ;;  %v1144_v19 = vld [vmem:[%s8496_s12 + $0x1a38] sm:$0xff]  ;;  %v7840_v20 = vcombine.low %v1131_v8, %v1135_v9 }
 0x3c6   : > { %6460 = vmatmul.mubr.bf16.vlgmr.msra.gmra.mrb[4].mxu0 %v9004_v29  ;;  %v7851_v23 = vcombine.high %v1140_v3, %v1144_v19 }
 0x3c7   : > { %6469 = vmatpush1.bf16.msra.mxu0 %v7784_v24  ;;  %6747 = vmatmul.mubr.bf16.vlgmr.msra.gmra.mrb[4].mxu1 %v9004_v29  ;;  %v7800_v29 = vcombine.low %v1091_v28, %v1095_v32  ;;  %v1151_v24 = vld [vmem:[%s8496_s12 + $0x1a70] sm:$0xff]  ;;  %v7850_v28 = vcombine.low %v1140_v3, %v1144_v19 }
 0x3c8   : > { %6756 = vmatpush1.bf16.msra.mxu1 %v7786_v61  ;;  %6470 = vmatprep.subr.bf16.mxu0 %v7793_v26  ;;  %v1148_v61 = vld [vmem:[%s8496_s12 + $0x1a58] sm:$0xff]  ;;  %v7857_v32 = vcombine.high %v1147_v25, %v1151_v24 }
 0x3c9   : > { %6757 = vmatprep.subr.bf16.mxu1 %v7795_v27  ;;  %7878 = vmatprep.mubr.msk.bf16.mxu0 %vm5644_vm1, %v9011_v39  ;;  %v1152_v26 = vld [vmem:[%s8496_s12 + $0x1a78] sm:$0xff]  ;;  %v7848_v27 = vcombine.low %v1139_v17, %v1143_v21 }
 0x3ca   : > { %7879 = vmatprep.mubr.msk.bf16.mxu1 %vm5644_vm1, %v9011_v39  ;;  %v7810_v39 = vcombine.low %v1100_v41, %v1104_v2  ;;  %v7859_v53 = vcombine.high %v1148_v61, %v1152_v26  ;;  %v7858_v37 = vcombine.low %v1148_v61, %v1152_v26  ;;  %v1163_v2 = vld [vmem:[%s8496_s12 + $0x1ad0] sm:$0xff] }
 0x3cb   : > { %6471 = vmatpush1.bf16.msra.mxu0 %v7792_v1  ;;  %v1159_v1 = vld [vmem:[%s8496_s12 + $0x1ab0] sm:$0xff] }
 0x3cc   : > { %6758 = vmatpush1.bf16.msra.mxu1 %v7794_v35  ;;  %6472 = vmatprep.subr.bf16.mxu0 %v7801_v34  ;;  %v1156_v35 = vld [vmem:[%s8496_s12 + $0x1a98] sm:$0xff]  ;;  %v7865_v38 = vcombine.high %v1155_v33, %v1159_v1 }
 0x3cd   : > { %6759 = vmatprep.subr.bf16.mxu1 %v7803_v36  ;;  %v1160_v34 = vld [vmem:[%s8496_s12 + $0x1ab8] sm:$0xff]  ;;  %v7856_v36 = vcombine.low %v1147_v25, %v1151_v24 }
 0x3ce   : > { %v7867_v41 = vcombine.high %v1156_v35, %v1160_v34  ;;  %v7866_v43 = vcombine.low %v1156_v35, %v1160_v34 }
 0x3cf   : > { %6473 = vmatpush1.bf16.msra.mxu0 %v7800_v29  ;;  %v1167_v29 = vld [vmem:[%s8496_s12 + $0x1af0] sm:$0xff] }
 0x3d0   : > { %6760 = vmatpush1.bf16.msra.mxu1 %v7802_v55  ;;  %6474 = vmatprep.subr.bf16.mxu0 %v7809_v18  ;;  %v1164_v55 = vld [vmem:[%s8496_s12 + $0x1ad8] sm:$0xff]  ;;  %v7873_v44 = vcombine.high %v1163_v2, %v1167_v29  ;;  %v7872_v47 = vcombine.low %v1163_v2, %v1167_v29 }
 0x3d1   : > { %6761 = vmatprep.subr.bf16.mxu1 %v7811_v42  ;;  %v1168_v18 = vld [vmem:[%s8496_s12 + $0x1af8] sm:$0xff]  ;;  %v7864_v42 = vcombine.low %v1155_v33, %v1159_v1  ;;  %v6822_v1 = vld [vmem:[%s9614_s5] sm:$0x3] }
 0x3d2   : > { %v7875_v46 = vcombine.high %v1164_v55, %v1168_v18 }
 0x3d3   : > { %6475 = vmatpush1.bf16.msra.mxu0 %v7808_v48  ;;  %v7874_v48 = vcombine.low %v1164_v55, %v1168_v18 }
 0x3d4   : > { %6762 = vmatpush1.bf16.msra.mxu1 %v7810_v39  ;;  %6476 = vmatprep.subr.bf16.mxu0 %v7817_v49  ;;  %v1191_v39 = vsub.s32 4, %v8536_v45  ;;  %v1199_v49 = vsub.s32 6, %v8536_v45 }
 0x3d5   : > { %6763 = vmatprep.subr.bf16.mxu1 %v7819_v51  ;;  %v1195_v51 = vsub.s32 5, %v8536_v45 }
 0x3d6   : > { %v1192_v54 = vrot.slane %v8085_v52, %v1191_v39  ;;  %v1200_v56 = vrot.slane %v8085_v52, %v1199_v49  ;;  %v6843_v10 = vrot.slane %v8086_v11, %v1191_v39 }
 0x3d7   : > { %6477 = vmatpush1.bf16.msra.mxu0 %v7816_v57  ;;  %v1196_v57 = vrot.slane %v8085_v52, %v1195_v51  ;;  %v6847_v9 = vrot.slane %v8086_v11, %v1195_v51 }
 0x3d8   : > { %6764 = vmatpush1.bf16.msra.mxu1 %v7818_v58  ;;  %6478 = vmatprep.subr.bf16.mxu0 %v7825_v59  ;;  %v1204_v58 = vrot.slane %v8085_v52, %v1203_v40 }
 0x3d9   : > { %6765 = vmatprep.subr.bf16.mxu1 %v7827_v62 }
 0x3db   : > { %6479 = vmatpush1.bf16.msra.mxu0 %v7824_v4  ;;  %v6851_v4 = vrot.slane %v8086_v11, %v1199_v49 }
 0x3dc   : > { %6766 = vmatpush1.bf16.msra.mxu1 %v7826_v5  ;;  %6480 = vmatprep.subr.bf16.mxu0 %v7833_v6 }
 0x3dd   : > { %6767 = vmatprep.subr.bf16.mxu1 %v7835_v31 }
 0x3df   : > { %6481 = vmatpush1.bf16.msra.mxu0 %v7832_v13 }
 0x3e0   : > { %6768 = vmatpush1.bf16.msra.mxu1 %v7834_v14  ;;  %6482 = vmatprep.subr.bf16.mxu0 %v7841_v15 }
 0x3e1   : > { %6769 = vmatprep.subr.bf16.mxu1 %v7843_v16 }
 0x3e3   : > { %6483 = vmatpush1.bf16.msra.mxu0 %v7840_v20  ;;  %v6855_v20 = vrot.slane %v8086_v11, %v1203_v40 }
 0x3e4   : > { %6770 = vmatpush1.bf16.msra.mxu1 %v7842_v7  ;;  %6484 = vmatprep.subr.bf16.mxu0 %v7849_v22 }
 0x3e5   : > { %6771 = vmatprep.subr.bf16.mxu1 %v7851_v23 }
 0x3e7   : > { %6485 = vmatpush1.bf16.msra.mxu0 %v7848_v27 }
 0x3e8   : > { %6772 = vmatpush1.bf16.msra.mxu1 %v7850_v28  ;;  %6486 = vmatprep.subr.bf16.mxu0 %v7857_v32 }
 0x3e9   : > { %6773 = vmatprep.subr.bf16.mxu1 %v7859_v53 }
 0x3eb   : > { %6487 = vmatpush1.bf16.msra.mxu0 %v7856_v36  ;;  %v7881_v36 = vld [vmem:[#allocation2] ss:$0 sm:$0xff] (!%p7880_p5) }
 0x3ec   : > { %6774 = vmatpush1.bf16.msra.mxu1 %v7858_v37  ;;  %6488 = vmatprep.subr.bf16.mxu0 %v7865_v38 }
 0x3ed   : > { %6775 = vmatprep.subr.bf16.mxu1 %v7867_v41 }
 0x3ef   : > { %6489 = vmatpush1.bf16.msra.mxu0 %v7864_v42 }
 0x3f0   : > { %6776 = vmatpush1.bf16.msra.mxu1 %v7866_v43  ;;  %6490 = vmatprep.subr.bf16.mxu0 %v7873_v44 }
 0x3f1   : > { %6777 = vmatprep.subr.bf16.mxu1 %v7875_v46 }
 0x3f3   : > { %6491 = vmatpush1.bf16.msra.mxu0 %v7872_v47 }
 0x3f4   : > { %6778 = vmatpush1.bf16.msra.mxu1 %v7874_v48 }
 0x3f6   : > { %6501 = vmatmul.mubr.bf16.vlgmr.msra.gmra.mrb[4].mxu0 %v9065_v30 }
 0x3f7   : > { %6788 = vmatmul.mubr.bf16.vlgmr.msra.gmra.mrb[4].mxu1 %v9065_v30 }
 0x4c9   : > { %v6502_v59 = vpop.f32.mrb[4].mxu0 }
 0x4ca   : > { %v7888_v62 = vadd.f32 %v6502_v59, %v1192_v54  ;;  %v6789_v63 = vpop.f32.mrb[4].mxu1  ;;  %v6504_v0 = vpop.f32.mrb[5].mxu0 }
 0x4cb   : > { %v7890_v30 = vadd.f32 %v6789_v63, %v1200_v56  ;;  %v7889_v5 = vadd.f32 %v6504_v0, %v1196_v57  ;;  %v6791_v6 = vpop.f32.mrb[5].mxu1  ;;  %v6506_v31 = vpop.f32.mrb[6].mxu0 }
 0x4cc   : > { %vm6800_vm7 = vcmp.gt.f32.partialorder %v7888_v62, 0.0  ;;  %v6808_v8 = vmul.f32 0.25, %v7888_v62  ;;  %v7891_v45 = vadd.f32 %v6791_v6, %v1204_v58  ;;  %v6793_v12 = vpop.f32.mrb[6].mxu1  ;;  %v6507_v60 = vpop.f32.mrb[7].mxu0 }
 0x4cd   : > { %vm6802_vm8 = vcmp.gt.f32.partialorder %v7890_v30, 0.0  ;;  %v6810_v13 = vmul.f32 0.25, %v7890_v30  ;;  %vm6801_vm9 = vcmp.gt.f32.partialorder %v7889_v5, 0.0  ;;  %v6809_v14 = vmul.f32 0.25, %v7889_v5  ;;  %v6794_v15 = vpop.f32.mrb[7].mxu1 }
 0x4ce   : > { %v6816_v16 = vsel %vm6800_vm7, %v7888_v62, %v6808_v8  ;;  %vm6803_vm10 = vcmp.gt.f32.partialorder %v7891_v45, 0.0  ;;  %v6811_v17 = vmul.f32 0.25, %v7891_v45 }
 0x4cf   : > { %v6868_v21 = vmul.f32 %v6843_v10, %v6816_v16  ;;  %v6818_v3 = vsel %vm6802_vm8, %v7890_v30, %v6810_v13  ;;  %v6817_v19 = vsel %vm6801_vm9, %v7889_v5, %v6809_v14 }
 0x4d0   : > { %v6869_v7 = vmul.f32 %v6847_v9, %v6817_v19  ;;  %v6819_v22 = vsel %vm6803_vm10, %v7891_v45, %v6811_v17  ;;  %v6870_v23 = vmul.f32 %v6851_v4, %v6818_v3 }
 0x4d1   : > { %v6880_v25 = vsel %vm6872_vm2, %v6868_v21, 0.0  ;;  %v6871_v26 = vmul.f32 %v6855_v20, %v6819_v22 }
 0x4d2   : > { %v6881_v24 = vadd.f32 %v6880_v25, %v9353_v50  ;;  %v6882_v61 = vsel %vm6872_vm2, %v6869_v7, 0.0  ;;  %v6884_v28 = vsel %vm6872_vm2, %v6870_v23, 0.0 }
 0x4d3   : > { %v6886_v53 = vsel %vm6872_vm2, %v6871_v26, 0.0 }
 0x4d4   : > { %v6883_v27 = vadd.f32 %v6882_v61, %v6881_v24 }
 0x4d6   : > { %v6885_v32 = vadd.f32 %v6884_v28, %v6883_v27 }
 0x4d8   : > { %v6887_v33 = vadd.f32 %v6886_v53, %v6885_v32 }
 0x4da   : > { %6888 = vadd.xlane.f32.xlu0 %v6887_v33 }
 0x564   : > { %6896 = sbr.rel (%p7880_p5) target bundleno = 1400 (0x578), region = 64 }
 0x567   : > { %v6889_v35 = vpop.xlane.xlu0 %6888 }
 0x568   : > { %v6890_v34 = vadd.f32 %v6889_v35, %v6822_v1 }
 0x56a   : > { %6892 = vst.msk [vmem:[%s9614_s5] sm:$0x3] %vm6891_vm11, %v6890_v34 }
 0x571   : > { %v6897_v50 = vld [vmem:[%s9614_s5] sm:$0x3] }
 0x572   : > { %v6905_v37 = vadd.f32 %v7881_v36, %v6897_v50 }
 0x574   : > { %vm6906_vm12 = vcmp.gt.f32.partialorder %v6905_v37, 0.0  ;;  %v6907_v38 = vmul.f32 0.25, %v6905_v37 }
 0x576   : > { %v6908_v41 = vsel %vm6906_vm12, %v6905_v37, %v6907_v38 }
 0x577   : > { %6909 = vst.msk [vmem:[%s9614_s5] sm:$0x3] %vm6891_vm11, %v6908_v41 }
 0x578 PF: > { %s22_s25 = sadd.s32 1, %s8263_s25   ;;  %s9632_s20 = smov %s8247_s21 }
 0x579   : > { %p19_p7 = scmp.ge.s32.totalorder %s22_s25, 6   ;;  %s9633_s21 = smov %s8251_s22 }
 0x57a   : > { %s9634_s22 = smov %s8455_s17  ;;  %s9635_s23 = smov %s8259_s24 }
 0x57b   : > { %s9636_s24 = smov %s9638_s14  ;;  %21 = sbr.rel (!%p19_p7) target bundleno = 9 (0x9), region = 99 }
 0x582   :  { %6921 = vsyncpa [#allocation4], 1 }
 0x583   :  { %6923 = vsyncpa [#allocation4 + $0x1], 1 }
 0x584   :  { %6924 = vsyncpa [#allocation6], 1 }
 0x585   :  { %6926 = vsyncpa [#allocation6 + $0x1], 1 }
 0x586   :  { %6927 = vsyncpa [#allocation9], 1 }

</bundles_post_ra>
